<compile_context>
chip_gen: v7x
topology: tpu7x:2x2x1
jax: 0.10.0
libtpu: 0.0.40
codegen_flags: <defaults>
</compile_context>

<pallas_src>
import jax
import jax.numpy as jnp
from jax.experimental import pallas as pl
from jax.experimental.pallas import tpu as pltpu
from jax.scipy.linalg import block_diag


# ---------------------------------------------------------------------------
# The fused kernel: FNet13 trunk + 2x AttentionModule2 (MLPs + conv head)
# ---------------------------------------------------------------------------
def _fnet13_kernel(
    # inputs
    vx_ref, ax_ref,
    fc1_w, fc1_b, afc_w, afc_b,
    wav_w, wav_b, fus_w, fus_b,
    attfc2_w, attfc2_b,
    vafc2_w, vafc2_b, fc3_row, fc3_b,
    am_u1w, am_u1b, am_u2w, am_u2b, am_c1w, am_c1b, am_c2w, am_c2b,
    # outputs
    slab_ref, scal_ref,
):
    f32 = jnp.float32
    bf16 = jnp.bfloat16

    def relu(t):
        return jnp.maximum(t, 0.0)

    def mm(x, w_ref, b_ref=None):
        # bf16 MXU inputs, f32 accumulation.
        r = jnp.dot(x.astype(bf16), w_ref[...], preferred_element_type=f32)
        return r if b_ref is None else r + b_ref[...]

    vx = vx_ref[...]
    ax_in = ax_ref[...]
    B = vx.shape[0]

    # FNet13 trunk (dropout layers are identity in eval mode).
    vo1 = relu(mm(vx, fc1_w, fc1_b))        # (B, F)
    ax2 = relu(mm(ax_in, afc_w, afc_b))     # (B, F)
    F = vo1.shape[1]
    NSF = am_u2b.shape[-1]                  # Ns * F (== 512)
    NS = NSF // F                           # num_of_subAttention (== 4)

    x_shared = jnp.concatenate([vo1, ax2], axis=-1)      # (B, 2F)
    x_shared_bf = x_shared.astype(bf16)

    # Both AMs' Ns sub-attention fc1's merged into ONE (B, 2F) @ (2F, 2*Ns*F) matmul.
    h_all = relu(jnp.dot(x_shared_bf, am_u1w[...], preferred_element_type=f32)
                 + am_u1b[...])                          # (B, 2*Ns*F)

    def attention_module(idx, v, h):
        # --- sub-attention fc2: block-diagonal (Ns*F, Ns*F) matmul ---
        u = jnp.dot(h.astype(bf16), am_u2w[idx], preferred_element_type=f32) + am_u2b[idx]
        # legacy F.softmax (no dim) on the 3-D (B, Ns, F) tensor -> dim 0 (batch)
        m = jnp.max(u, axis=0, keepdims=True)
        e = jnp.exp(u - m)
        att = e * pl.reciprocal(jnp.sum(e, axis=0, keepdims=True), approx=True)
        # rows of the (column-constant) conv input: row n = v * attention_unit_n
        rows = [v * att[:, n * F:(n + 1) * F] for n in range(NS)]              # (B, F) each
        zero = jnp.zeros_like(rows[0])
        pad = [zero] + rows + [zero]
        # --- conv_1 (3x3, pad 1) as ONE matmul: im2col over kh; kw taps were
        # pre-summed in the wrapper into 3 column classes (left/interior/right) ---
        xh = [jnp.concatenate([pad[r], pad[r + 1], pad[r + 2]], axis=-1)
              for r in range(NS)]                                               # (B, 3F)
        X = jnp.concatenate(xh, axis=0)                                         # (Ns*B, 3F)
        C = jnp.dot(X.astype(bf16), am_c1w[idx], preferred_element_type=f32) + am_c1b[idx]
        # --- maxpool (kernel = stride = Ns//2 = 2); 4-wide column map is [L, M, M, R] ---
        rmax = [jnp.maximum(C[(2 * i) * B:(2 * i + 1) * B, :],
                            C[(2 * i + 1) * B:(2 * i + 2) * B, :])
                for i in range(2)]                                              # (B, 3F)

        def cls(blk, c):
            return blk[:, c * F:(c + 1) * F]

        pooled_parts = []
        for i in range(2):
            pooled_parts.append(jnp.maximum(cls(rmax[i], 0), cls(rmax[i], 1)))  # cols {0,1}={L,M}
            pooled_parts.append(jnp.maximum(cls(rmax[i], 1), cls(rmax[i], 2)))  # cols {2,3}={M,R}
        pooled = jnp.concatenate(pooled_parts, axis=-1)                         # (B, 4F)
        # --- conv_2 + AdaptiveAvgPool(1,1) + bias folded into ONE (B,4F)@(4F,F) matmul ---
        total = jnp.dot(pooled.astype(bf16), am_c2w[idx],
                        preferred_element_type=f32) + am_c2b[idx]
        return relu(total)                                                      # (B, F)

    visual_att_x = attention_module(0, vo1, h_all[:, :NSF])
    audio_att_x = attention_module(1, ax2, h_all[:, NSF:])

    # WA(audio_att_x) + WV(visual_att_x) merged into one (2F, F) matmul.
    s = jnp.dot(jnp.concatenate([audio_att_x, visual_att_x], axis=-1).astype(bf16),
                wav_w[...], preferred_element_type=f32) + wav_b[...]
    attx = relu(mm(s, fus_w, fus_b))                                            # (B, F)

    # Heads: attfc2 separate (depends on attx, arrives last); vfc2+afc2 merged block-diag.
    za = relu(mm(attx, attfc2_w, attfc2_b))                                     # (B, 64)
    zva = relu(jnp.dot(x_shared_bf, vafc2_w[...],
                       preferred_element_type=f32) + vafc2_b[...])              # (B, 128)

    # fc3 heads (64 -> 1) as one elementwise multiply + three lane-segment sums.
    prod = jnp.concatenate([za, zva], axis=-1) * fc3_row[...]                   # (B, 192)
    H = za.shape[1]
    att_sum = jnp.sum(prod[:, :H], axis=-1, keepdims=True)
    v_sum = jnp.sum(prod[:, H:2 * H], axis=-1, keepdims=True)
    a_sum = jnp.sum(prod[:, 2 * H:], axis=-1, keepdims=True)

    slab_ref[...] = jnp.concatenate([attx, vo1, ax2], axis=-1)                  # (B, 3F)
    scal_ref[...] = jnp.concatenate([att_sum, v_sum, a_sum], axis=-1) + fc3_b[...]  # (B, 3)


@jax.jit
def fnet13_forward(vx, ax, packed):
    B = vx.shape[0]
    F = packed[0].shape[1]   # fc1_w is (in, 128)
    n_in = 2 + len(packed)
    out_shape = (
        jax.ShapeDtypeStruct((B, 3 * F), jnp.float32),   # [attx | vo1 | ax2]
        jax.ShapeDtypeStruct((B, 3), jnp.float32),       # [att_out | vout | aout]
    )
    vmem = pltpu.MemorySpace.VMEM
    slab, scal = pl.pallas_call(
        _fnet13_kernel,
        out_shape=out_shape,
        in_specs=[pl.BlockSpec(memory_space=vmem)] * n_in,
        out_specs=tuple(pl.BlockSpec(memory_space=vmem) for _ in out_shape),
        compiler_params=pltpu.CompilerParams(vmem_limit_bytes=32 * 1024 * 1024),
    )(vx, ax, *packed)
    att_out = scal[:, 0:1]
    vout = scal[:, 1:2]
    aout = scal[:, 2:3]
    attx = slab[:, 0:F]
    vo1 = slab[:, F:2 * F]
    ax2 = slab[:, 2 * F:3 * F]
    return att_out, vout, aout, attx, vo1, ax2


# ---------------------------------------------------------------------------
# Host-side weight packing (done once; pure preprocessing, no runtime cost)
# ---------------------------------------------------------------------------
def pack_params(raw):
    bf16 = jnp.bfloat16
    f32 = jnp.float32

    def lin(name):   # PyTorch (out, in) -> (in, out) bf16, bias -> (1, out) f32
        return (raw[name + "_w"].T.astype(bf16), raw[name + "_b"][None, :].astype(f32))

    fc1_w, fc1_b = lin("fc1")
    afc_w, afc_b = lin("afc")
    fus_w, fus_b = lin("fusion")
    attfc2_w, attfc2_b = lin("attfc2")

    # WA(audio) + WV(visual) == concat([audio, visual]) @ [[WA^T],[WV^T]] + (bWA + bWV)
    wav_w = jnp.concatenate([raw["WA_w"].T, raw["WV_w"].T], axis=0).astype(bf16)
    wav_b = (raw["WA_b"] + raw["WV_b"])[None, :].astype(f32)

    # vfc2 + afc2 merged into a block-diagonal (2F, 128) head on concat([vo1, ax2]).
    vafc2_w = block_diag(raw["vfc2_w"].T, raw["afc2_w"].T).astype(bf16)
    vafc2_b = jnp.concatenate([raw["vfc2_b"], raw["afc2_b"]])[None, :].astype(f32)
    # All three fc3 (64 -> 1) heads as one (1, 192) row vector + (1, 3) bias pack.
    fc3_row = jnp.concatenate([raw["attfc3_w"].reshape(-1),
                               raw["vfc3_w"].reshape(-1),
                               raw["afc3_w"].reshape(-1)]).reshape(1, -1).astype(f32)
    fc3_b = jnp.stack([raw["attfc3_b"].reshape(()),
                       raw["vfc3_b"].reshape(()),
                       raw["afc3_b"].reshape(())]).reshape(1, 3).astype(f32)

    def pack_am(am, swap_halves):
        Ns, Fo, F2 = am["u1_w"].shape            # (4, F, 2F)
        assert Ns == 4, "conv-head folding assumes num_of_subAttention == 4"
        # Packed unit fc1: x (B, 2F) @ (2F, Ns*F)
        u1w = jnp.transpose(am["u1_w"], (2, 0, 1)).reshape(F2, Ns * Fo)
        if swap_halves:
            # audio AM consumes concat([ax2, vo1]); re-route it to concat([vo1, ax2])
            u1w = jnp.concatenate([u1w[Fo:, :], u1w[:Fo, :]], axis=0)
        u1b = am["u1_b"].reshape(1, Ns * Fo)
        # Packed unit fc2: block-diagonal (Ns*F, Ns*F)
        u2w = block_diag(*[am["u2_w"][n].T for n in range(Ns)])
        u2b = am["u2_b"].reshape(1, Ns * Fo)
        # conv_1: OIHW -> HWIO, then collapse kw by column class (input constant over W):
        #   col 0 (left)  touches kw in {1,2}; cols 1,2 (interior) touch all kw;
        #   col 3 (right) touches kw in {0,1}.  Stack kh along the contraction axis.
        hwio1 = jnp.transpose(am["c1_w"], (2, 3, 1, 0))               # (3, 3, I, O)
        wl = (hwio1[:, 1] + hwio1[:, 2]).reshape(3 * Fo, Fo)
        wm = (hwio1[:, 0] + hwio1[:, 1] + hwio1[:, 2]).reshape(3 * Fo, Fo)
        wr = (hwio1[:, 0] + hwio1[:, 1]).reshape(3 * Fo, Fo)
        c1w = jnp.concatenate([wl, wm, wr], axis=1)                   # (3F, 3F)
        c1b = jnp.tile(am["c1_b"], 3).reshape(1, 3 * Fo)
        # conv_2 + avg-pool fold: W2_eff[i][j] = 0.25 * sum_{h,w in {0,1}} w2[i-h+1, j-w+1]
        # stacked row-wise (i,j) row-major into ONE (4F, F) weight.
        hwio2 = jnp.transpose(am["c2_w"], (2, 3, 1, 0))
        w2eff = jnp.concatenate(
            [0.25 * sum(hwio2[i - h + 1, j - w + 1] for h in range(2) for w in range(2))
             for i in range(2) for j in range(2)], axis=0)            # (4F, F)
        c2b = am["c2_b"].reshape(1, Fo)
        return u1w, u1b, u2w, u2b, c1w, c1b, w2eff, c2b

    v = pack_am(raw["visual_am"], swap_halves=False)
    a = pack_am(raw["audio_am"], swap_halves=True)
    am_u1w = jnp.concatenate([v[0], a[0]], axis=1).astype(bf16)   # (2F, 2*Ns*F)
    am_u1b = jnp.concatenate([v[1], a[1]], axis=1).astype(f32)    # (1, 2*Ns*F)
    am_u2w = jnp.stack([v[2], a[2]]).astype(bf16)                 # (2, Ns*F, Ns*F)
    am_u2b = jnp.stack([v[3], a[3]]).astype(f32)
    am_c1w = jnp.stack([v[4], a[4]]).astype(bf16)                 # (2, 3F, 3F)
    am_c1b = jnp.stack([v[5], a[5]]).astype(f32)
    am_c2w = jnp.stack([v[6], a[6]]).astype(bf16)                 # (2, 4F, F)
    am_c2b = jnp.stack([v[7], a[7]]).astype(f32)

    return (fc1_w, fc1_b, afc_w, afc_b,
            wav_w, wav_b, fus_w, fus_b,
            attfc2_w, attfc2_b,
            vafc2_w, vafc2_b, fc3_row, fc3_b,
            am_u1w, am_u1b, am_u2w, am_u2b, am_c1w, am_c1b, am_c2w, am_c2b)


# ---------------------------------------------------------------------------
# Pure-JAX reference (for a sanity check), high precision
# ---------------------------------------------------------------------------
_HI = jax.lax.Precision.HIGHEST


def _lin_ref(x, w, b):
    return jnp.dot(x, w.T, precision=_HI) + b


def _am_reference(vx, ax, am):
    Ns, F = am["u1_w"].shape[0], vx.shape[1]
    B = vx.shape[0]
    x = jnp.concatenate([vx, ax], axis=-1)
    units = [jnp.dot(jnp.maximum(_lin_ref(x, am["u1_w"][n], am["u1_b"][n]), 0.0),
                     am["u2_w"][n].T, precision=_HI) + am["u2_b"][n]
             for n in range(Ns)]
    concat = jnp.stack(units, axis=1)                        # (B, Ns, F)
    att = jax.nn.softmax(concat, axis=0)                     # legacy implicit dim -> 0
    vx_att = vx[:, None, :] * att                            # (B, Ns, F)
    img = jnp.broadcast_to(vx_att[:, :, None, :], (B, Ns, Ns, F))   # NHWC, constant over W
    cw1 = jnp.transpose(am["c1_w"], (2, 3, 1, 0))
    cw2 = jnp.transpose(am["c2_w"], (2, 3, 1, 0))
    c1 = jax.lax.conv_general_dilated(img, cw1, (1, 1), "SAME",
                                      dimension_numbers=("NHWC", "HWIO", "NHWC"),
                                      precision=_HI) + am["c1_b"]
    k = Ns // 2
    p = jax.lax.reduce_window(c1, -jnp.inf, jax.lax.max,
                              (1, k, k, 1), (1, k, k, 1), "VALID")
    c2 = jax.lax.conv_general_dilated(p, cw2, (1, 1), "SAME",
                                      dimension_numbers=("NHWC", "HWIO", "NHWC"),
                                      precision=_HI) + am["c2_b"]
    return jnp.maximum(jnp.mean(c2, axis=(1, 2)), 0.0)


def _fnet13_reference(vx, ax, raw):
    relu = lambda t: jnp.maximum(t, 0.0)
    vo1 = relu(_lin_ref(vx, raw["fc1_w"], raw["fc1_b"]))
    ax2 = relu(_lin_ref(ax, raw["afc_w"], raw["afc_b"]))
    visual_att_x = _am_reference(vo1, ax2, raw["visual_am"])
    audio_att_x = _am_reference(ax2, vo1, raw["audio_am"])
    attx = relu(_lin_ref(_lin_ref(audio_att_x, raw["WA_w"], raw["WA_b"])
                         + _lin_ref(visual_att_x, raw["WV_w"], raw["WV_b"]),
                         raw["fusion_w"], raw["fusion_b"]))
    att_out = _lin_ref(relu(_lin_ref(attx, raw["attfc2_w"], raw["attfc2_b"])),
                       raw["attfc3_w"], raw["attfc3_b"])
    vout = _lin_ref(relu(_lin_ref(vo1, raw["vfc2_w"], raw["vfc2_b"])),
                    raw["vfc3_w"], raw["vfc3_b"])
    aout = _lin_ref(relu(_lin_ref(ax2, raw["afc2_w"], raw["afc2_b"])),
                    raw["afc3_w"], raw["afc3_b"])
    return att_out, vout, aout, attx, vo1, ax2


# ---------------------------------------------------------------------------
# Deterministic synthetic parameters
# ---------------------------------------------------------------------------
def _init_linear(key, out_dim, in_dim):
    kw, kb = jax.random.split(key)
    w = jax.random.normal(kw, (out_dim, in_dim), jnp.float32) / jnp.sqrt(float(in_dim))
    b = jax.random.normal(kb, (out_dim,), jnp.float32) * 0.05
    return w, b


def _init_am(key, F, Ns):
    ks = jax.random.split(key, 6)
    u1_w = jax.random.normal(ks[0], (Ns, F, 2 * F), jnp.float32) / jnp.sqrt(2.0 * F)
    u1_b = jax.random.normal(ks[1], (Ns, F), jnp.float32) * 0.05
    u2_w = jax.random.normal(ks[2], (Ns, F, F), jnp.float32) / jnp.sqrt(float(F))
    u2_b = jax.random.normal(ks[3], (Ns, F), jnp.float32) * 0.05
    kc1 = jax.random.split(ks[4], 2)
    kc2 = jax.random.split(ks[5], 2)
    sc = 1.0 / jnp.sqrt(9.0 * F)
    c1_w = jax.random.normal(kc1[0], (F, F, 3, 3), jnp.float32) * sc   # nn.Conv2d OIHW
    c1_b = jax.random.normal(kc1[1], (F,), jnp.float32) * 0.05
    c2_w = jax.random.normal(kc2[0], (F, F, 3, 3), jnp.float32) * sc
    c2_b = jax.random.normal(kc2[1], (F,), jnp.float32) * 0.05
    return dict(u1_w=u1_w, u1_b=u1_b, u2_w=u2_w, u2_b=u2_b,
                c1_w=c1_w, c1_b=c1_b, c2_w=c2_w, c2_b=c2_b)


if __name__ == "__main__":
    B, IN_DIM, F, NS = 2, 512, 128, 4          # feature_dim=512 (default), AM(128), Ns=4
    key = jax.random.PRNGKey(0)
    keys = iter(jax.random.split(key, 16))

    raw = {}
    for name, (o, i) in [("fc1", (F, IN_DIM)), ("afc", (F, F)),
                         ("WA", (F, F)), ("WV", (F, F)), ("fusion", (F, F)),
                         ("attfc2", (64, F)), ("attfc3", (1, 64)),
                         ("vfc2", (64, F)), ("vfc3", (1, 64)),
                         ("afc2", (64, F)), ("afc3", (1, 64))]:
        w, b = _init_linear(next(keys), o, i)
        raw[name + "_w"], raw[name + "_b"] = w, b
    raw["visual_am"] = _init_am(next(keys), F, NS)
    raw["audio_am"] = _init_am(next(keys), F, NS)

    vx = jax.random.normal(next(keys), (B, IN_DIM), jnp.float32)
    ax = jax.random.normal(next(keys), (B, F), jnp.float32)

    packed = pack_params(raw)
    outs = jax.block_until_ready(fnet13_forward(vx, ax, packed))
    refs = jax.block_until_ready(_fnet13_reference(vx, ax, raw))

    # bf16 weights + approx reciprocal => ~1e-2-level perturbations; 5e-2 tolerance
    # still catches any shape/logic bug (those give O(1) errors).
    names = ["att_out", "vout", "aout", "attx", "vo1", "ax"]
    for name, o, r in zip(names, outs, refs):
        assert o.shape == r.shape and o.dtype == jnp.float32, (name, o.shape, r.shape)
        assert jnp.allclose(o, r, atol=5e-2, rtol=5e-2), (name, o, r)

    print("KERNEL_OK")
</pallas_src>

<mosaic_0001>
module attributes {stable_mosaic.version = 11 : i64} {
  func.func @_fnet13_kernel(%arg0: memref<2x512xf32, #tpu.memory_space<vmem>>, %arg1: memref<2x128xf32, #tpu.memory_space<vmem>>, %arg2: memref<512x128xbf16, #tpu.memory_space<vmem>>, %arg3: memref<1x128xf32, #tpu.memory_space<vmem>>, %arg4: memref<128x128xbf16, #tpu.memory_space<vmem>>, %arg5: memref<1x128xf32, #tpu.memory_space<vmem>>, %arg6: memref<256x128xbf16, #tpu.memory_space<vmem>>, %arg7: memref<1x128xf32, #tpu.memory_space<vmem>>, %arg8: memref<128x128xbf16, #tpu.memory_space<vmem>>, %arg9: memref<1x128xf32, #tpu.memory_space<vmem>>, %arg10: memref<128x64xbf16, #tpu.memory_space<vmem>>, %arg11: memref<1x64xf32, #tpu.memory_space<vmem>>, %arg12: memref<256x128xbf16, #tpu.memory_space<vmem>>, %arg13: memref<1x128xf32, #tpu.memory_space<vmem>>, %arg14: memref<1x192xf32, #tpu.memory_space<vmem>>, %arg15: memref<1x3xf32, #tpu.memory_space<vmem>>, %arg16: memref<256x1024xbf16, #tpu.memory_space<vmem>>, %arg17: memref<1x1024xf32, #tpu.memory_space<vmem>>, %arg18: memref<2x512x512xbf16, #tpu.memory_space<vmem>>, %arg19: memref<2x1x512xf32, #tpu.memory_space<vmem>>, %arg20: memref<2x384x384xbf16, #tpu.memory_space<vmem>>, %arg21: memref<2x1x384xf32, #tpu.memory_space<vmem>>, %arg22: memref<2x512x128xbf16, #tpu.memory_space<vmem>>, %arg23: memref<2x1x128xf32, #tpu.memory_space<vmem>>, %arg24: memref<2x384xf32, #tpu.memory_space<vmem>>, %arg25: memref<2x3xf32, #tpu.memory_space<vmem>>) attributes {dimension_semantics = [], scalar_prefetch = 0 : i64, scratch_operands = 0 : i64, tpu.core_type = #tpu.core_type<tc>} {
    %c0 = arith.constant 0 : index
    %c0_0 = arith.constant 0 : index
    %0 = vector.load %arg0[%c0, %c0_0] : memref<2x512xf32, #tpu.memory_space<vmem>>, vector<2x512xf32>
    %c0_1 = arith.constant 0 : index
    %c0_2 = arith.constant 0 : index
    %1 = vector.load %arg1[%c0_1, %c0_2] : memref<2x128xf32, #tpu.memory_space<vmem>>, vector<2x128xf32>
    %2 = arith.truncf %0 : vector<2x512xf32> to vector<2x512xbf16>
    %c0_3 = arith.constant 0 : index
    %c0_4 = arith.constant 0 : index
    %3 = vector.load %arg2[%c0_3, %c0_4] : memref<512x128xbf16, #tpu.memory_space<vmem>>, vector<512x128xbf16>
    %cst = arith.constant dense<0.000000e+00> : vector<2x128xf32>
    %4 = tpu.matmul %2, %3, %cst {dimension_numbers = #tpu.dot_dimension_numbers<[1], [0], [0], [1], [0, 0, 1, 1], [], []>} : vector<2x512xbf16>, vector<512x128xbf16>, vector<2x128xf32> -> vector<2x128xf32>
    %c0_5 = arith.constant 0 : index
    %c0_6 = arith.constant 0 : index
    %5 = vector.load %arg3[%c0_5, %c0_6] : memref<1x128xf32, #tpu.memory_space<vmem>>, vector<1x128xf32>
    %6 = vector.broadcast %5 : vector<1x128xf32> to vector<2x128xf32>
    %7 = arith.addf %4, %6 : vector<2x128xf32>
    %cst_7 = arith.constant 0.000000e+00 : f32
    %8 = vector.broadcast %cst_7 : f32 to vector<2x128xf32>
    %9 = arith.maximumf %7, %8 : vector<2x128xf32>
    %10 = arith.truncf %1 : vector<2x128xf32> to vector<2x128xbf16>
    %c0_8 = arith.constant 0 : index
    %c0_9 = arith.constant 0 : index
    %11 = vector.load %arg4[%c0_8, %c0_9] : memref<128x128xbf16, #tpu.memory_space<vmem>>, vector<128x128xbf16>
    %cst_10 = arith.constant dense<0.000000e+00> : vector<2x128xf32>
    %12 = tpu.matmul %10, %11, %cst_10 {dimension_numbers = #tpu.dot_dimension_numbers<[1], [0], [0], [1], [0, 0, 1, 1], [], []>} : vector<2x128xbf16>, vector<128x128xbf16>, vector<2x128xf32> -> vector<2x128xf32>
    %c0_11 = arith.constant 0 : index
    %c0_12 = arith.constant 0 : index
    %13 = vector.load %arg5[%c0_11, %c0_12] : memref<1x128xf32, #tpu.memory_space<vmem>>, vector<1x128xf32>
    %14 = vector.broadcast %13 : vector<1x128xf32> to vector<2x128xf32>
    %15 = arith.addf %12, %14 : vector<2x128xf32>
    %cst_13 = arith.constant 0.000000e+00 : f32
    %16 = vector.broadcast %cst_13 : f32 to vector<2x128xf32>
    %17 = arith.maximumf %15, %16 : vector<2x128xf32>
    %18 = tpu.concatenate %9, %17 in 1 : vector<2x128xf32>, vector<2x128xf32> -> vector<2x256xf32>
    %19 = arith.truncf %18 : vector<2x256xf32> to vector<2x256xbf16>
    %c0_14 = arith.constant 0 : index
    %c0_15 = arith.constant 0 : index
    %20 = vector.load %arg16[%c0_14, %c0_15] : memref<256x1024xbf16, #tpu.memory_space<vmem>>, vector<256x1024xbf16>
    %cst_16 = arith.constant dense<0.000000e+00> : vector<2x1024xf32>
    %21 = tpu.matmul %19, %20, %cst_16 {dimension_numbers = #tpu.dot_dimension_numbers<[1], [0], [0], [1], [0, 0, 1, 1], [], []>} : vector<2x256xbf16>, vector<256x1024xbf16>, vector<2x1024xf32> -> vector<2x1024xf32>
    %c0_17 = arith.constant 0 : index
    %c0_18 = arith.constant 0 : index
    %22 = vector.load %arg17[%c0_17, %c0_18] : memref<1x1024xf32, #tpu.memory_space<vmem>>, vector<1x1024xf32>
    %23 = vector.broadcast %22 : vector<1x1024xf32> to vector<2x1024xf32>
    %24 = arith.addf %21, %23 : vector<2x1024xf32>
    %cst_19 = arith.constant 0.000000e+00 : f32
    %25 = vector.broadcast %cst_19 : f32 to vector<2x1024xf32>
    %26 = arith.maximumf %24, %25 : vector<2x1024xf32>
    %27 = vector.extract_strided_slice %26 {offsets = [0, 0], sizes = [2, 512], strides = [1, 1]} : vector<2x1024xf32> to vector<2x512xf32>
    %28 = arith.truncf %27 : vector<2x512xf32> to vector<2x512xbf16>
    %c0_20 = arith.constant 0 : index
    %c0_21 = arith.constant 0 : index
    %c0_22 = arith.constant 0 : index
    %29 = vector.load %arg18[%c0_20, %c0_21, %c0_22] : memref<2x512x512xbf16, #tpu.memory_space<vmem>>, vector<1x512x512xbf16>
    %30 = vector.shape_cast %29 : vector<1x512x512xbf16> to vector<512x512xbf16>
    %cst_23 = arith.constant dense<0.000000e+00> : vector<2x512xf32>
    %31 = tpu.matmul %28, %30, %cst_23 {dimension_numbers = #tpu.dot_dimension_numbers<[1], [0], [0], [1], [0, 0, 1, 1], [], []>} : vector<2x512xbf16>, vector<512x512xbf16>, vector<2x512xf32> -> vector<2x512xf32>
    %c0_24 = arith.constant 0 : index
    %c0_25 = arith.constant 0 : index
    %c0_26 = arith.constant 0 : index
    %32 = vector.load %arg19[%c0_24, %c0_25, %c0_26] : memref<2x1x512xf32, #tpu.memory_space<vmem>>, vector<1x1x512xf32>
    %33 = vector.shape_cast %32 : vector<1x1x512xf32> to vector<1x512xf32>
    %34 = vector.broadcast %33 : vector<1x512xf32> to vector<2x512xf32>
    %35 = arith.addf %31, %34 : vector<2x512xf32>
    %cst_27 = arith.constant dense<0xFF800000> : vector<512xf32>
    %36 = vector.multi_reduction <maximumf>, %35, %cst_27 [0] : vector<2x512xf32> to vector<512xf32>
    %37 = vector.shape_cast %36 : vector<512xf32> to vector<1x512xf32>
    %38 = vector.broadcast %37 : vector<1x512xf32> to vector<2x512xf32>
    %39 = arith.subf %35, %38 : vector<2x512xf32>
    %40 = math.exp %39 : vector<2x512xf32>
    %cst_28 = arith.constant dense<0.000000e+00> : vector<512xf32>
    %41 = vector.multi_reduction <add>, %40, %cst_28 [0] : vector<2x512xf32> to vector<512xf32>
    %42 = vector.shape_cast %41 : vector<512xf32> to vector<1x512xf32>
    %43 = tpu.reciprocal %42 {approx = true} : vector<1x512xf32> -> vector<1x512xf32>
    %44 = vector.broadcast %43 : vector<1x512xf32> to vector<2x512xf32>
    %45 = arith.mulf %40, %44 : vector<2x512xf32>
    %46 = vector.extract_strided_slice %45 {offsets = [0, 0], sizes = [2, 128], strides = [1, 1]} : vector<2x512xf32> to vector<2x128xf32>
    %47 = arith.mulf %9, %46 : vector<2x128xf32>
    %48 = vector.extract_strided_slice %45 {offsets = [0, 128], sizes = [2, 128], strides = [1, 1]} : vector<2x512xf32> to vector<2x128xf32>
    %49 = arith.mulf %9, %48 : vector<2x128xf32>
    %50 = vector.extract_strided_slice %45 {offsets = [0, 256], sizes = [2, 128], strides = [1, 1]} : vector<2x512xf32> to vector<2x128xf32>
    %51 = arith.mulf %9, %50 : vector<2x128xf32>
    %52 = vector.extract_strided_slice %45 {offsets = [0, 384], sizes = [2, 128], strides = [1, 1]} : vector<2x512xf32> to vector<2x128xf32>
    %53 = arith.mulf %9, %52 : vector<2x128xf32>
    %cst_29 = arith.constant 0.000000e+00 : f32
    %54 = vector.broadcast %cst_29 : f32 to vector<2x128xf32>
    %55 = tpu.concatenate %54, %47, %49 in 1 : vector<2x128xf32>, vector<2x128xf32>, vector<2x128xf32> -> vector<2x384xf32>
    %56 = tpu.concatenate %47, %49, %51 in 1 : vector<2x128xf32>, vector<2x128xf32>, vector<2x128xf32> -> vector<2x384xf32>
    %57 = tpu.concatenate %49, %51, %53 in 1 : vector<2x128xf32>, vector<2x128xf32>, vector<2x128xf32> -> vector<2x384xf32>
    %58 = tpu.concatenate %51, %53, %54 in 1 : vector<2x128xf32>, vector<2x128xf32>, vector<2x128xf32> -> vector<2x384xf32>
    %59 = tpu.concatenate %55, %56, %57, %58 in 0 : vector<2x384xf32>, vector<2x384xf32>, vector<2x384xf32>, vector<2x384xf32> -> vector<8x384xf32>
    %60 = arith.truncf %59 : vector<8x384xf32> to vector<8x384xbf16>
    %c0_30 = arith.constant 0 : index
    %c0_31 = arith.constant 0 : index
    %c0_32 = arith.constant 0 : index
    %61 = vector.load %arg20[%c0_30, %c0_31, %c0_32] : memref<2x384x384xbf16, #tpu.memory_space<vmem>>, vector<1x384x384xbf16>
    %62 = vector.shape_cast %61 : vector<1x384x384xbf16> to vector<384x384xbf16>
    %cst_33 = arith.constant dense<0.000000e+00> : vector<8x384xf32>
    %63 = tpu.matmul %60, %62, %cst_33 {dimension_numbers = #tpu.dot_dimension_numbers<[1], [0], [0], [1], [0, 0, 1, 1], [], []>} : vector<8x384xbf16>, vector<384x384xbf16>, vector<8x384xf32> -> vector<8x384xf32>
    %c0_34 = arith.constant 0 : index
    %c0_35 = arith.constant 0 : index
    %c0_36 = arith.constant 0 : index
    %64 = vector.load %arg21[%c0_34, %c0_35, %c0_36] : memref<2x1x384xf32, #tpu.memory_space<vmem>>, vector<1x1x384xf32>
    %65 = vector.shape_cast %64 : vector<1x1x384xf32> to vector<1x384xf32>
    %66 = vector.broadcast %65 : vector<1x384xf32> to vector<8x384xf32>
    %67 = arith.addf %63, %66 : vector<8x384xf32>
    %68 = vector.extract_strided_slice %67 {offsets = [0, 0], sizes = [2, 384], strides = [1, 1]} : vector<8x384xf32> to vector<2x384xf32>
    %69 = vector.extract_strided_slice %67 {offsets = [2, 0], sizes = [2, 384], strides = [1, 1]} : vector<8x384xf32> to vector<2x384xf32>
    %70 = arith.maximumf %68, %69 : vector<2x384xf32>
    %71 = vector.extract_strided_slice %67 {offsets = [4, 0], sizes = [2, 384], strides = [1, 1]} : vector<8x384xf32> to vector<2x384xf32>
    %72 = vector.extract_strided_slice %67 {offsets = [6, 0], sizes = [2, 384], strides = [1, 1]} : vector<8x384xf32> to vector<2x384xf32>
    %73 = arith.maximumf %71, %72 : vector<2x384xf32>
    %74 = vector.extract_strided_slice %70 {offsets = [0, 0], sizes = [2, 128], strides = [1, 1]} : vector<2x384xf32> to vector<2x128xf32>
    %75 = vector.extract_strided_slice %70 {offsets = [0, 128], sizes = [2, 128], strides = [1, 1]} : vector<2x384xf32> to vector<2x128xf32>
    %76 = arith.maximumf %74, %75 : vector<2x128xf32>
    %77 = vector.extract_strided_slice %70 {offsets = [0, 128], sizes = [2, 128], strides = [1, 1]} : vector<2x384xf32> to vector<2x128xf32>
    %78 = vector.extract_strided_slice %70 {offsets = [0, 256], sizes = [2, 128], strides = [1, 1]} : vector<2x384xf32> to vector<2x128xf32>
    %79 = arith.maximumf %77, %78 : vector<2x128xf32>
    %80 = vector.extract_strided_slice %73 {offsets = [0, 0], sizes = [2, 128], strides = [1, 1]} : vector<2x384xf32> to vector<2x128xf32>
    %81 = vector.extract_strided_slice %73 {offsets = [0, 128], sizes = [2, 128], strides = [1, 1]} : vector<2x384xf32> to vector<2x128xf32>
    %82 = arith.maximumf %80, %81 : vector<2x128xf32>
    %83 = vector.extract_strided_slice %73 {offsets = [0, 128], sizes = [2, 128], strides = [1, 1]} : vector<2x384xf32> to vector<2x128xf32>
    %84 = vector.extract_strided_slice %73 {offsets = [0, 256], sizes = [2, 128], strides = [1, 1]} : vector<2x384xf32> to vector<2x128xf32>
    %85 = arith.maximumf %83, %84 : vector<2x128xf32>
    %86 = tpu.concatenate %76, %79, %82, %85 in 1 : vector<2x128xf32>, vector<2x128xf32>, vector<2x128xf32>, vector<2x128xf32> -> vector<2x512xf32>
    %87 = arith.truncf %86 : vector<2x512xf32> to vector<2x512xbf16>
    %c0_37 = arith.constant 0 : index
    %c0_38 = arith.constant 0 : index
    %c0_39 = arith.constant 0 : index
    %88 = vector.load %arg22[%c0_37, %c0_38, %c0_39] : memref<2x512x128xbf16, #tpu.memory_space<vmem>>, vector<1x512x128xbf16>
    %89 = vector.shape_cast %88 : vector<1x512x128xbf16> to vector<512x128xbf16>
    %cst_40 = arith.constant dense<0.000000e+00> : vector<2x128xf32>
    %90 = tpu.matmul %87, %89, %cst_40 {dimension_numbers = #tpu.dot_dimension_numbers<[1], [0], [0], [1], [0, 0, 1, 1], [], []>} : vector<2x512xbf16>, vector<512x128xbf16>, vector<2x128xf32> -> vector<2x128xf32>
    %c0_41 = arith.constant 0 : index
    %c0_42 = arith.constant 0 : index
    %c0_43 = arith.constant 0 : index
    %91 = vector.load %arg23[%c0_41, %c0_42, %c0_43] : memref<2x1x128xf32, #tpu.memory_space<vmem>>, vector<1x1x128xf32>
    %92 = vector.shape_cast %91 : vector<1x1x128xf32> to vector<1x128xf32>
    %93 = vector.broadcast %92 : vector<1x128xf32> to vector<2x128xf32>
    %94 = arith.addf %90, %93 : vector<2x128xf32>
    %cst_44 = arith.constant 0.000000e+00 : f32
    %95 = vector.broadcast %cst_44 : f32 to vector<2x128xf32>
    %96 = arith.maximumf %94, %95 : vector<2x128xf32>
    %97 = vector.extract_strided_slice %26 {offsets = [0, 512], sizes = [2, 512], strides = [1, 1]} : vector<2x1024xf32> to vector<2x512xf32>
    %98 = arith.truncf %97 : vector<2x512xf32> to vector<2x512xbf16>
    %c1 = arith.constant 1 : index
    %c0_45 = arith.constant 0 : index
    %c0_46 = arith.constant 0 : index
    %99 = vector.load %arg18[%c1, %c0_45, %c0_46] : memref<2x512x512xbf16, #tpu.memory_space<vmem>>, vector<1x512x512xbf16>
    %100 = vector.shape_cast %99 : vector<1x512x512xbf16> to vector<512x512xbf16>
    %cst_47 = arith.constant dense<0.000000e+00> : vector<2x512xf32>
    %101 = tpu.matmul %98, %100, %cst_47 {dimension_numbers = #tpu.dot_dimension_numbers<[1], [0], [0], [1], [0, 0, 1, 1], [], []>} : vector<2x512xbf16>, vector<512x512xbf16>, vector<2x512xf32> -> vector<2x512xf32>
    %c1_48 = arith.constant 1 : index
    %c0_49 = arith.constant 0 : index
    %c0_50 = arith.constant 0 : index
    %102 = vector.load %arg19[%c1_48, %c0_49, %c0_50] : memref<2x1x512xf32, #tpu.memory_space<vmem>>, vector<1x1x512xf32>
    %103 = vector.shape_cast %102 : vector<1x1x512xf32> to vector<1x512xf32>
    %104 = vector.broadcast %103 : vector<1x512xf32> to vector<2x512xf32>
    %105 = arith.addf %101, %104 : vector<2x512xf32>
    %cst_51 = arith.constant dense<0xFF800000> : vector<512xf32>
    %106 = vector.multi_reduction <maximumf>, %105, %cst_51 [0] : vector<2x512xf32> to vector<512xf32>
    %107 = vector.shape_cast %106 : vector<512xf32> to vector<1x512xf32>
    %108 = vector.broadcast %107 : vector<1x512xf32> to vector<2x512xf32>
    %109 = arith.subf %105, %108 : vector<2x512xf32>
    %110 = math.exp %109 : vector<2x512xf32>
    %cst_52 = arith.constant dense<0.000000e+00> : vector<512xf32>
    %111 = vector.multi_reduction <add>, %110, %cst_52 [0] : vector<2x512xf32> to vector<512xf32>
    %112 = vector.shape_cast %111 : vector<512xf32> to vector<1x512xf32>
    %113 = tpu.reciprocal %112 {approx = true} : vector<1x512xf32> -> vector<1x512xf32>
    %114 = vector.broadcast %113 : vector<1x512xf32> to vector<2x512xf32>
    %115 = arith.mulf %110, %114 : vector<2x512xf32>
    %116 = vector.extract_strided_slice %115 {offsets = [0, 0], sizes = [2, 128], strides = [1, 1]} : vector<2x512xf32> to vector<2x128xf32>
    %117 = arith.mulf %17, %116 : vector<2x128xf32>
    %118 = vector.extract_strided_slice %115 {offsets = [0, 128], sizes = [2, 128], strides = [1, 1]} : vector<2x512xf32> to vector<2x128xf32>
    %119 = arith.mulf %17, %118 : vector<2x128xf32>
    %120 = vector.extract_strided_slice %115 {offsets = [0, 256], sizes = [2, 128], strides = [1, 1]} : vector<2x512xf32> to vector<2x128xf32>
    %121 = arith.mulf %17, %120 : vector<2x128xf32>
    %122 = vector.extract_strided_slice %115 {offsets = [0, 384], sizes = [2, 128], strides = [1, 1]} : vector<2x512xf32> to vector<2x128xf32>
    %123 = arith.mulf %17, %122 : vector<2x128xf32>
    %cst_53 = arith.constant 0.000000e+00 : f32
    %124 = vector.broadcast %cst_53 : f32 to vector<2x128xf32>
    %125 = tpu.concatenate %124, %117, %119 in 1 : vector<2x128xf32>, vector<2x128xf32>, vector<2x128xf32> -> vector<2x384xf32>
    %126 = tpu.concatenate %117, %119, %121 in 1 : vector<2x128xf32>, vector<2x128xf32>, vector<2x128xf32> -> vector<2x384xf32>
    %127 = tpu.concatenate %119, %121, %123 in 1 : vector<2x128xf32>, vector<2x128xf32>, vector<2x128xf32> -> vector<2x384xf32>
    %128 = tpu.concatenate %121, %123, %124 in 1 : vector<2x128xf32>, vector<2x128xf32>, vector<2x128xf32> -> vector<2x384xf32>
    %129 = tpu.concatenate %125, %126, %127, %128 in 0 : vector<2x384xf32>, vector<2x384xf32>, vector<2x384xf32>, vector<2x384xf32> -> vector<8x384xf32>
    %130 = arith.truncf %129 : vector<8x384xf32> to vector<8x384xbf16>
    %c1_54 = arith.constant 1 : index
    %c0_55 = arith.constant 0 : index
    %c0_56 = arith.constant 0 : index
    %131 = vector.load %arg20[%c1_54, %c0_55, %c0_56] : memref<2x384x384xbf16, #tpu.memory_space<vmem>>, vector<1x384x384xbf16>
    %132 = vector.shape_cast %131 : vector<1x384x384xbf16> to vector<384x384xbf16>
    %cst_57 = arith.constant dense<0.000000e+00> : vector<8x384xf32>
    %133 = tpu.matmul %130, %132, %cst_57 {dimension_numbers = #tpu.dot_dimension_numbers<[1], [0], [0], [1], [0, 0, 1, 1], [], []>} : vector<8x384xbf16>, vector<384x384xbf16>, vector<8x384xf32> -> vector<8x384xf32>
    %c1_58 = arith.constant 1 : index
    %c0_59 = arith.constant 0 : index
    %c0_60 = arith.constant 0 : index
    %134 = vector.load %arg21[%c1_58, %c0_59, %c0_60] : memref<2x1x384xf32, #tpu.memory_space<vmem>>, vector<1x1x384xf32>
    %135 = vector.shape_cast %134 : vector<1x1x384xf32> to vector<1x384xf32>
    %136 = vector.broadcast %135 : vector<1x384xf32> to vector<8x384xf32>
    %137 = arith.addf %133, %136 : vector<8x384xf32>
    %138 = vector.extract_strided_slice %137 {offsets = [0, 0], sizes = [2, 384], strides = [1, 1]} : vector<8x384xf32> to vector<2x384xf32>
    %139 = vector.extract_strided_slice %137 {offsets = [2, 0], sizes = [2, 384], strides = [1, 1]} : vector<8x384xf32> to vector<2x384xf32>
    %140 = arith.maximumf %138, %139 : vector<2x384xf32>
    %141 = vector.extract_strided_slice %137 {offsets = [4, 0], sizes = [2, 384], strides = [1, 1]} : vector<8x384xf32> to vector<2x384xf32>
    %142 = vector.extract_strided_slice %137 {offsets = [6, 0], sizes = [2, 384], strides = [1, 1]} : vector<8x384xf32> to vector<2x384xf32>
    %143 = arith.maximumf %141, %142 : vector<2x384xf32>
    %144 = vector.extract_strided_slice %140 {offsets = [0, 0], sizes = [2, 128], strides = [1, 1]} : vector<2x384xf32> to vector<2x128xf32>
    %145 = vector.extract_strided_slice %140 {offsets = [0, 128], sizes = [2, 128], strides = [1, 1]} : vector<2x384xf32> to vector<2x128xf32>
    %146 = arith.maximumf %144, %145 : vector<2x128xf32>
    %147 = vector.extract_strided_slice %140 {offsets = [0, 128], sizes = [2, 128], strides = [1, 1]} : vector<2x384xf32> to vector<2x128xf32>
    %148 = vector.extract_strided_slice %140 {offsets = [0, 256], sizes = [2, 128], strides = [1, 1]} : vector<2x384xf32> to vector<2x128xf32>
    %149 = arith.maximumf %147, %148 : vector<2x128xf32>
    %150 = vector.extract_strided_slice %143 {offsets = [0, 0], sizes = [2, 128], strides = [1, 1]} : vector<2x384xf32> to vector<2x128xf32>
    %151 = vector.extract_strided_slice %143 {offsets = [0, 128], sizes = [2, 128], strides = [1, 1]} : vector<2x384xf32> to vector<2x128xf32>
    %152 = arith.maximumf %150, %151 : vector<2x128xf32>
    %153 = vector.extract_strided_slice %143 {offsets = [0, 128], sizes = [2, 128], strides = [1, 1]} : vector<2x384xf32> to vector<2x128xf32>
    %154 = vector.extract_strided_slice %143 {offsets = [0, 256], sizes = [2, 128], strides = [1, 1]} : vector<2x384xf32> to vector<2x128xf32>
    %155 = arith.maximumf %153, %154 : vector<2x128xf32>
    %156 = tpu.concatenate %146, %149, %152, %155 in 1 : vector<2x128xf32>, vector<2x128xf32>, vector<2x128xf32>, vector<2x128xf32> -> vector<2x512xf32>
    %157 = arith.truncf %156 : vector<2x512xf32> to vector<2x512xbf16>
    %c1_61 = arith.constant 1 : index
    %c0_62 = arith.constant 0 : index
    %c0_63 = arith.constant 0 : index
    %158 = vector.load %arg22[%c1_61, %c0_62, %c0_63] : memref<2x512x128xbf16, #tpu.memory_space<vmem>>, vector<1x512x128xbf16>
    %159 = vector.shape_cast %158 : vector<1x512x128xbf16> to vector<512x128xbf16>
    %cst_64 = arith.constant dense<0.000000e+00> : vector<2x128xf32>
    %160 = tpu.matmul %157, %159, %cst_64 {dimension_numbers = #tpu.dot_dimension_numbers<[1], [0], [0], [1], [0, 0, 1, 1], [], []>} : vector<2x512xbf16>, vector<512x128xbf16>, vector<2x128xf32> -> vector<2x128xf32>
    %c1_65 = arith.constant 1 : index
    %c0_66 = arith.constant 0 : index
    %c0_67 = arith.constant 0 : index
    %161 = vector.load %arg23[%c1_65, %c0_66, %c0_67] : memref<2x1x128xf32, #tpu.memory_space<vmem>>, vector<1x1x128xf32>
    %162 = vector.shape_cast %161 : vector<1x1x128xf32> to vector<1x128xf32>
    %163 = vector.broadcast %162 : vector<1x128xf32> to vector<2x128xf32>
    %164 = arith.addf %160, %163 : vector<2x128xf32>
    %cst_68 = arith.constant 0.000000e+00 : f32
    %165 = vector.broadcast %cst_68 : f32 to vector<2x128xf32>
    %166 = arith.maximumf %164, %165 : vector<2x128xf32>
    %167 = tpu.concatenate %166, %96 in 1 : vector<2x128xf32>, vector<2x128xf32> -> vector<2x256xf32>
    %168 = arith.truncf %167 : vector<2x256xf32> to vector<2x256xbf16>
    %c0_69 = arith.constant 0 : index
    %c0_70 = arith.constant 0 : index
    %169 = vector.load %arg6[%c0_69, %c0_70] : memref<256x128xbf16, #tpu.memory_space<vmem>>, vector<256x128xbf16>
    %cst_71 = arith.constant dense<0.000000e+00> : vector<2x128xf32>
    %170 = tpu.matmul %168, %169, %cst_71 {dimension_numbers = #tpu.dot_dimension_numbers<[1], [0], [0], [1], [0, 0, 1, 1], [], []>} : vector<2x256xbf16>, vector<256x128xbf16>, vector<2x128xf32> -> vector<2x128xf32>
    %c0_72 = arith.constant 0 : index
    %c0_73 = arith.constant 0 : index
    %171 = vector.load %arg7[%c0_72, %c0_73] : memref<1x128xf32, #tpu.memory_space<vmem>>, vector<1x128xf32>
    %172 = vector.broadcast %171 : vector<1x128xf32> to vector<2x128xf32>
    %173 = arith.addf %170, %172 : vector<2x128xf32>
    %174 = arith.truncf %173 : vector<2x128xf32> to vector<2x128xbf16>
    %c0_74 = arith.constant 0 : index
    %c0_75 = arith.constant 0 : index
    %175 = vector.load %arg8[%c0_74, %c0_75] : memref<128x128xbf16, #tpu.memory_space<vmem>>, vector<128x128xbf16>
    %cst_76 = arith.constant dense<0.000000e+00> : vector<2x128xf32>
    %176 = tpu.matmul %174, %175, %cst_76 {dimension_numbers = #tpu.dot_dimension_numbers<[1], [0], [0], [1], [0, 0, 1, 1], [], []>} : vector<2x128xbf16>, vector<128x128xbf16>, vector<2x128xf32> -> vector<2x128xf32>
    %c0_77 = arith.constant 0 : index
    %c0_78 = arith.constant 0 : index
    %177 = vector.load %arg9[%c0_77, %c0_78] : memref<1x128xf32, #tpu.memory_space<vmem>>, vector<1x128xf32>
    %178 = vector.broadcast %177 : vector<1x128xf32> to vector<2x128xf32>
    %179 = arith.addf %176, %178 : vector<2x128xf32>
    %cst_79 = arith.constant 0.000000e+00 : f32
    %180 = vector.broadcast %cst_79 : f32 to vector<2x128xf32>
    %181 = arith.maximumf %179, %180 : vector<2x128xf32>
    %182 = arith.truncf %181 : vector<2x128xf32> to vector<2x128xbf16>
    %c0_80 = arith.constant 0 : index
    %c0_81 = arith.constant 0 : index
    %183 = vector.load %arg10[%c0_80, %c0_81] : memref<128x64xbf16, #tpu.memory_space<vmem>>, vector<128x64xbf16>
    %cst_82 = arith.constant dense<0.000000e+00> : vector<2x64xf32>
    %184 = tpu.matmul %182, %183, %cst_82 {dimension_numbers = #tpu.dot_dimension_numbers<[1], [0], [0], [1], [0, 0, 1, 1], [], []>} : vector<2x128xbf16>, vector<128x64xbf16>, vector<2x64xf32> -> vector<2x64xf32>
    %c0_83 = arith.constant 0 : index
    %c0_84 = arith.constant 0 : index
    %185 = vector.load %arg11[%c0_83, %c0_84] : memref<1x64xf32, #tpu.memory_space<vmem>>, vector<1x64xf32>
    %186 = vector.broadcast %185 : vector<1x64xf32> to vector<2x64xf32>
    %187 = arith.addf %184, %186 : vector<2x64xf32>
    %cst_85 = arith.constant 0.000000e+00 : f32
    %188 = vector.broadcast %cst_85 : f32 to vector<2x64xf32>
    %189 = arith.maximumf %187, %188 : vector<2x64xf32>
    %c0_86 = arith.constant 0 : index
    %c0_87 = arith.constant 0 : index
    %190 = vector.load %arg12[%c0_86, %c0_87] : memref<256x128xbf16, #tpu.memory_space<vmem>>, vector<256x128xbf16>
    %cst_88 = arith.constant dense<0.000000e+00> : vector<2x128xf32>
    %191 = tpu.matmul %19, %190, %cst_88 {dimension_numbers = #tpu.dot_dimension_numbers<[1], [0], [0], [1], [0, 0, 1, 1], [], []>} : vector<2x256xbf16>, vector<256x128xbf16>, vector<2x128xf32> -> vector<2x128xf32>
    %c0_89 = arith.constant 0 : index
    %c0_90 = arith.constant 0 : index
    %192 = vector.load %arg13[%c0_89, %c0_90] : memref<1x128xf32, #tpu.memory_space<vmem>>, vector<1x128xf32>
    %193 = vector.broadcast %192 : vector<1x128xf32> to vector<2x128xf32>
    %194 = arith.addf %191, %193 : vector<2x128xf32>
    %cst_91 = arith.constant 0.000000e+00 : f32
    %195 = vector.broadcast %cst_91 : f32 to vector<2x128xf32>
    %196 = arith.maximumf %194, %195 : vector<2x128xf32>
    %197 = tpu.concatenate %189, %196 in 1 : vector<2x64xf32>, vector<2x128xf32> -> vector<2x192xf32>
    %c0_92 = arith.constant 0 : index
    %c0_93 = arith.constant 0 : index
    %198 = vector.load %arg14[%c0_92, %c0_93] : memref<1x192xf32, #tpu.memory_space<vmem>>, vector<1x192xf32>
    %199 = vector.broadcast %198 : vector<1x192xf32> to vector<2x192xf32>
    %200 = arith.mulf %197, %199 : vector<2x192xf32>
    %201 = vector.extract_strided_slice %200 {offsets = [0, 0], sizes = [2, 64], strides = [1, 1]} : vector<2x192xf32> to vector<2x64xf32>
    %cst_94 = arith.constant dense<0.000000e+00> : vector<2xf32>
    %202 = vector.multi_reduction <add>, %201, %cst_94 [1] : vector<2x64xf32> to vector<2xf32>
    %203 = vector.shape_cast %202 : vector<2xf32> to vector<2x1xf32>
    %204 = vector.extract_strided_slice %200 {offsets = [0, 64], sizes = [2, 64], strides = [1, 1]} : vector<2x192xf32> to vector<2x64xf32>
    %cst_95 = arith.constant dense<0.000000e+00> : vector<2xf32>
    %205 = vector.multi_reduction <add>, %204, %cst_95 [1] : vector<2x64xf32> to vector<2xf32>
    %206 = vector.shape_cast %205 : vector<2xf32> to vector<2x1xf32>
    %207 = vector.extract_strided_slice %200 {offsets = [0, 128], sizes = [2, 64], strides = [1, 1]} : vector<2x192xf32> to vector<2x64xf32>
    %cst_96 = arith.constant dense<0.000000e+00> : vector<2xf32>
    %208 = vector.multi_reduction <add>, %207, %cst_96 [1] : vector<2x64xf32> to vector<2xf32>
    %209 = vector.shape_cast %208 : vector<2xf32> to vector<2x1xf32>
    %210 = tpu.concatenate %181, %9, %17 in 1 : vector<2x128xf32>, vector<2x128xf32>, vector<2x128xf32> -> vector<2x384xf32>
    %c0_97 = arith.constant 0 : index
    %c0_98 = arith.constant 0 : index
    %211 = vector.load %arg24[%c0_97, %c0_98] : memref<2x384xf32, #tpu.memory_space<vmem>>, vector<2x384xf32>
    tpu.vector_store %arg24[%c0_97, %c0_98], %210 {strides = array<i32>} : memref<2x384xf32, #tpu.memory_space<vmem>>, vector<2x384xf32>,
    %212 = tpu.concatenate %203, %206, %209 in 1 : vector<2x1xf32>, vector<2x1xf32>, vector<2x1xf32> -> vector<2x3xf32>
    %c0_99 = arith.constant 0 : index
    %c0_100 = arith.constant 0 : index
    %213 = vector.load %arg15[%c0_99, %c0_100] : memref<1x3xf32, #tpu.memory_space<vmem>>, vector<1x3xf32>
    %214 = vector.broadcast %213 : vector<1x3xf32> to vector<2x3xf32>
    %215 = arith.addf %212, %214 : vector<2x3xf32>
    %c0_101 = arith.constant 0 : index
    %c0_102 = arith.constant 0 : index
    %216 = vector.load %arg25[%c0_101, %c0_102] : memref<2x3xf32, #tpu.memory_space<vmem>>, vector<2x3xf32>
    tpu.vector_store %arg25[%c0_101, %c0_102], %215 {strides = array<i32>} : memref<2x3xf32, #tpu.memory_space<vmem>>, vector<2x3xf32>,
    return
  }
}

</mosaic_0001>

<bundles_post_ra>
// kernel: fnet13_forward.1
= control target key start
LH: loop header
LB: loop body
LE: loop exit
PB: predicated region body
PF: predicated region fallthrough
CT: control target
= control target key end

     0   :  { %s9601_s0 = inlined_call_operand.vmem [shape: f32[2,512], index: 0, kind: input, shape index: {}]   ;;  %s9602_s1 = inlined_call_operand.hbm [shape: f32[2,128], index: 1, kind: input, shape index: {}]   ;;  %s9603_s2 = inlined_call_operand.hbm [shape: bf16[512,128], index: 2, kind: input, shape index: {}]   ;;  %s9604_s3 = inlined_call_operand.hbm [shape: f32[1,128], index: 3, kind: input, shape index: {}]   ;;  %s9605_s4 = inlined_call_operand.hbm [shape: bf16[128,128], index: 4, kind: input, shape index: {}]   ;;  %s9606_s5 = inlined_call_operand.hbm [shape: f32[1,128], index: 5, kind: input, shape index: {}]   ;;  %s9607_s6 = inlined_call_operand.hbm [shape: bf16[256,128], index: 6, kind: input, shape index: {}]   ;;  %s9608_s7 = inlined_call_operand.hbm [shape: f32[1,128], index: 7, kind: input, shape index: {}]   ;;  %s9609_s8 = inlined_call_operand.hbm [shape: bf16[128,128], index: 8, kind: input, shape index: {}]   ;;  %s9610_s9 = inlined_call_operand.hbm [shape: f32[1,128], index: 9, kind: input, shape index: {}]   ;;  %s9611_s10 = inlined_call_operand.vmem [shape: bf16[128,64], index: 10, kind: input, shape index: {}]   ;;  %s9612_s11 = inlined_call_operand.hbm [shape: f32[1,64], index: 11, kind: input, shape index: {}]   ;;  %s9613_s12 = inlined_call_operand.vmem [shape: bf16[256,128], index: 12, kind: input, shape index: {}]   ;;  %s9614_s13 = inlined_call_operand.hbm [shape: f32[1,128], index: 13, kind: input, shape index: {}]   ;;  %s9615_s14 = inlined_call_operand.hbm [shape: f32[1,192], index: 14, kind: input, shape index: {}]   ;;  %s9616_s15 = inlined_call_operand.hbm [shape: f32[1,3], index: 15, kind: input, shape index: {}]   ;;  %s9617_s16 = inlined_call_operand.hbm [shape: bf16[256,1024], index: 16, kind: input, shape index: {}]   ;;  %s9618_s17 = inlined_call_operand.vmem [shape: f32[1,1024], index: 17, kind: input, shape index: {}]   ;;  %s9619_s18 = inlined_call_operand.hbm [shape: bf16[2,512,512], index: 18, kind: input, shape index: {}]   ;;  %s9620_s19 = inlined_call_operand.vmem [shape: f32[2,1,512], index: 19, kind: input, shape index: {}]   ;;  %s9621_s20 = inlined_call_operand.hbm [shape: bf16[2,384,384], index: 20, kind: input, shape index: {}]   ;;  %s9622_s21 = inlined_call_operand.vmem [shape: f32[2,1,384], index: 21, kind: input, shape index: {}]   ;;  %s9623_s22 = inlined_call_operand.hbm [shape: bf16[2,512,128], index: 22, kind: input, shape index: {}]   ;;  %s9624_s23 = inlined_call_operand.vmem [shape: f32[2,1,128], index: 23, kind: input, shape index: {}]   ;;  %s9625_s24 = inlined_call_operand.vmem [shape: f32[2,384], index: 24, kind: output, shape index: {0}]   ;;  %s9626_s25 = inlined_call_operand.vmem [shape: f32[2,3], index: 25, kind: output, shape index: {1}]  }
   0x1   :  { %9637 = sst [smem:[#allocation37_spill]] %s9601_s0 }
   0x2   :  { %9638 = sst [smem:[#allocation38_spill]] %s9602_s1 }
   0x3   :  { %9639 = sst [smem:[#allocation39_spill]] %s9603_s2 }
   0x4   :  { %9640 = sst [smem:[#allocation40_spill]] %s9604_s3 }
   0x5   :  { %9641 = sst [smem:[#allocation41_spill]] %s9605_s4 }
   0x6   :  { %9642 = sst [smem:[#allocation42_spill]] %s9606_s5 }
   0x7   :  { %9643 = sst [smem:[#allocation43_spill]] %s9607_s6 }
   0x8   :  { %9644 = sst [smem:[#allocation44_spill]] %s9608_s7 }
   0x9   :  { %9645 = sst [smem:[#allocation45_spill]] %s9609_s8 }
   0xa   :  { %9646 = sst [smem:[#allocation46_spill]] %s9610_s9 }
   0xb   :  { %9647 = sst [smem:[#allocation47_spill]] %s9611_s10 }
   0xc   :  { %9648 = sst [smem:[#allocation48_spill]] %s9625_s24 }
   0xd   :  { %9649 = sst [smem:[#allocation49_spill]] %s9626_s25 }
   0xe   :  { %31 = vsyncpa [#allocation3], 0 }
   0xf   :  { %32 = vsyncpa [#allocation5], 0 }
  0x10   :  { %33 = vsyncpa [#allocation8], 0 }
  0x11   :  { %34 = vsyncpa [#allocation11], 0 }
  0x12   :  { %35 = vsyncpa [#allocation14], 0 }
  0x13   :  { %36 = vsyncpa [#allocation17], 0 }
  0x14   :  { %37 = vsyncpa [#allocation20], 0 }
  0x15   :  { %38 = vsyncpa [#allocation23], 0 }
  0x16   :  { %39 = vsyncpa [#allocation26], 0  ;;  %s8908_s29 = smov [#allocation4]   ;;  %s9650_s7 = sld [smem:[#allocation39_spill]] }
  0x17   :  { %s57_s2 = sshll.u32 %s8908_s29, 4  ;;  %s58_s2 = int_to_ptr.vmem [resolvable:$true] %s57_s2 }
  0x1c   :  { %s8516_s3 = scalar_lea.hbm %s9650_s7, 4096 }
  0x1d   :  { %p8517_p0 = scmp.ne.s32.totalorder %s9650_s7, %s8516_s3  ;;  %p8520_p1 = scmp.lt.u32.totalorder %s8516_s3, %s9650_s7 }
  0x1f   :  { %p8522_p2 = pnand %p8520_p1, %p8517_p0 }
  0x21   :  { %8525 = shalt.err (!%p8522_p2)
}
  0x22   :  { %s8526_s4 = scalar_lea.vmem %s58_s2, 4096  ;;  %p8531_p4 = scmp.lt.s32.totalorder %s58_s2, %s58_s2 }
  0x23   :  { %p8527_p3 = scmp.ne.s32.totalorder %s58_s2, %s8526_s4  ;;  %p8532_p5 = scmp.lt.s32.totalorder %s8526_s4, %s8526_s4 }
  0x25   :  { %p8533_p6 = por %p8532_p5, %p8531_p4 }
  0x27   :  { %p8534_p7 = pnand %p8533_p6, %p8527_p3 }
  0x29   :  { %8537 = shalt.err (!%p8534_p7)
}
  0x2a   :  { %s8909_s28 = smov 64   ;;  %s8910_s9 = smov 4  }
  0x2b   :  { %63 = dma.hbm_to_vmem [thread:$0]  %s9650_s7, 4096, %s58_s2, [#allocation5], %s8909_s28, %s8909_s28, %s8910_s9  }
  0x2c   :  { %s8911_s29 = smov [#allocation7]   ;;  %s8912_s30 = smov [#allocation10]  }
  0x2d   :  { %s79_s6 = sshll.u32 %s8911_s29, 4  ;;  %s101_s3 = sshll.u32 %s8912_s30, 4  ;;  %s80_s6 = int_to_ptr.vmem [resolvable:$true] %s79_s6  ;;  %s102_s3 = int_to_ptr.vmem [resolvable:$true] %s101_s3 }
  0x2e   :  { %s9651_s8 = sld [smem:[#allocation41_spill]] }
  0x34   :  { %s8538_s27 = scalar_lea.hbm %s9651_s8, 1024 }
  0x35   :  { %p8539_p8 = scmp.ne.s32.totalorder %s9651_s8, %s8538_s27  ;;  %p8542_p9 = scmp.lt.u32.totalorder %s8538_s27, %s9651_s8 }
  0x37   :  { %p8544_p10 = pnand %p8542_p9, %p8539_p8 }
  0x39   :  { %8547 = shalt.err (!%p8544_p10)
}
  0x3a   :  { %s8548_s2 = scalar_lea.vmem %s80_s6, 1024  ;;  %p8553_p12 = scmp.lt.s32.totalorder %s80_s6, %s80_s6 }
  0x3b   :  { %p8549_p11 = scmp.ne.s32.totalorder %s80_s6, %s8548_s2  ;;  %p8554_p13 = scmp.lt.s32.totalorder %s8548_s2, %s8548_s2 }
  0x3d   :  { %p8555_p0 = por %p8554_p13, %p8553_p12 }
  0x3f   :  { %p8556_p1 = pnand %p8555_p0, %p8549_p11 }
  0x41   :  { %8559 = shalt.err (!%p8556_p1)
}
  0x42   :  { %85 = dma.hbm_to_vmem [thread:$0]  %s9651_s8, 1024, %s80_s6, [#allocation8], %s8909_s28, %s8909_s28, %s8910_s9  }
  0x43   :  { %s9652_s24 = sld [smem:[#allocation43_spill]] }
  0x49   :  { %s8560_s0 = scalar_lea.hbm %s9652_s24, 2048 }
  0x4a   :  { %p8561_p2 = scmp.ne.s32.totalorder %s9652_s24, %s8560_s0  ;;  %p8564_p3 = scmp.lt.u32.totalorder %s8560_s0, %s9652_s24 }
  0x4c   :  { %p8566_p4 = pnand %p8564_p3, %p8561_p2 }
  0x4e   :  { %8569 = shalt.err (!%p8566_p4)
}
  0x4f   :  { %s8570_s27 = scalar_lea.vmem %s102_s3, 2048  ;;  %p8575_p6 = scmp.lt.s32.totalorder %s102_s3, %s102_s3 }
  0x50   :  { %p8571_p5 = scmp.ne.s32.totalorder %s102_s3, %s8570_s27  ;;  %p8576_p7 = scmp.lt.s32.totalorder %s8570_s27, %s8570_s27 }
  0x52   :  { %p8577_p8 = por %p8576_p7, %p8575_p6 }
  0x54   :  { %p8578_p9 = pnand %p8577_p8, %p8571_p5 }
  0x56   :  { %8581 = shalt.err (!%p8578_p9)
}
  0x57   :  { %107 = dma.hbm_to_vmem [thread:$0]  %s9652_s24, 2048, %s102_s3, [#allocation11], %s8909_s28, %s8909_s28, %s8910_s9  }
  0x58   :  { %s8913_s4 = smov [#allocation13]   ;;  %s8914_s7 = smov [#allocation16]  }
  0x59   :  { %s123_s2 = sshll.u32 %s8913_s4, 4  ;;  %s148_s5 = sshll.u32 %s8914_s7, 4  ;;  %s124_s2 = int_to_ptr.vmem [resolvable:$true] %s123_s2  ;;  %s149_s5 = int_to_ptr.vmem [resolvable:$true] %s148_s5 }
  0x5a   :  { %s9653_s0 = sld [smem:[#allocation45_spill]] }
  0x60   :  { %s8582_s29 = scalar_lea.hbm %s9653_s0, 1024 }
  0x61   :  { %p8583_p10 = scmp.ne.s32.totalorder %s9653_s0, %s8582_s29  ;;  %p8586_p11 = scmp.lt.u32.totalorder %s8582_s29, %s9653_s0 }
  0x63   :  { %p8588_p12 = pnand %p8586_p11, %p8583_p10 }
  0x65   :  { %8591 = shalt.err (!%p8588_p12)
}
  0x66   :  { %s8592_s3 = scalar_lea.vmem %s124_s2, 1024  ;;  %p8597_p0 = scmp.lt.s32.totalorder %s124_s2, %s124_s2 }
  0x67   :  { %p8593_p13 = scmp.ne.s32.totalorder %s124_s2, %s8592_s3  ;;  %p8598_p1 = scmp.lt.s32.totalorder %s8592_s3, %s8592_s3 }
  0x69   :  { %p8599_p2 = por %p8598_p1, %p8597_p0 }
  0x6b   :  { %p8600_p3 = pnand %p8599_p2, %p8593_p13 }
  0x6d   :  { %8603 = shalt.err (!%p8600_p3)
}
  0x6e   :  { %129 = dma.hbm_to_vmem [thread:$0]  %s9653_s0, 1024, %s124_s2, [#allocation14], %s8909_s28, %s8909_s28, %s8910_s9  }
  0x6f   :  { %s8604_s7 = scalar_lea.hbm %s9612_s11, 16 }
  0x70   :  { %p8605_p4 = scmp.ne.s32.totalorder %s9612_s11, %s8604_s7  ;;  %p8608_p5 = scmp.lt.u32.totalorder %s8604_s7, %s9612_s11 }
  0x72   :  { %p8610_p6 = pnand %p8608_p5, %p8605_p4 }
  0x74   :  { %8613 = shalt.err (!%p8610_p6)
}
  0x75   :  { %s8614_s26 = scalar_lea.vmem %s149_s5, 16  ;;  %s8618_s1 = scalar_lea.vmem %s149_s5, 32 }
  0x76   :  { %p8615_p7 = scmp.ne.s32.totalorder %s149_s5, %s8614_s26  ;;  %p8619_p8 = scmp.lt.s32.totalorder %s149_s5, %s149_s5 }
  0x77   :  { %p8620_p9 = scmp.lt.s32.totalorder %s8618_s1, %s8614_s26 }
  0x79   :  { %p8621_p10 = por %p8620_p9, %p8619_p8 }
  0x7b   :  { %p8622_p11 = pnand %p8621_p10, %p8615_p7 }
  0x7d   :  { %8625 = shalt.err (!%p8622_p11)
}
  0x7e   :  { %151 = dma.hbm_to_vmem [thread:$0]  %s9612_s11, 16, %s149_s5, [#allocation17]  }
  0x7f   :  { %s8915_s27 = smov [#allocation19]   ;;  %s8916_s24 = smov [#allocation22]  }
  0x80   :  { %s170_s3 = sshll.u32 %s8915_s27, 4  ;;  %s189_s6 = sshll.u32 %s8916_s24, 4  ;;  %s171_s3 = int_to_ptr.vmem [resolvable:$true] %s170_s3  ;;  %s190_s6 = int_to_ptr.vmem [resolvable:$true] %s189_s6 }
  0x81   :  { %s8626_s7 = scalar_lea.hbm %s9615_s14, 32 }
  0x82   :  { %p8627_p12 = scmp.ne.s32.totalorder %s9615_s14, %s8626_s7  ;;  %p8630_p13 = scmp.lt.u32.totalorder %s8626_s7, %s9615_s14 }
  0x84   :  { %p8632_p0 = pnand %p8630_p13, %p8627_p12 }
  0x86   :  { %8635 = shalt.err (!%p8632_p0)
}
  0x87   :  { %s8636_s11 = scalar_lea.vmem %s171_s3, 32  ;;  %p8641_p2 = scmp.lt.s32.totalorder %s171_s3, %s171_s3 }
  0x88   :  { %p8637_p1 = scmp.ne.s32.totalorder %s171_s3, %s8636_s11  ;;  %p8642_p3 = scmp.lt.s32.totalorder %s8636_s11, %s8636_s11 }
  0x8a   :  { %p8643_p4 = por %p8642_p3, %p8641_p2 }
  0x8c   :  { %p8644_p5 = pnand %p8643_p4, %p8637_p1 }
  0x8e   :  { %8647 = shalt.err (!%p8644_p5)
}
  0x8f   :  { %173 = dma.hbm_to_vmem [thread:$0]  %s9615_s14, 32, %s171_s3, [#allocation20]  }
  0x90   :  { %s8648_s0 = scalar_lea.hbm %s9617_s16, 16384 }
  0x91   :  { %p8649_p6 = scmp.ne.s32.totalorder %s9617_s16, %s8648_s0  ;;  %p8652_p7 = scmp.lt.u32.totalorder %s8648_s0, %s9617_s16 }
  0x93   :  { %p8654_p8 = pnand %p8652_p7, %p8649_p6 }
  0x95   :  { %8657 = shalt.err (!%p8654_p8)
}
  0x96   :  { %s8658_s7 = scalar_lea.vmem %s190_s6, 16384  ;;  %p8663_p10 = scmp.lt.s32.totalorder %s190_s6, %s190_s6 }
  0x97   :  { %p8659_p9 = scmp.ne.s32.totalorder %s190_s6, %s8658_s7  ;;  %p8664_p11 = scmp.lt.s32.totalorder %s8658_s7, %s8658_s7 }
  0x99   :  { %p8665_p12 = por %p8664_p11, %p8663_p10 }
  0x9b   :  { %p8666_p13 = pnand %p8665_p12, %p8659_p9 }
  0x9d   :  { %8669 = shalt.err (!%p8666_p13)
}
  0x9e   :  { %s8917_s14 = smov 512   ;;  %s8918_s3 = smov 32  }
  0x9f   :  { %195 = dma.hbm_to_vmem [thread:$0]  %s9617_s16, 16384, %s190_s6, [#allocation23], %s8917_s14, %s8917_s14, %s8918_s3  }
  0xa0   :  { %s8919_s29 = smov [#allocation25]   ;;  %s8670_s26 = scalar_lea.hbm %s9621_s20, 18432 }
  0xa1   :  { %s217_s30 = sshll.u32 %s8919_s29, 4  ;;  %p8671_p0 = scmp.ne.s32.totalorder %s9621_s20, %s8670_s26  ;;  %s218_s30 = int_to_ptr.vmem [resolvable:$true] %s217_s30 }
  0xa2   :  { %p8674_p1 = scmp.lt.u32.totalorder %s8670_s26, %s9621_s20 }
  0xa4   :  { %p8676_p2 = pnand %p8674_p1, %p8671_p0 }
  0xa6   :  { %8679 = shalt.err (!%p8676_p2)
}
  0xa7   :  { %s8680_s24 = scalar_lea.vmem %s218_s30, 18432  ;;  %p8685_p4 = scmp.lt.s32.totalorder %s218_s30, %s218_s30 }
  0xa8   :  { %p8681_p3 = scmp.ne.s32.totalorder %s218_s30, %s8680_s24  ;;  %p8686_p5 = scmp.lt.s32.totalorder %s8680_s24, %s8680_s24 }
  0xaa   :  { %p8687_p6 = por %p8686_p5, %p8685_p4 }
  0xac   :  { %p8688_p7 = pnand %p8687_p6, %p8681_p3 }
  0xae   :  { %8691 = shalt.err (!%p8688_p7)
}
  0xaf   :  { %s8920_s16 = smov 192   ;;  %s8921_s6 = smov 12  }
  0xb0   :  { %223 = dma.hbm_to_vmem [thread:$0]  %s9621_s20, 18432, %s218_s30, [#allocation26], %s8920_s16, %s8920_s16, %s8921_s6  }
  0xb1   :  { %s8922_s7 = smov [#allocation2]   ;;  %s8923_s3 = smov [#allocation6]  }
  0xb2   :  { %s48_s14 = sshll.u32 %s8922_s7, 4  ;;  %s70_s25 = sshll.u32 %s8923_s3, 4  ;;  %s49_s14 = int_to_ptr.vmem [resolvable:$true] %s48_s14  ;;  %s71_s25 = int_to_ptr.vmem [resolvable:$true] %s70_s25 }
  0xb3   :  { %s9654_s11 = sld [smem:[#allocation38_spill]] }
  0xb9   :  { %s8692_s5 = scalar_lea.hbm %s9654_s11, 32 }
  0xba   :  { %p8693_p8 = scmp.ne.s32.totalorder %s9654_s11, %s8692_s5  ;;  %p8696_p9 = scmp.lt.u32.totalorder %s8692_s5, %s9654_s11 }
  0xbc   :  { %p8698_p10 = pnand %p8696_p9, %p8693_p8 }
  0xbe   :  { %8701 = shalt.err (!%p8698_p10)
}
  0xbf   :  { %s8702_s20 = scalar_lea.vmem %s49_s14, 32  ;;  %p8707_p12 = scmp.lt.s32.totalorder %s49_s14, %s49_s14 }
  0xc0   :  { %p8703_p11 = scmp.ne.s32.totalorder %s49_s14, %s8702_s20  ;;  %p8708_p13 = scmp.lt.s32.totalorder %s8702_s20, %s8702_s20 }
  0xc2   :  { %p8709_p0 = por %p8708_p13, %p8707_p12 }
  0xc4   :  { %p8710_p1 = pnand %p8709_p0, %p8703_p11 }
  0xc6   :  { %8713 = shalt.err (!%p8710_p1)
}
  0xc7   :  { %51 = dma.hbm_to_vmem [thread:$0]  %s9654_s11, 32, %s49_s14, [#allocation3]  }
  0xc8   :  { %s9655_s6 = sld [smem:[#allocation40_spill]] }
  0xce   :  { %s8714_s8 = scalar_lea.hbm %s9655_s6, 16 }
  0xcf   :  { %p8715_p2 = scmp.ne.s32.totalorder %s9655_s6, %s8714_s8  ;;  %p8718_p3 = scmp.lt.u32.totalorder %s8714_s8, %s9655_s6 }
  0xd1   :  { %p8720_p4 = pnand %p8718_p3, %p8715_p2 }
  0xd3   :  { %8723 = shalt.err (!%p8720_p4)
}
  0xd4   :  { %s8724_s29 = scalar_lea.vmem %s71_s25, 16  ;;  %s8728_s5 = scalar_lea.vmem %s71_s25, 32 }
  0xd5   :  { %p8725_p5 = scmp.ne.s32.totalorder %s71_s25, %s8724_s29  ;;  %p8729_p6 = scmp.lt.s32.totalorder %s71_s25, %s71_s25 }
  0xd6   :  { %p8730_p7 = scmp.lt.s32.totalorder %s8728_s5, %s8724_s29 }
  0xd8   :  { %p8731_p8 = por %p8730_p7, %p8729_p6 }
  0xda   :  { %p8732_p9 = pnand %p8731_p8, %p8725_p5 }
  0xdc   :  { %8735 = shalt.err (!%p8732_p9)
}
  0xdd   :  { %73 = dma.hbm_to_vmem [thread:$0]  %s9655_s6, 16, %s71_s25, [#allocation5]  }
  0xde   :  { %s8924_s26 = smov [#allocation9]   ;;  %s8925_s2 = smov [#allocation12]  }
  0xdf   :  { %s92_s1 = sshll.u32 %s8924_s26, 4  ;;  %s114_s0 = sshll.u32 %s8925_s2, 4  ;;  %s93_s1 = int_to_ptr.vmem [resolvable:$true] %s92_s1  ;;  %s115_s0 = int_to_ptr.vmem [resolvable:$true] %s114_s0 }
  0xe0   :  { %s9656_s27 = sld [smem:[#allocation42_spill]] }
  0xe6   :  { %s8736_s24 = scalar_lea.hbm %s9656_s27, 16 }
  0xe7   :  { %p8737_p10 = scmp.ne.s32.totalorder %s9656_s27, %s8736_s24  ;;  %p8740_p11 = scmp.lt.u32.totalorder %s8736_s24, %s9656_s27 }
  0xe9   :  { %p8742_p12 = pnand %p8740_p11, %p8737_p10 }
  0xeb   :  { %8745 = shalt.err (!%p8742_p12)
}
  0xec   :  { %s8746_s25 = scalar_lea.vmem %s93_s1, 16  ;;  %s8750_s6 = scalar_lea.vmem %s93_s1, 32 }
  0xed   :  { %p8747_p13 = scmp.ne.s32.totalorder %s93_s1, %s8746_s25  ;;  %p8751_p0 = scmp.lt.s32.totalorder %s93_s1, %s93_s1 }
  0xee   :  { %p8752_p1 = scmp.lt.s32.totalorder %s8750_s6, %s8746_s25 }
  0xf0   :  { %p8753_p2 = por %p8752_p1, %p8751_p0 }
  0xf2   :  { %p8754_p3 = pnand %p8753_p2, %p8747_p13 }
  0xf4   :  { %8757 = shalt.err (!%p8754_p3)
}
  0xf5   :  { %95 = dma.hbm_to_vmem [thread:$0]  %s9656_s27, 16, %s93_s1, [#allocation8]  }
  0xf6   :  { %s9657_s14 = sld [smem:[#allocation44_spill]] }
  0xfc   :  { %s8758_s11 = scalar_lea.hbm %s9657_s14, 16 }
  0xfd   :  { %p8759_p4 = scmp.ne.s32.totalorder %s9657_s14, %s8758_s11  ;;  %p8762_p5 = scmp.lt.u32.totalorder %s8758_s11, %s9657_s14 }
  0xff   :  { %p8764_p6 = pnand %p8762_p5, %p8759_p4 }
 0x101   :  { %8767 = shalt.err (!%p8764_p6)
}
 0x102   :  { %s8768_s24 = scalar_lea.vmem %s115_s0, 16  ;;  %s8772_s16 = scalar_lea.vmem %s115_s0, 32 }
 0x103   :  { %p8769_p7 = scmp.ne.s32.totalorder %s115_s0, %s8768_s24  ;;  %p8773_p8 = scmp.lt.s32.totalorder %s115_s0, %s115_s0 }
 0x104   :  { %p8774_p9 = scmp.lt.s32.totalorder %s8772_s16, %s8768_s24 }
 0x106   :  { %p8775_p10 = por %p8774_p9, %p8773_p8 }
 0x108   :  { %p8776_p11 = pnand %p8775_p10, %p8769_p7 }
 0x10a   :  { %8779 = shalt.err (!%p8776_p11)
}
 0x10b   :  { %117 = dma.hbm_to_vmem [thread:$0]  %s9657_s14, 16, %s115_s0, [#allocation11]  }
 0x10c   :  { %s8926_s8 = smov [#allocation15]   ;;  %s8927_s7 = smov [#allocation18]  }
 0x10d   :  { %s136_s4 = sshll.u32 %s8926_s8, 4  ;;  %s160_s25 = sshll.u32 %s8927_s7, 4  ;;  %s137_s4 = int_to_ptr.vmem [resolvable:$true] %s136_s4  ;;  %s161_s25 = int_to_ptr.vmem [resolvable:$true] %s160_s25 }
 0x10e   :  { %s9658_s10 = sld [smem:[#allocation46_spill]] }
 0x114   :  { %s8780_s29 = scalar_lea.hbm %s9658_s10, 16 }
 0x115   :  { %p8781_p12 = scmp.ne.s32.totalorder %s9658_s10, %s8780_s29  ;;  %p8784_p13 = scmp.lt.u32.totalorder %s8780_s29, %s9658_s10 }
 0x117   :  { %p8786_p0 = pnand %p8784_p13, %p8781_p12 }
 0x119   :  { %8789 = shalt.err (!%p8786_p0)
}
 0x11a   :  { %s8790_s0 = scalar_lea.vmem %s137_s4, 16  ;;  %s8794_s14 = scalar_lea.vmem %s137_s4, 32 }
 0x11b   :  { %p8791_p1 = scmp.ne.s32.totalorder %s137_s4, %s8790_s0  ;;  %p8795_p2 = scmp.lt.s32.totalorder %s137_s4, %s137_s4 }
 0x11c   :  { %p8796_p3 = scmp.lt.s32.totalorder %s8794_s14, %s8790_s0 }
 0x11e   :  { %p8797_p4 = por %p8796_p3, %p8795_p2 }
 0x120   :  { %p8798_p5 = pnand %p8797_p4, %p8791_p1 }
 0x122   :  { %8801 = shalt.err (!%p8798_p5)
}
 0x123   :  { %139 = dma.hbm_to_vmem [thread:$0]  %s9658_s10, 16, %s137_s4, [#allocation14]  }
 0x124   :  { %s8802_s1 = scalar_lea.hbm %s9614_s13, 16 }
 0x125   :  { %p8803_p6 = scmp.ne.s32.totalorder %s9614_s13, %s8802_s1  ;;  %p8806_p7 = scmp.lt.u32.totalorder %s8802_s1, %s9614_s13 }
 0x127   :  { %p8808_p8 = pnand %p8806_p7, %p8803_p6 }
 0x129   :  { %8811 = shalt.err (!%p8808_p8)
}
 0x12a   :  { %s8812_s3 = scalar_lea.vmem %s161_s25, 16  ;;  %s8816_s29 = scalar_lea.vmem %s161_s25, 32 }
 0x12b   :  { %p8813_p9 = scmp.ne.s32.totalorder %s161_s25, %s8812_s3  ;;  %p8817_p10 = scmp.lt.s32.totalorder %s161_s25, %s161_s25 }
 0x12c   :  { %p8818_p11 = scmp.lt.s32.totalorder %s8816_s29, %s8812_s3 }
 0x12e   :  { %p8819_p12 = por %p8818_p11, %p8817_p10 }
 0x130   :  { %p8820_p13 = pnand %p8819_p12, %p8813_p9 }
 0x132   :  { %8823 = shalt.err (!%p8820_p13)
}
 0x133   :  { %163 = dma.hbm_to_vmem [thread:$0]  %s9614_s13, 16, %s161_s25, [#allocation17]  }
 0x134   :  { %s8928_s5 = smov [#allocation21]   ;;  %s8929_s26 = smov [#allocation24]  }
 0x135   :  { %s180_s11 = sshll.u32 %s8928_s5, 4  ;;  %s203_s2 = sshll.u32 %s8929_s26, 4  ;;  %s181_s11 = int_to_ptr.vmem [resolvable:$true] %s180_s11  ;;  %s9247_s2 = int_to_ptr.vmem [resolvable:$true] %s203_s2 }
 0x136   :  { %s8824_s20 = scalar_lea.hbm %s9616_s15, 16 }
 0x137   :  { %p8825_p0 = scmp.ne.s32.totalorder %s9616_s15, %s8824_s20  ;;  %p8828_p1 = scmp.lt.u32.totalorder %s8824_s20, %s9616_s15 }
 0x139   :  { %p8830_p2 = pnand %p8828_p1, %p8825_p0 }
 0x13b   :  { %8833 = shalt.err (!%p8830_p2)
}
 0x13c   :  { %s8834_s13 = scalar_lea.vmem %s181_s11, 16  ;;  %s8838_s25 = scalar_lea.vmem %s181_s11, 32 }
 0x13d   :  { %p8835_p3 = scmp.ne.s32.totalorder %s181_s11, %s8834_s13  ;;  %p8839_p4 = scmp.lt.s32.totalorder %s181_s11, %s181_s11 }
 0x13e   :  { %p8840_p5 = scmp.lt.s32.totalorder %s8838_s25, %s8834_s13 }
 0x140   :  { %p8841_p6 = por %p8840_p5, %p8839_p4 }
 0x142   :  { %p8842_p7 = pnand %p8841_p6, %p8835_p3 }
 0x144   :  { %8845 = shalt.err (!%p8842_p7)
}
 0x145   :  { %183 = dma.hbm_to_vmem [thread:$0]  %s9616_s15, 16, %s181_s11, [#allocation20]  }
 0x146   :  { %s8846_s3 = scalar_lea.hbm %s9619_s18, 32768 }
 0x147   :  { %p8847_p8 = scmp.ne.s32.totalorder %s9619_s18, %s8846_s3  ;;  %p8850_p9 = scmp.lt.u32.totalorder %s8846_s3, %s9619_s18 }
 0x149   :  { %p8852_p10 = pnand %p8850_p9, %p8847_p8 }
 0x14b   :  { %8855 = shalt.err (!%p8852_p10)
}
 0x14c   :  { %s8856_s26 = scalar_lea.vmem %s9247_s2, 32768  ;;  %p8861_p12 = scmp.lt.s32.totalorder %s9247_s2, %s9247_s2 }
 0x14d   :  { %p8857_p11 = scmp.ne.s32.totalorder %s9247_s2, %s8856_s26  ;;  %p8862_p13 = scmp.lt.s32.totalorder %s8856_s26, %s8856_s26 }
 0x14f   :  { %p8863_p0 = por %p8862_p13, %p8861_p12 }
 0x151   :  { %p8864_p1 = pnand %p8863_p0, %p8857_p11 }
 0x153   :  { %8867 = shalt.err (!%p8864_p1)
}
 0x154   :  { %s8930_s15 = smov 256   ;;  %s8931_s11 = smov 16  }
 0x155   :  { %209 = dma.hbm_to_vmem [thread:$0]  %s9619_s18, 32768, %s9247_s2, [#allocation23], %s8930_s15, %s8930_s15, %s8931_s11  }
 0x156   :  { %s8932_s20 = smov [#allocation27]   ;;  %s8868_s1 = scalar_lea.hbm %s9623_s22, 8192 }
 0x157   :  { %s231_s30 = sshll.u32 %s8932_s20, 4  ;;  %p8869_p2 = scmp.ne.s32.totalorder %s9623_s22, %s8868_s1  ;;  %s232_s30 = int_to_ptr.vmem [resolvable:$true] %s231_s30 }
 0x158   :  { %p8872_p3 = scmp.lt.u32.totalorder %s8868_s1, %s9623_s22 }
 0x15a   :  { %p8874_p4 = pnand %p8872_p3, %p8869_p2 }
 0x15c   :  { %8877 = shalt.err (!%p8874_p4)
}
 0x15d   :  { %s8878_s7 = scalar_lea.vmem %s232_s30, 8192  ;;  %p8883_p6 = scmp.lt.s32.totalorder %s232_s30, %s232_s30 }
 0x15e   :  { %p8879_p5 = scmp.ne.s32.totalorder %s232_s30, %s8878_s7  ;;  %p8884_p7 = scmp.lt.s32.totalorder %s8878_s7, %s8878_s7 }
 0x160   :  { %p8885_p8 = por %p8884_p7, %p8883_p6 }
 0x162   :  { %p8886_p9 = pnand %p8885_p8, %p8879_p5 }
 0x164   :  { %8889 = shalt.err (!%p8886_p9)
}
 0x165   :  { %237 = dma.hbm_to_vmem [thread:$0]  %s9623_s22, 8192, %s232_s30, [#allocation26], %s8909_s28, %s8909_s28, %s8910_s9  }
 0x166   :  { %8890 = dma.done.wait [#allocation3], 32  }
 0x167   :  { %8891 = vsyncadd [#allocation3], 4294967264 }
 0x168   :  { %8892 = dma.done.wait [#allocation5], 4112  }
 0x169   :  { %8893 = vsyncadd [#allocation5], 4294963184 }
 0x16a   :  { %8894 = dma.done.wait [#allocation8], 1040  }
 0x16b   :  { %8895 = vsyncadd [#allocation8], 4294966256 }
 0x16c   :  { %8896 = dma.done.wait [#allocation11], 2064  }
 0x16d   :  { %8897 = vsyncadd [#allocation11], 4294965232 }
 0x16e   :  { %8898 = dma.done.wait [#allocation14], 1040  }
 0x16f   :  { %8899 = vsyncadd [#allocation14], 4294966256 }
 0x170   :  { %8900 = dma.done.wait [#allocation17], 32  }
 0x171   :  { %8901 = vsyncadd [#allocation17], 4294967264 }
 0x172   :  { %8902 = dma.done.wait [#allocation20], 48  }
 0x173   :  { %8903 = vsyncadd [#allocation20], 4294967248 }
 0x174   :  { %8904 = dma.done.wait [#allocation23], 49152  }
 0x175   :  { %8905 = vsyncadd [#allocation23], 4294918144 }
 0x176   :  { %8906 = dma.done.wait [#allocation26], 26624  }
 0x177   :  { %8907 = vsyncadd [#allocation26], 4294940672  ;;  %v7754_v0 = vld [vmem:[#allocation4 + $0x40] sm:$0xff]   ;;  %v7758_v4 = vld [vmem:[#allocation4 + $0x48] sm:$0xff]   ;;  %v8933_v21 = vmov 1983009808   ;;  %v299_v23 = vlaneseq }
 0x178   :  { %v7755_v1 = vld [vmem:[#allocation4] sm:$0xff]   ;;  %7324 = vmatprep.subr.bf16.mxu0 %v7754_v0  ;;  %v7759_v5 = vld [vmem:[#allocation4 + $0x8] sm:$0xff]   ;;  %v7762_v8 = vld [vmem:[#allocation4 + $0x50] sm:$0xff]   ;;  %v297_v22 = vunpack.c.l.s4 %v8933_v21  ;;  %s9659_s6 = sld [smem:[#allocation37_spill]]  ;;  %v8934_v40 = vmov 0.0   ;;  %vm8935_vm0 = vmmov 0  }
 0x179   :  { %v7756_v2 = vld [vmem:[#allocation4 + $0xc0] sm:$0xff]   ;;  %7325 = vmatpush3.bf16.msra.mxu0 %v7755_v1  ;;  %v7760_v6 = vld [vmem:[#allocation4 + $0xc8] sm:$0xff]   ;;  %v7763_v9 = vld [vmem:[#allocation4 + $0x10] sm:$0xff]   ;;  %v9293_v29 = vshrl.u32 %v299_v23, 7  ;;  %vm2719_vm1 = vcmask 1041408   ;;  %vm2826_vm2 = vcmask 1043456  }
 0x17a   :  { %v7757_v3 = vld [vmem:[#allocation4 + $0x80] sm:$0xff]   ;;  %7346 = vmatprep.subr.bf16.mxu1 %v7756_v2  ;;  %7326 = vmatprep.subr.bf16.mxu0 %v7758_v4  ;;  %v7761_v7 = vld [vmem:[#allocation4 + $0x88] sm:$0xff]   ;;  %v7764_v10 = vld [vmem:[#allocation4 + $0xd0] sm:$0xff]   ;;  %v298_v28 = vunpack.c.0.s8 %v297_v22  ;;  %vm2830_vm3 = vcmask 1045504   ;;  %s9660_s25 = sld [smem:[#allocation47_spill]]  ;;  %vm6550_vm4 = vcmask 523264  }
 0x17b   :  { %7347 = vmatpush3.bf16.msra.mxu1 %v7757_v3  ;;  %v7765_v11 = vld [vmem:[#allocation4 + $0x90] sm:$0xff]   ;;  %v7766_v12 = vld [vmem:[#allocation4 + $0x58] sm:$0xff]   ;;  %v7770_v16 = vld [vmem:[#allocation4 + $0x60] sm:$0xff]   ;;  %vm6566_vm5 = vcmask 517120   ;;  %vm6601_vm6 = vcmask 7168   ;;  %vm6603_vm7 = vcmask 15360  }
 0x17c   :  { %7348 = vmatprep.subr.bf16.mxu1 %v7760_v6  ;;  %v7767_v13 = vld [vmem:[#allocation4 + $0x18] sm:$0xff]   ;;  %v7771_v17 = vld [vmem:[#allocation4 + $0x20] sm:$0xff]   ;;  %v7774_v20 = vld [vmem:[#allocation4 + $0x68] sm:$0xff]   ;;  %v9296_v34 = vsub.s32 %v298_v28, %v9293_v29  ;;  %vm6613_vm8 = vcmask 17408   ;;  %s9662_s14 = sld [smem:[#allocation49_spill]] }
 0x17d   :  { %7327 = vmatpush3.bf16.msra.mxu0 %v7759_v5  ;;  %v7768_v14 = vld [vmem:[#allocation4 + $0xd8] sm:$0xff]   ;;  %v7772_v18 = vld [vmem:[#allocation4 + $0xe0] sm:$0xff]   ;;  %v7775_v24 = vld [vmem:[#allocation4 + $0x28] sm:$0xff]  }
 0x17e   :  { %7328 = vmatprep.subr.bf16.mxu0 %v7762_v8  ;;  %v7769_v15 = vld [vmem:[#allocation4 + $0x98] sm:$0xff]   ;;  %v7773_v19 = vld [vmem:[#allocation4 + $0xa0] sm:$0xff]   ;;  %v7776_v25 = vld [vmem:[#allocation4 + $0xe8] sm:$0xff]  }
 0x17f   :  { %7349 = vmatpush3.bf16.msra.mxu1 %v7761_v7  ;;  %v7777_v26 = vld [vmem:[#allocation4 + $0xa8] sm:$0xff]   ;;  %v7778_v27 = vld [vmem:[#allocation4 + $0x70] sm:$0xff]   ;;  %v7782_v33 = vld [vmem:[#allocation4 + $0x78] sm:$0xff]  }
 0x180   :  { %7350 = vmatprep.subr.bf16.mxu1 %v7764_v10  ;;  %v7779_v30 = vld [vmem:[#allocation4 + $0x30] sm:$0xff]   ;;  %v7783_v35 = vld [vmem:[#allocation4 + $0x38] sm:$0xff]   ;;  %v7787_v47 = vld [vmem:[#allocation7] sm:$0xff]  }
 0x181   :  { %7329 = vmatpush3.bf16.msra.mxu0 %v7763_v9  ;;  %v7780_v31 = vld [vmem:[#allocation4 + $0xf0] sm:$0xff]   ;;  %v7784_v36 = vld [vmem:[#allocation4 + $0xf8] sm:$0xff]   ;;  %v7791_v5 = vld [vmem:[#allocation7 + $0x20] sm:$0xff]  }
 0x182   :  { %7330 = vmatprep.subr.bf16.mxu0 %v7766_v12  ;;  %v7781_v32 = vld [vmem:[#allocation4 + $0xb0] sm:$0xff]   ;;  %v292_v37 = vld [vmem:[%s9659_s6] sm:$0xff] }
 0x183   :  { %7351 = vmatpush3.bf16.msra.mxu1 %v7765_v11  ;;  %v302_v38 = vrot.slane %v292_v37, %v9296_v34  ;;  %v7785_v39 = vld [vmem:[#allocation4 + $0xb8] sm:$0xff]   ;;  %v295_v41 = vcombine.high %v292_v37, %v292_v37  ;;  %v7788_v50 = vld [vmem:[#allocation7 + $0x8] sm:$0xff]  }
 0x184   :  { %7352 = vmatprep.subr.bf16.mxu1 %v7768_v14  ;;  %v779_v51 = vld [vmem:[#allocation22] sm:$0xff]  ;;  %v7790_v1 = vld [vmem:[#allocation7 + $0x18] sm:$0xff]  }
 0x185   :  { %7331 = vmatpush3.bf16.msra.mxu0 %v7767_v13  ;;  %v310_v42 = vcombine.high %v302_v38, %v302_v38  ;;  %v309_v43 = vrot.slane %v295_v41, %v9296_v34  ;;  %v316_v44 = vpack.c.bf16 %v302_v38, %v302_v38  ;;  %v783_v52 = vld [vmem:[#allocation22 + $0x20] sm:$0xff]  ;;  %v293_v21 = vld [vmem:[#allocation2] sm:$0x3] }
 0x186   :  { %7332 = vmatprep.subr.bf16.mxu0 %v7770_v16  ;;  %v6674_v53 = vcombine.low %v779_v51, %v783_v52  ;;  %v6675_v54 = vcombine.high %v779_v51, %v783_v52  ;;  %v787_v55 = vld [vmem:[#allocation22 + $0x40] sm:$0xff]  ;;  %v788_v23 = vld [vmem:[#allocation22 + $0x48] sm:$0xff] }
 0x187   :  { %7353 = vmatpush3.bf16.msra.mxu1 %v7769_v15  ;;  %v317_v45 = vpack.c.bf16 %v310_v42, %v310_v42  ;;  %v311_v46 = vcombine.high %v309_v43, %v309_v43  ;;  %v318_v48 = vpack.c.bf16 %v309_v43, %v309_v43  ;;  %v791_v56 = vld [vmem:[#allocation22 + $0x60] sm:$0xff]  ;;  %v816_v41 = vld [vmem:[#allocation22 + $0x128] sm:$0xff] }
 0x188   :  { %7354 = vmatprep.subr.bf16.mxu1 %v7772_v18  ;;  %v6683_v57 = vcombine.high %v787_v55, %v791_v56  ;;  %v795_v58 = vld [vmem:[#allocation22 + $0x80] sm:$0xff]  ;;  %v6682_v61 = vcombine.low %v787_v55, %v791_v56  ;;  %v784_v18 = vld [vmem:[#allocation22 + $0x28] sm:$0xff] }
 0x189   :  { %7333 = vmatpush3.bf16.msra.mxu0 %v7771_v17  ;;  %615 = vmatprep.mubr.bf16.mxu0 %v317_v45  ;;  %v319_v49 = vpack.c.bf16 %v311_v46, %v311_v46  ;;  %v799_v59 = vld [vmem:[#allocation22 + $0xa0] sm:$0xff]  ;;  %v780_v17 = vld [vmem:[#allocation22 + $0x8] sm:$0xff] }
 0x18a   :  { %7334 = vmatprep.subr.bf16.mxu0 %v7774_v20  ;;  %v7789_v60 = vld [vmem:[#allocation7 + $0x10] sm:$0xff]   ;;  %v6691_v62 = vcombine.high %v795_v58, %v799_v59  ;;  %v6690_v2 = vcombine.low %v795_v58, %v799_v59  ;;  %v7792_v10 = vld [vmem:[#allocation7 + $0x28] sm:$0xff]   ;;  %v7794_v20 = vld [vmem:[#allocation7 + $0x38] sm:$0xff]   ;;  %v6676_v28 = vcombine.low %v780_v17, %v784_v18 }
 0x18b   :  { %7355 = vmatpush3.bf16.msra.mxu1 %v7773_v19  ;;  %655 = vmatprep.mubr.bf16.mxu1 %v319_v49  ;;  %v803_v63 = vld [vmem:[#allocation22 + $0xc0] sm:$0xff]  ;;  %v824_v45 = vld [vmem:[#allocation22 + $0x168] sm:$0xff] }
 0x18c   :  { %7356 = vmatprep.subr.bf16.mxu1 %v7776_v25  ;;  %v807_v0 = vld [vmem:[#allocation22 + $0xe0] sm:$0xff]  ;;  %v6677_v25 = vcombine.high %v780_v17, %v784_v18  ;;  %v832_v49 = vld [vmem:[#allocation22 + $0x1a8] sm:$0xff] }
 0x18d   :  { %7335 = vmatpush3.bf16.msra.mxu0 %v7775_v24  ;;  %v811_v3 = vld [vmem:[#allocation22 + $0x100] sm:$0xff]  ;;  %v6699_v6 = vcombine.high %v803_v63, %v807_v0  ;;  %v6698_v7 = vcombine.low %v803_v63, %v807_v0  ;;  %v792_v24 = vld [vmem:[#allocation22 + $0x68] sm:$0xff] }
 0x18e   :  { %7336 = vmatprep.subr.bf16.mxu0 %v7778_v27  ;;  %v815_v4 = vld [vmem:[#allocation22 + $0x120] sm:$0xff]  ;;  %v664_v27 = vpack.c.bf16 %v293_v21, %v293_v21  ;;  %v840_v58 = vld [vmem:[#allocation22 + $0x1e8] sm:$0xff] }
 0x18f   :  { %7357 = vmatpush3.bf16.msra.mxu1 %v7777_v26  ;;  %v819_v8 = vld [vmem:[#allocation22 + $0x140] sm:$0xff]  ;;  %v6707_v11 = vcombine.high %v811_v3, %v815_v4  ;;  %v6706_v12 = vcombine.low %v811_v3, %v815_v4  ;;  %v844_v0 = vld [vmem:[#allocation22 + $0x208] sm:$0xff] }
 0x190   :  { %7358 = vmatprep.subr.bf16.mxu1 %v7780_v31  ;;  %v823_v9 = vld [vmem:[#allocation22 + $0x160] sm:$0xff]  ;;  %v800_v31 = vld [vmem:[#allocation22 + $0xa8] sm:$0xff] }
 0x191   :  { %7337 = vmatpush3.bf16.msra.mxu0 %v7779_v30  ;;  %v827_v13 = vld [vmem:[#allocation22 + $0x180] sm:$0xff]  ;;  %v6715_v16 = vcombine.high %v819_v8, %v823_v9  ;;  %v6714_v19 = vcombine.low %v819_v8, %v823_v9  ;;  %v796_v30 = vld [vmem:[#allocation22 + $0x88] sm:$0xff] }
 0x192   :  { %7338 = vmatprep.subr.bf16.mxu0 %v7782_v33  ;;  %v831_v14 = vld [vmem:[#allocation22 + $0x1a0] sm:$0xff]  ;;  %v6684_v33 = vcombine.low %v788_v23, %v792_v24  ;;  %v6693_v37 = vcombine.high %v796_v30, %v800_v31  ;;  %v6692_v38 = vcombine.low %v796_v30, %v800_v31  ;;  %v852_v8 = vld [vmem:[#allocation22 + $0x248] sm:$0xff] }
 0x193   :  { %7359 = vmatpush3.bf16.msra.mxu1 %v7781_v32  ;;  %v7793_v15 = vld [vmem:[#allocation7 + $0x30] sm:$0xff]   ;;  %v6723_v22 = vcombine.high %v827_v13, %v831_v14  ;;  %v6722_v26 = vcombine.low %v827_v13, %v831_v14  ;;  %v6685_v32 = vcombine.high %v788_v23, %v792_v24 }
 0x194   :  { %7360 = vmatprep.subr.bf16.mxu1 %v7784_v36  ;;  %v808_v36 = vld [vmem:[#allocation22 + $0xe8] sm:$0xff]  ;;  %v839_v55 = vld [vmem:[#allocation22 + $0x1e0] sm:$0xff] }
 0x195   :  { %7339 = vmatpush3.bf16.msra.mxu0 %v7783_v35  ;;  %v804_v35 = vld [vmem:[#allocation22 + $0xc8] sm:$0xff]  ;;  %v847_v63 = vld [vmem:[#allocation22 + $0x220] sm:$0xff] }
 0x196   :  { %7589 = vmatprep.subr.bf16.mxu0 %v8934_v40  ;;  %v6701_v42 = vcombine.high %v804_v35, %v808_v36  ;;  %v6700_v43 = vcombine.low %v804_v35, %v808_v36  ;;  %v863_v13 = vld [vmem:[#allocation22 + $0x2a0] sm:$0xff]  ;;  %v860_v17 = vld [vmem:[#allocation22 + $0x288] sm:$0xff] }
 0x197   :  { %7361 = vmatpush3.bf16.msra.mxu1 %v7785_v39  ;;  %v812_v39 = vld [vmem:[#allocation22 + $0x108] sm:$0xff]  ;;  %v871_v21 = vld [vmem:[#allocation22 + $0x2e0] sm:$0xff] }
 0x198   :  { %616 = vmatmul.mubr.bf16.vlgmr.msra.gmra.mrb[0].mxu0 %v316_v44  ;;  %1589 = vmatprep.subr.bf16.mxu1 %v6675_v54  ;;  %v820_v44 = vld [vmem:[#allocation22 + $0x148] sm:$0xff]  ;;  %v6709_v46 = vcombine.high %v812_v39, %v816_v41  ;;  %v835_v54 = vld [vmem:[#allocation22 + $0x1c0] sm:$0xff] }
 0x199   :  { %7590 = vmatpush3.bf16.msra.mxu0 %v7787_v47  ;;  %7605 = vmatprep.mubr.msk.bf16.mxu0 %vm8935_vm0, %v8934_v40  ;;  %v6708_v47 = vcombine.low %v812_v39, %v816_v41  ;;  %v6716_v51 = vcombine.low %v820_v44, %v824_v45  ;;  %v6731_v56 = vcombine.high %v835_v54, %v839_v55  ;;  %v864_v18 = vld [vmem:[#allocation22 + $0x2a8] sm:$0xff]  ;;  %v879_v30 = vld [vmem:[#allocation22 + $0x320] sm:$0xff] }
 0x19a   :  { %656 = vmatmul.mubr.bf16.vlgmr.msra.gmra.mrb[0].mxu1 %v318_v48  ;;  %7591 = vmatprep.subr.bf16.mxu0 %v8934_v40  ;;  %v828_v48 = vld [vmem:[#allocation22 + $0x188] sm:$0xff]  ;;  %v6730_v59 = vcombine.low %v835_v54, %v839_v55  ;;  %v883_v35 = vld [vmem:[#allocation22 + $0x340] sm:$0xff] }
 0x19b   :  { %1590 = vmatpush1.bf16.msra.mxu1 %v6674_v53  ;;  %v6725_v52 = vcombine.high %v828_v48, %v832_v49  ;;  %v6724_v53 = vcombine.low %v828_v48, %v832_v49  ;;  %v872_v23 = vld [vmem:[#allocation22 + $0x2e8] sm:$0xff]  ;;  %v887_v36 = vld [vmem:[#allocation22 + $0x360] sm:$0xff] }
 0x19c   :  { %1591 = vmatprep.subr.bf16.mxu1 %v6683_v57  ;;  %v836_v57 = vld [vmem:[#allocation22 + $0x1c8] sm:$0xff] }
 0x19d   :  { %7592 = vmatpush3.bf16.msra.mxu0 %v7788_v50  ;;  %v6717_v50 = vcombine.high %v820_v44, %v824_v45  ;;  %v876_v31 = vld [vmem:[#allocation22 + $0x308] sm:$0xff]  ;;  %v891_v44 = vld [vmem:[#allocation22 + $0x380] sm:$0xff] }
 0x19e   :  { %7593 = vmatprep.subr.bf16.mxu0 %v8934_v40  ;;  %v884_v39 = vld [vmem:[#allocation22 + $0x348] sm:$0xff]  ;;  %v895_v45 = vld [vmem:[#allocation22 + $0x3a0] sm:$0xff] }
 0x19f   :  { %1592 = vmatpush1.bf16.msra.mxu1 %v6682_v61  ;;  %v6733_v61 = vcombine.high %v836_v57, %v840_v58  ;;  %v888_v41 = vld [vmem:[#allocation22 + $0x368] sm:$0xff]  ;;  %v6786_v55 = vcombine.low %v891_v44, %v895_v45 }
 0x1a0   :  { %1593 = vmatprep.subr.bf16.mxu1 %v6691_v62  ;;  %v843_v62 = vld [vmem:[#allocation22 + $0x200] sm:$0xff]  ;;  %v892_v48 = vld [vmem:[#allocation22 + $0x388] sm:$0xff] }
 0x1a1   :  { %7594 = vmatpush3.bf16.msra.mxu0 %v7789_v60  ;;  %v6732_v60 = vcombine.low %v836_v57, %v840_v58  ;;  %v6738_v3 = vcombine.low %v843_v62, %v847_v63  ;;  %v896_v49 = vld [vmem:[#allocation22 + $0x3a8] sm:$0xff]  ;;  %v899_v57 = vld [vmem:[#allocation22 + $0x3c0] sm:$0xff] }
 0x1a2   :  { %7595 = vmatprep.subr.bf16.mxu0 %v8934_v40  ;;  %v6789_v54 = vcombine.high %v892_v48, %v896_v49  ;;  %v903_v58 = vld [vmem:[#allocation22 + $0x3e0] sm:$0xff] }
 0x1a3   :  { %1594 = vmatpush1.bf16.msra.mxu1 %v6690_v2  ;;  %v848_v2 = vld [vmem:[#allocation22 + $0x228] sm:$0xff] }
 0x1a4   :  { %1595 = vmatprep.subr.bf16.mxu1 %v6699_v6  ;;  %v6740_v4 = vcombine.low %v844_v0, %v848_v2  ;;  %v851_v6 = vld [vmem:[#allocation22 + $0x240] sm:$0xff] }
 0x1a5   :  { %7596 = vmatpush3.bf16.msra.mxu0 %v7790_v1  ;;  %v6739_v1 = vcombine.high %v843_v62, %v847_v63  ;;  %v6794_v62 = vcombine.low %v899_v57, %v903_v58 }
 0x1a6   :  { %7597 = vmatprep.subr.bf16.mxu0 %v8934_v40 }
 0x1a7   :  { %1596 = vmatpush1.bf16.msra.mxu1 %v6698_v7  ;;  %v855_v7 = vld [vmem:[#allocation22 + $0x260] sm:$0xff] }
 0x1a8   :  { %1597 = vmatprep.subr.bf16.mxu1 %v6707_v11  ;;  %v6746_v9 = vcombine.low %v851_v6, %v855_v7  ;;  %v856_v11 = vld [vmem:[#allocation22 + $0x268] sm:$0xff] }
 0x1a9   :  { %7598 = vmatpush3.bf16.msra.mxu0 %v7791_v5  ;;  %v6741_v5 = vcombine.high %v844_v0, %v848_v2  ;;  %v6748_v14 = vcombine.low %v852_v8, %v856_v11  ;;  %v785_v2 = vld [vmem:[#allocation22 + $0x30] sm:$0xff] }
 0x1aa   :  { %7599 = vmatprep.subr.bf16.mxu0 %v8934_v40 }
 0x1ab   :  { %1598 = vmatpush1.bf16.msra.mxu1 %v6706_v12  ;;  %v859_v12 = vld [vmem:[#allocation22 + $0x280] sm:$0xff] }
 0x1ac   :  { %1599 = vmatprep.subr.bf16.mxu1 %v6715_v16  ;;  %v6755_v16 = vcombine.high %v859_v12, %v863_v13  ;;  %v6754_v24 = vcombine.low %v859_v12, %v863_v13 }
 0x1ad   :  { %7600 = vmatpush3.bf16.msra.mxu0 %v7792_v10  ;;  %v6747_v10 = vcombine.high %v851_v6, %v855_v7 }
 0x1ae   :  { %7601 = vmatprep.subr.bf16.mxu0 %v8934_v40 }
 0x1af   :  { %1600 = vmatpush1.bf16.msra.mxu1 %v6714_v19  ;;  %v867_v19 = vld [vmem:[#allocation22 + $0x2c0] sm:$0xff] }
 0x1b0   :  { %1601 = vmatprep.subr.bf16.mxu1 %v6723_v22  ;;  %v868_v22 = vld [vmem:[#allocation22 + $0x2c8] sm:$0xff] }
 0x1b1   :  { %7602 = vmatpush3.bf16.msra.mxu0 %v7793_v15  ;;  %v6749_v15 = vcombine.high %v852_v8, %v856_v11 }
 0x1b2   :  { %7603 = vmatprep.subr.bf16.mxu0 %v8934_v40 }
 0x1b3   :  { %1602 = vmatpush1.bf16.msra.mxu1 %v6722_v26  ;;  %v6763_v26 = vcombine.high %v867_v19, %v871_v21 }
 0x1b4   :  { %1603 = vmatprep.subr.bf16.mxu1 %v6731_v56  ;;  %v6788_v56 = vcombine.low %v892_v48, %v896_v49  ;;  %v809_v48 = vld [vmem:[#allocation22 + $0xf0] sm:$0xff]  ;;  %v806_v49 = vld [vmem:[#allocation22 + $0xd8] sm:$0xff] }
 0x1b5   :  { %7604 = vmatpush3.bf16.msra.mxu0 %v7794_v20  ;;  %v6757_v20 = vcombine.high %v860_v17, %v864_v18 }
 0x1b6   :  { %1630 = vmatprep.subr.bf16.mxu0 %v6677_v25  ;;  %v6756_v25 = vcombine.low %v860_v17, %v864_v18 }
 0x1b7   :  { %1604 = vmatpush1.bf16.msra.mxu1 %v6730_v59  ;;  %v900_v59 = vld [vmem:[#allocation22 + $0x3c8] sm:$0xff] }
 0x1b8   :  { %7606 = vmatmul.mubr.bf16.vlgmr.msra.gmra.mrb[4].mxu0 %v664_v27  ;;  %1605 = vmatprep.subr.bf16.mxu1 %v6739_v1  ;;  %v6765_v27 = vcombine.high %v868_v22, %v872_v23  ;;  %v781_v1 = vld [vmem:[#allocation22 + $0x10] sm:$0xff] }
 0x1b9   :  { %1631 = vmatpush1.bf16.msra.mxu0 %v6676_v28  ;;  %v875_v28 = vld [vmem:[#allocation22 + $0x300] sm:$0xff]  ;;  %v6678_v6 = vcombine.low %v781_v1, %v785_v2 }
 0x1ba   :  { %1632 = vmatprep.subr.bf16.mxu0 %v6685_v32  ;;  %v880_v32 = vld [vmem:[#allocation22 + $0x328] sm:$0xff] }
 0x1bb   :  { %1606 = vmatpush1.bf16.msra.mxu1 %v6738_v3  ;;  %v782_v3 = vld [vmem:[#allocation22 + $0x18] sm:$0xff] }
 0x1bc   :  { %1607 = vmatprep.subr.bf16.mxu1 %v6747_v10  ;;  %v6632_v10 = vld [vmem:[#allocation6] ss:$0 sm:$0xff] }
 0x1bd   :  { %1633 = vmatpush1.bf16.msra.mxu0 %v6684_v33  ;;  %v6762_v33 = vcombine.low %v867_v19, %v871_v21 }
 0x1be   :  { %1634 = vmatprep.subr.bf16.mxu0 %v6693_v37  ;;  %v6764_v37 = vcombine.low %v868_v22, %v872_v23  ;;  %v6665_v22 = vld [vmem:[#allocation9] ss:$0 sm:$0xff] }
 0x1bf   :  { %1608 = vmatpush1.bf16.msra.mxu1 %v6746_v9 }
 0x1c0   :  { %1609 = vmatprep.subr.bf16.mxu1 %v6755_v16 }
 0x1c1   :  { %1635 = vmatpush1.bf16.msra.mxu0 %v6692_v38  ;;  %v6771_v38 = vcombine.high %v875_v28, %v879_v30 }
 0x1c2   :  { %1636 = vmatprep.subr.bf16.mxu0 %v6701_v42  ;;  %v6773_v42 = vcombine.high %v876_v31, %v880_v32 }
 0x1c3   :  { %1610 = vmatpush1.bf16.msra.mxu1 %v6754_v24 }
 0x1c4   :  { %1611 = vmatprep.subr.bf16.mxu1 %v6763_v26 }
 0x1c5   :  { %1637 = vmatpush1.bf16.msra.mxu0 %v6700_v43  ;;  %v6770_v43 = vcombine.low %v875_v28, %v879_v30  ;;  %v789_v28 = vld [vmem:[#allocation22 + $0x50] sm:$0xff] }
 0x1c6   :  { %1638 = vmatprep.subr.bf16.mxu0 %v6709_v46  ;;  %v6772_v46 = vcombine.low %v876_v31, %v880_v32  ;;  %v793_v30 = vld [vmem:[#allocation22 + $0x70] sm:$0xff]  ;;  %v790_v31 = vld [vmem:[#allocation22 + $0x58] sm:$0xff] }
 0x1c7   :  { %1612 = vmatpush1.bf16.msra.mxu1 %v6762_v33  ;;  %v794_v32 = vld [vmem:[#allocation22 + $0x78] sm:$0xff] }
 0x1c8   :  { %1613 = vmatprep.subr.bf16.mxu1 %v6771_v38  ;;  %v801_v38 = vld [vmem:[#allocation22 + $0xb0] sm:$0xff] }
 0x1c9   :  { %1639 = vmatpush1.bf16.msra.mxu0 %v6708_v47  ;;  %v6779_v47 = vcombine.high %v883_v35, %v887_v36 }
 0x1ca   :  { %1640 = vmatprep.subr.bf16.mxu0 %v6717_v50  ;;  %v6781_v50 = vcombine.high %v884_v39, %v888_v41 }
 0x1cb   :  { %1614 = vmatpush1.bf16.msra.mxu1 %v6770_v43  ;;  %v6687_v43 = vcombine.high %v789_v28, %v793_v30 }
 0x1cc   :  { %1615 = vmatprep.subr.bf16.mxu1 %v6779_v47  ;;  %v805_v47 = vld [vmem:[#allocation22 + $0xd0] sm:$0xff] }
 0x1cd   :  { %1641 = vmatpush1.bf16.msra.mxu0 %v6716_v51  ;;  %v6778_v51 = vcombine.low %v883_v35, %v887_v36 }
 0x1ce   :  { %1642 = vmatprep.subr.bf16.mxu0 %v6725_v52  ;;  %v6780_v52 = vcombine.low %v884_v39, %v888_v41  ;;  %v798_v39 = vld [vmem:[#allocation22 + $0x98] sm:$0xff] }
 0x1cf   :  { %1616 = vmatpush1.bf16.msra.mxu1 %v6778_v51  ;;  %v802_v41 = vld [vmem:[#allocation22 + $0xb8] sm:$0xff] }
 0x1d1   :  { %1643 = vmatpush1.bf16.msra.mxu0 %v6724_v53  ;;  %v6787_v53 = vcombine.high %v891_v44, %v895_v45  ;;  %v6689_v44 = vcombine.high %v790_v31, %v794_v32  ;;  %v6686_v45 = vcombine.low %v789_v28, %v793_v30 }
 0x1d2   :  { %1644 = vmatprep.subr.bf16.mxu0 %v6733_v61  ;;  %v904_v61 = vld [vmem:[#allocation22 + $0x3e8] sm:$0xff] }
 0x1d3   :  { %1617 = vmatprep.subr.bf16.mxu1 %v6787_v53  ;;  %v6796_v63 = vcombine.low %v900_v59, %v904_v61  ;;  %v6797_v0 = vcombine.high %v900_v59, %v904_v61  ;;  %v6703_v59 = vcombine.high %v805_v47, %v809_v48  ;;  %v6702_v61 = vcombine.low %v805_v47, %v809_v48  ;;  %v865_v47 = vld [vmem:[#allocation22 + $0x2b0] sm:$0xff]  ;;  %v862_v48 = vld [vmem:[#allocation22 + $0x298] sm:$0xff] }
 0x1d4   :  { %1618 = vmatpush1.bf16.msra.mxu1 %v6786_v55  ;;  %v813_v55 = vld [vmem:[#allocation22 + $0x110] sm:$0xff] }
 0x1d5   :  { %1645 = vmatpush1.bf16.msra.mxu0 %v6732_v60  ;;  %v6795_v60 = vcombine.high %v899_v57, %v903_v58  ;;  %v814_v57 = vld [vmem:[#allocation22 + $0x118] sm:$0xff] }
 0x1d6   :  { %1646 = vmatprep.subr.bf16.mxu0 %v6741_v5  ;;  %v786_v5 = vld [vmem:[#allocation22 + $0x38] sm:$0xff] }
 0x1d7   :  { %1619 = vmatprep.subr.bf16.mxu1 %v6795_v60  ;;  %v6680_v7 = vcombine.low %v782_v3, %v786_v5  ;;  %v6681_v8 = vcombine.high %v782_v3, %v786_v5  ;;  %v818_v58 = vld [vmem:[#allocation22 + $0x138] sm:$0xff] }
 0x1d8   :  { %1620 = vmatpush1.bf16.msra.mxu1 %v6794_v62 }
 0x1d9   :  { %1647 = vmatpush1.bf16.msra.mxu0 %v6740_v4  ;;  %v6679_v4 = vcombine.high %v781_v1, %v785_v2  ;;  %v822_v1 = vld [vmem:[#allocation22 + $0x158] sm:$0xff] }
 0x1da   :  { %1648 = vmatprep.subr.bf16.mxu0 %v6749_v15  ;;  %v826_v2 = vld [vmem:[#allocation22 + $0x178] sm:$0xff] }
 0x1db   :  { %1671 = vmatprep.subr.bf16.mxu1 %v6679_v4  ;;  %v6713_v4 = vcombine.high %v814_v57, %v818_v58 }
 0x1dd   :  { %1649 = vmatpush1.bf16.msra.mxu0 %v6748_v14 }
 0x1de   :  { %1650 = vmatprep.subr.bf16.mxu0 %v6757_v20 }
 0x1e1   :  { %1651 = vmatpush1.bf16.msra.mxu0 %v6756_v25 }
 0x1e2   :  { %1652 = vmatprep.subr.bf16.mxu0 %v6765_v27 }
 0x1e5   :  { %1653 = vmatpush1.bf16.msra.mxu0 %v6764_v37  ;;  %v797_v37 = vld [vmem:[#allocation22 + $0x90] sm:$0xff] }
 0x1e6   :  { %1654 = vmatprep.subr.bf16.mxu0 %v6773_v42  ;;  %v6695_v51 = vcombine.high %v797_v37, %v801_v38  ;;  %v6694_v53 = vcombine.low %v797_v37, %v801_v38  ;;  %v857_v37 = vld [vmem:[#allocation22 + $0x270] sm:$0xff]  ;;  %v854_v38 = vld [vmem:[#allocation22 + $0x258] sm:$0xff] }
 0x1e9   :  { %1655 = vmatpush1.bf16.msra.mxu0 %v6772_v46  ;;  %v6688_v46 = vcombine.low %v790_v31, %v794_v32 }
 0x1ea   :  { %1656 = vmatprep.subr.bf16.mxu0 %v6781_v50  ;;  %v810_v50 = vld [vmem:[#allocation22 + $0xf8] sm:$0xff] }
 0x1eb   :  { %v6705_v60 = vcombine.high %v806_v49, %v810_v50  ;;  %v6704_v62 = vcombine.low %v806_v49, %v810_v50  ;;  %v866_v49 = vld [vmem:[#allocation22 + $0x2b8] sm:$0xff] }
 0x1ed   :  { %1657 = vmatpush1.bf16.msra.mxu0 %v6780_v52  ;;  %v6697_v52 = vcombine.high %v798_v39, %v802_v41 }
 0x1ee   :  { %1658 = vmatprep.subr.bf16.mxu0 %v6789_v54  ;;  %v6696_v54 = vcombine.low %v798_v39, %v802_v41  ;;  %v858_v39 = vld [vmem:[#allocation22 + $0x278] sm:$0xff] }
 0x1f1   :  { %1659 = vmatpush1.bf16.msra.mxu0 %v6788_v56  ;;  %v817_v56 = vld [vmem:[#allocation22 + $0x130] sm:$0xff] }
 0x1f2   :  { %1660 = vmatprep.subr.bf16.mxu0 %v6797_v0  ;;  %v825_v0 = vld [vmem:[#allocation22 + $0x170] sm:$0xff]  ;;  %v6711_v3 = vcombine.high %v813_v55, %v817_v56  ;;  %v6710_v5 = vcombine.low %v813_v55, %v817_v56  ;;  %v870_v56 = vld [vmem:[#allocation22 + $0x2d8] sm:$0xff] }
 0x1f3   :  { %v873_v55 = vld [vmem:[#allocation22 + $0x2f0] sm:$0xff] }
 0x1f5   :  { %1661 = vmatpush1.bf16.msra.mxu0 %v6796_v63  ;;  %v821_v63 = vld [vmem:[#allocation22 + $0x150] sm:$0xff] }
 0x1f6   :  { %1712 = vmatprep.subr.bf16.mxu0 %v6681_v8  ;;  %v833_v8 = vld [vmem:[#allocation22 + $0x1b0] sm:$0xff] }
 0x26b   :  { %v7340_v9 = vpop.f32.mrb[0].mxu0 }
 0x26c   :  { %v7341_v11 = vpop.f32.mrb[1].mxu0 }
 0x26d   :  { %v7342_v12 = vadd.f32 %v7341_v11, %v7340_v9  ;;  %v7343_v13 = vpop.f32.mrb[2].mxu0  ;;  %v7362_v14 = vpop.f32.mrb[0].mxu1  ;;  %v830_v9 = vld [vmem:[#allocation22 + $0x198] sm:$0xff]  ;;  %v6719_v11 = vcombine.high %v821_v63, %v825_v0 }
 0x26e   :  { %v7344_v15 = vpop.f32.mrb[3].mxu0  ;;  %v7363_v16 = vpop.f32.mrb[1].mxu1  ;;  %v6718_v13 = vcombine.low %v821_v63, %v825_v0 }
 0x26f   :  { %v618_v17 = vadd.f32 %v7342_v12, %v6632_v10  ;;  %v7364_v18 = vadd.f32 %v7363_v16, %v7362_v14  ;;  %v7365_v19 = vpop.f32.mrb[2].mxu1  ;;  %v834_v10 = vld [vmem:[#allocation22 + $0x1b8] sm:$0xff]  ;;  %v6721_v12 = vcombine.high %v822_v1, %v826_v2  ;;  %v6720_v14 = vcombine.low %v822_v1, %v826_v2  ;;  %v837_v15 = vld [vmem:[#allocation22 + $0x1d0] sm:$0xff] }
 0x270   :  { %v7366_v20 = vpop.f32.mrb[3].mxu1  ;;  %v841_v16 = vld [vmem:[#allocation22 + $0x1f0] sm:$0xff]  ;;  %v878_v2 = vld [vmem:[#allocation22 + $0x318] sm:$0xff] }
 0x271   :  { %v658_v21 = vadd.f32 %v7364_v18, %v618_v17  ;;  %v838_v17 = vld [vmem:[#allocation22 + $0x1d8] sm:$0xff]  ;;  %v6729_v20 = vcombine.high %v830_v9, %v834_v10  ;;  %v6735_v28 = vcombine.high %v837_v15, %v841_v16  ;;  %v6734_v31 = vcombine.low %v837_v15, %v841_v16  ;;  %v881_v1 = vld [vmem:[#allocation22 + $0x330] sm:$0xff] }
 0x272   :  { %v842_v18 = vld [vmem:[#allocation22 + $0x1f8] sm:$0xff]  ;;  %v893_v16 = vld [vmem:[#allocation22 + $0x390] sm:$0xff] }
 0x273   :  { %v9313_v26 = vmax.f32 %v658_v21, 0.0  ;;  %v6737_v30 = vcombine.high %v838_v17, %v842_v18  ;;  %v6736_v32 = vcombine.low %v838_v17, %v842_v18  ;;  %v897_v17 = vld [vmem:[#allocation22 + $0x3b0] sm:$0xff]  ;;  %v894_v18 = vld [vmem:[#allocation22 + $0x398] sm:$0xff] }
 0x275   :  { %v9323_v42 = vpack.c.bf16 %v9313_v26, %v9313_v26 }
 0x28b   :  { %v770_v23 = vpop.f32.mrb[4].mxu0 }
 0x28c   :  { %v771_v24 = vadd.f32 %v6665_v22, %v770_v23  ;;  %v7607_v25 = vpop.f32.mrb[5].mxu0  ;;  %v6728_v22 = vcombine.low %v830_v9, %v834_v10  ;;  %v845_v23 = vld [vmem:[#allocation22 + $0x210] sm:$0xff]  ;;  %v886_v10 = vld [vmem:[#allocation22 + $0x358] sm:$0xff] }
 0x28d   :  { %v773_v27 = vpop.f32.mrb[6].mxu0  ;;  %v846_v25 = vld [vmem:[#allocation22 + $0x218] sm:$0xff]  ;;  %v889_v9 = vld [vmem:[#allocation22 + $0x370] sm:$0xff] }
 0x28e   :  { %v9315_v33 = vmax.f32 %v771_v24, 0.0  ;;  %v7608_v35 = vpop.f32.mrb[7].mxu0  ;;  %v849_v24 = vld [vmem:[#allocation22 + $0x230] sm:$0xff]  ;;  %v850_v27 = vld [vmem:[#allocation22 + $0x238] sm:$0xff] }
 0x28f   :  { %v853_v35 = vld [vmem:[#allocation22 + $0x250] sm:$0xff]  ;;  %v6743_v41 = vcombine.high %v845_v23, %v849_v24 }
 0x290   :  { %v9319_v36 = vpack.c.bf16 %v9315_v33, %v9315_v33  ;;  %v6751_v50 = vcombine.high %v853_v35, %v857_v37 }
 0x292   :  { %1621 = vmatprep.mubr.bf16.mxu1 %v9319_v36  ;;  %1662 = vmatprep.mubr.bf16.mxu0 %v9319_v36 }
 0x293   :  { %1622 = vmatmul.mubr.bf16.vlgmr.msra.gmra.mrb[4].mxu1 %v9323_v42  ;;  %1663 = vmatmul.mubr.bf16.vlgmr.msra.gmra.mrb[8].mxu0 %v9323_v42 }
 0x294   :  { %1672 = vmatpush1.bf16.msra.mxu1 %v6678_v6  ;;  %1713 = vmatpush1.bf16.msra.mxu0 %v6680_v7  ;;  %v6712_v6 = vcombine.low %v814_v57, %v818_v58  ;;  %v829_v7 = vld [vmem:[#allocation22 + $0x190] sm:$0xff]  ;;  %v874_v57 = vld [vmem:[#allocation22 + $0x2f8] sm:$0xff] }
 0x295   :  { %1703 = vmatprep.mubr.bf16.mxu1 %v9319_v36  ;;  %1744 = vmatprep.mubr.bf16.mxu0 %v9319_v36  ;;  %v6727_v19 = vcombine.high %v829_v7, %v833_v8  ;;  %v6726_v21 = vcombine.low %v829_v7, %v833_v8  ;;  %v6769_v0 = vcombine.high %v870_v56, %v874_v57  ;;  %v885_v8 = vld [vmem:[#allocation22 + $0x350] sm:$0xff] }
 0x296   :  { %1673 = vmatprep.subr.bf16.mxu1 %v6687_v43  ;;  %1714 = vmatprep.subr.bf16.mxu0 %v6689_v44  ;;  %v6745_v43 = vcombine.high %v846_v25, %v850_v27  ;;  %v6742_v44 = vcombine.low %v845_v23, %v849_v24  ;;  %v901_v24 = vld [vmem:[#allocation22 + $0x3d0] sm:$0xff] }
 0x298   :  { %1674 = vmatpush1.bf16.msra.mxu1 %v6686_v45  ;;  %1715 = vmatpush1.bf16.msra.mxu0 %v6688_v46  ;;  %v6744_v45 = vcombine.low %v846_v25, %v850_v27  ;;  %v861_v46 = vld [vmem:[#allocation22 + $0x290] sm:$0xff]  ;;  %v902_v27 = vld [vmem:[#allocation22 + $0x3d8] sm:$0xff] }
 0x299   :  { %1675 = vmatprep.subr.bf16.mxu1 %v6695_v51  ;;  %1716 = vmatprep.subr.bf16.mxu0 %v6697_v52  ;;  %v6753_v51 = vcombine.high %v854_v38, %v858_v39  ;;  %v6750_v52 = vcombine.low %v853_v35, %v857_v37  ;;  %v6759_v58 = vcombine.high %v861_v46, %v865_v47  ;;  %v905_v25 = vld [vmem:[#allocation22 + $0x3f0] sm:$0xff] }
 0x29a   :  { %v6798_v37 = vcombine.low %v901_v24, %v905_v25 }
 0x29c   :  { %1676 = vmatpush1.bf16.msra.mxu1 %v6694_v53  ;;  %1717 = vmatpush1.bf16.msra.mxu0 %v6696_v54  ;;  %v6752_v53 = vcombine.low %v854_v38, %v858_v39  ;;  %v869_v54 = vld [vmem:[#allocation22 + $0x2d0] sm:$0xff] }
 0x29d   :  { %1677 = vmatprep.subr.bf16.mxu1 %v6703_v59  ;;  %1718 = vmatprep.subr.bf16.mxu0 %v6705_v60  ;;  %v6761_v59 = vcombine.high %v862_v48, %v866_v49  ;;  %v6758_v60 = vcombine.low %v861_v46, %v865_v47  ;;  %v6767_v63 = vcombine.high %v869_v54, %v873_v55  ;;  %v7797_v39 = vld [vmem:[#allocation24 + $0x4] ss:$16 sps:$4 sm:$0xff]   ;;  %v7806_v46 = vld [vmem:[#allocation24 + $0x2c] ss:$16 sps:$4 sm:$0xff]   ;;  %v7801_v47 = vld [vmem:[#allocation24 + $0x20] ss:$16 sps:$4 sm:$0xff]  }
 0x2a0   :  { %1678 = vmatpush1.bf16.msra.mxu1 %v6702_v61  ;;  %1719 = vmatpush1.bf16.msra.mxu0 %v6704_v62  ;;  %v6760_v61 = vcombine.low %v862_v48, %v866_v49  ;;  %v877_v62 = vld [vmem:[#allocation22 + $0x310] sm:$0xff]  ;;  %v7804_v48 = vld [vmem:[#allocation24 + $0x28] ss:$16 sps:$4 sm:$0xff]  }
 0x2a1   :  { %1679 = vmatprep.subr.bf16.mxu1 %v6711_v3  ;;  %1720 = vmatprep.subr.bf16.mxu0 %v6713_v4  ;;  %v882_v3 = vld [vmem:[#allocation22 + $0x338] sm:$0xff]  ;;  %v6766_v4 = vcombine.low %v869_v54, %v873_v55  ;;  %v7809_v49 = vld [vmem:[#allocation24 + $0x44] ss:$16 sps:$4 sm:$0xff]   ;;  %v7813_v55 = vld [vmem:[#allocation24 + $0x60] ss:$16 sps:$4 sm:$0xff]  }
 0x2a2   :  { %v6777_v7 = vcombine.high %v878_v2, %v882_v3  ;;  %v7818_v54 = vld [vmem:[#allocation24 + $0x6c] ss:$16 sps:$4 sm:$0xff]  }
 0x2a4   :  { %1680 = vmatpush1.bf16.msra.mxu1 %v6710_v5  ;;  %1721 = vmatpush1.bf16.msra.mxu0 %v6712_v6  ;;  %v6768_v5 = vcombine.low %v870_v56, %v874_v57  ;;  %v6775_v6 = vcombine.high %v877_v62, %v881_v1  ;;  %v7816_v56 = vld [vmem:[#allocation24 + $0x68] ss:$16 sps:$4 sm:$0xff]   ;;  %v7821_v57 = vld [vmem:[#allocation24 + $0x84] ss:$16 sps:$4 sm:$0xff]  }
 0x2a5   :  { %1681 = vmatprep.subr.bf16.mxu1 %v6719_v11  ;;  %1722 = vmatprep.subr.bf16.mxu0 %v6721_v12  ;;  %v890_v11 = vld [vmem:[#allocation22 + $0x378] sm:$0xff]  ;;  %v6774_v12 = vcombine.low %v877_v62, %v881_v1  ;;  %v7833_v1 = vld [vmem:[#allocation24 + $0xc4] ss:$16 sps:$4 sm:$0xff]  }
 0x2a6   :  { %v6785_v15 = vcombine.high %v886_v10, %v890_v11  ;;  %v7830_v62 = vld [vmem:[#allocation24 + $0xac] ss:$16 sps:$4 sm:$0xff]  }
 0x2a8   :  { %1682 = vmatpush1.bf16.msra.mxu1 %v6718_v13  ;;  %1723 = vmatpush1.bf16.msra.mxu0 %v6720_v14  ;;  %v6776_v13 = vcombine.low %v878_v2, %v882_v3  ;;  %v6783_v14 = vcombine.high %v885_v8, %v889_v9  ;;  %v7836_v2 = vld [vmem:[#allocation24 + $0xcc] ss:$16 sps:$4 sm:$0xff]   ;;  %v7831_v3 = vld [vmem:[#allocation24 + $0xc0] ss:$16 sps:$4 sm:$0xff]  }
 0x2a9   :  { %1683 = vmatprep.subr.bf16.mxu1 %v6727_v19  ;;  %1724 = vmatprep.subr.bf16.mxu0 %v6729_v20  ;;  %v898_v19 = vld [vmem:[#allocation22 + $0x3b8] sm:$0xff]  ;;  %v6782_v20 = vcombine.low %v885_v8, %v889_v9  ;;  %v7845_v9 = vld [vmem:[#allocation24 + $0x104] ss:$16 sps:$4 sm:$0xff]  }
 0x2aa   :  { %v6793_v23 = vcombine.high %v894_v18, %v898_v19  ;;  %v7840_v8 = vld [vmem:[#allocation24 + $0xe8] ss:$16 sps:$4 sm:$0xff]  }
 0x2ac   :  { %1684 = vmatpush1.bf16.msra.mxu1 %v6726_v21  ;;  %1725 = vmatpush1.bf16.msra.mxu0 %v6728_v22  ;;  %v6784_v21 = vcombine.low %v886_v10, %v890_v11  ;;  %v6791_v22 = vcombine.high %v893_v16, %v897_v17  ;;  %v7848_v10 = vld [vmem:[#allocation24 + $0x10c] ss:$16 sps:$4 sm:$0xff]   ;;  %v7843_v11 = vld [vmem:[#allocation24 + $0x100] ss:$16 sps:$4 sm:$0xff]  }
 0x2ad   :  { %1685 = vmatprep.subr.bf16.mxu1 %v6735_v28  ;;  %1726 = vmatprep.subr.bf16.mxu0 %v6737_v30  ;;  %v906_v28 = vld [vmem:[#allocation22 + $0x3f8] sm:$0xff]  ;;  %v6790_v30 = vcombine.low %v893_v16, %v897_v17  ;;  %v7857_v17 = vld [vmem:[#allocation24 + $0x144] ss:$16 sps:$4 sm:$0xff]  }
 0x2ae   :  { %v6801_v35 = vcombine.high %v902_v27, %v906_v28  ;;  %v6800_v38 = vcombine.low %v902_v27, %v906_v28  ;;  %v7852_v16 = vld [vmem:[#allocation24 + $0x128] ss:$16 sps:$4 sm:$0xff]   ;;  %v7872_v27 = vld [vmem:[#allocation24 + $0x18c] ss:$16 sps:$4 sm:$0xff]   ;;  %v7867_v28 = vld [vmem:[#allocation24 + $0x180] ss:$16 sps:$4 sm:$0xff]  }
 0x2b0   :  { %1686 = vmatpush1.bf16.msra.mxu1 %v6734_v31  ;;  %1727 = vmatpush1.bf16.msra.mxu0 %v6736_v32  ;;  %v6792_v31 = vcombine.low %v894_v18, %v898_v19  ;;  %v6799_v32 = vcombine.high %v901_v24, %v905_v25  ;;  %v7860_v18 = vld [vmem:[#allocation24 + $0x14c] ss:$16 sps:$4 sm:$0xff]   ;;  %v7855_v19 = vld [vmem:[#allocation24 + $0x140] ss:$16 sps:$4 sm:$0xff]   ;;  %v7864_v24 = vld [vmem:[#allocation24 + $0x168] ss:$16 sps:$4 sm:$0xff]  }
 0x2b1   :  { %1687 = vmatprep.subr.bf16.mxu1 %v6743_v41  ;;  %1728 = vmatprep.subr.bf16.mxu0 %v6745_v43  ;;  %v7800_v41 = vld [vmem:[#allocation24 + $0xc] ss:$16 sps:$4 sm:$0xff]   ;;  %v7795_v43 = vld [vmem:[#allocation24] ss:$16 sps:$4 sm:$0xff]   ;;  %v7869_v25 = vld [vmem:[#allocation24 + $0x184] ss:$16 sps:$4 sm:$0xff]  }
 0x2b4   :  { %1688 = vmatpush1.bf16.msra.mxu1 %v6742_v44  ;;  %1729 = vmatpush1.bf16.msra.mxu0 %v6744_v45  ;;  %v7798_v44 = vld [vmem:[#allocation24 + $0x8] ss:$16 sps:$4 sm:$0xff]   ;;  %v7803_v45 = vld [vmem:[#allocation24 + $0x24] ss:$16 sps:$4 sm:$0xff]  }
 0x2b5   :  { %1689 = vmatprep.subr.bf16.mxu1 %v6751_v50  ;;  %1730 = vmatprep.subr.bf16.mxu0 %v6753_v51  ;;  %v7812_v50 = vld [vmem:[#allocation24 + $0x4c] ss:$16 sps:$4 sm:$0xff]   ;;  %v7807_v51 = vld [vmem:[#allocation24 + $0x40] ss:$16 sps:$4 sm:$0xff]  }
 0x2b8   :  { %1690 = vmatpush1.bf16.msra.mxu1 %v6750_v52  ;;  %1731 = vmatpush1.bf16.msra.mxu0 %v6752_v53  ;;  %v7810_v52 = vld [vmem:[#allocation24 + $0x48] ss:$16 sps:$4 sm:$0xff]   ;;  %v7815_v53 = vld [vmem:[#allocation24 + $0x64] ss:$16 sps:$4 sm:$0xff]  }
 0x2b9   :  { %1691 = vmatprep.subr.bf16.mxu1 %v6759_v58  ;;  %1732 = vmatprep.subr.bf16.mxu0 %v6761_v59  ;;  %v7824_v58 = vld [vmem:[#allocation24 + $0x8c] ss:$16 sps:$4 sm:$0xff]   ;;  %v7819_v59 = vld [vmem:[#allocation24 + $0x80] ss:$16 sps:$4 sm:$0xff]  }
 0x2bc   :  { %1692 = vmatpush1.bf16.msra.mxu1 %v6758_v60  ;;  %1733 = vmatpush1.bf16.msra.mxu0 %v6760_v61  ;;  %v7822_v60 = vld [vmem:[#allocation24 + $0x88] ss:$16 sps:$4 sm:$0xff]   ;;  %v7827_v61 = vld [vmem:[#allocation24 + $0xa4] ss:$16 sps:$4 sm:$0xff]  }
 0x2bd   :  { %1693 = vmatprep.subr.bf16.mxu1 %v6767_v63  ;;  %1734 = vmatprep.subr.bf16.mxu0 %v6769_v0  ;;  %v7825_v63 = vld [vmem:[#allocation24 + $0xa0] ss:$16 sps:$4 sm:$0xff]   ;;  %v7828_v0 = vld [vmem:[#allocation24 + $0xa8] ss:$16 sps:$4 sm:$0xff]  }
 0x2c0   :  { %1694 = vmatpush1.bf16.msra.mxu1 %v6766_v4  ;;  %1735 = vmatpush1.bf16.msra.mxu0 %v6768_v5  ;;  %v7834_v4 = vld [vmem:[#allocation24 + $0xc8] ss:$16 sps:$4 sm:$0xff]   ;;  %v7839_v5 = vld [vmem:[#allocation24 + $0xe4] ss:$16 sps:$4 sm:$0xff]  }
 0x2c1   :  { %1695 = vmatprep.subr.bf16.mxu1 %v6775_v6  ;;  %1736 = vmatprep.subr.bf16.mxu0 %v6777_v7  ;;  %v7842_v6 = vld [vmem:[#allocation24 + $0xec] ss:$16 sps:$4 sm:$0xff]   ;;  %v7837_v7 = vld [vmem:[#allocation24 + $0xe0] ss:$16 sps:$4 sm:$0xff]  }
 0x2c4   :  { %1696 = vmatpush1.bf16.msra.mxu1 %v6774_v12  ;;  %1737 = vmatpush1.bf16.msra.mxu0 %v6776_v13  ;;  %v7846_v12 = vld [vmem:[#allocation24 + $0x108] ss:$16 sps:$4 sm:$0xff]   ;;  %v7851_v13 = vld [vmem:[#allocation24 + $0x124] ss:$16 sps:$4 sm:$0xff]  }
 0x2c5   :  { %1697 = vmatprep.subr.bf16.mxu1 %v6783_v14  ;;  %1738 = vmatprep.subr.bf16.mxu0 %v6785_v15  ;;  %v7854_v14 = vld [vmem:[#allocation24 + $0x12c] ss:$16 sps:$4 sm:$0xff]   ;;  %v7849_v15 = vld [vmem:[#allocation24 + $0x120] ss:$16 sps:$4 sm:$0xff]  }
 0x2c8   :  { %1698 = vmatpush1.bf16.msra.mxu1 %v6782_v20  ;;  %1739 = vmatpush1.bf16.msra.mxu0 %v6784_v21  ;;  %v7858_v20 = vld [vmem:[#allocation24 + $0x148] ss:$16 sps:$4 sm:$0xff]   ;;  %v7863_v21 = vld [vmem:[#allocation24 + $0x164] ss:$16 sps:$4 sm:$0xff]  }
 0x2c9   :  { %1699 = vmatprep.subr.bf16.mxu1 %v6791_v22  ;;  %1740 = vmatprep.subr.bf16.mxu0 %v6793_v23  ;;  %v7866_v22 = vld [vmem:[#allocation24 + $0x16c] ss:$16 sps:$4 sm:$0xff]   ;;  %v7861_v23 = vld [vmem:[#allocation24 + $0x160] ss:$16 sps:$4 sm:$0xff]  }
 0x2cc   :  { %1700 = vmatpush1.bf16.msra.mxu1 %v6790_v30  ;;  %1741 = vmatpush1.bf16.msra.mxu0 %v6792_v31  ;;  %v7870_v30 = vld [vmem:[#allocation24 + $0x188] ss:$16 sps:$4 sm:$0xff]   ;;  %v7875_v31 = vld [vmem:[#allocation24 + $0x1a4] ss:$16 sps:$4 sm:$0xff]  }
 0x2cd   :  { %1701 = vmatprep.subr.bf16.mxu1 %v6799_v32  ;;  %1742 = vmatprep.subr.bf16.mxu0 %v6801_v35  ;;  %v7878_v32 = vld [vmem:[#allocation24 + $0x1ac] ss:$16 sps:$4 sm:$0xff]   ;;  %v7873_v35 = vld [vmem:[#allocation24 + $0x1a0] ss:$16 sps:$4 sm:$0xff]  }
 0x2d0   :  { %1702 = vmatpush1.bf16.msra.mxu1 %v6798_v37  ;;  %1743 = vmatpush1.bf16.msra.mxu0 %v6800_v38  ;;  %v7876_v37 = vld [vmem:[#allocation24 + $0x1a8] ss:$16 sps:$4 sm:$0xff]   ;;  %v7881_v38 = vld [vmem:[#allocation24 + $0x1c4] ss:$16 sps:$4 sm:$0xff]  }
 0x2d1   :  { %2555 = vmatprep.subr.bf16.mxu1 %v7797_v39  ;;  %2637 = vmatprep.subr.bf16.mxu0 %v7800_v41  ;;  %v7884_v39 = vld [vmem:[#allocation24 + $0x1cc] ss:$16 sps:$4 sm:$0xff]   ;;  %v7879_v41 = vld [vmem:[#allocation24 + $0x1c0] ss:$16 sps:$4 sm:$0xff]  }
 0x2d3   :  { %1704 = vmatmul.mubr.bf16.vlgmr.msra.gmra.mrb[8].mxu1 %v9323_v42  ;;  %1745 = vmatmul.mubr.bf16.vlgmr.msra.gmra.mrb[12].mxu0 %v9323_v42 }
 0x2d4   :  { %2556 = vmatpush1.bf16.msra.mxu1 %v7795_v43  ;;  %2638 = vmatpush1.bf16.msra.mxu0 %v7798_v44  ;;  %v7882_v43 = vld [vmem:[#allocation24 + $0x1c8] ss:$16 sps:$4 sm:$0xff]   ;;  %v7887_v44 = vld [vmem:[#allocation24 + $0x1e4] ss:$16 sps:$4 sm:$0xff]  }
 0x2d5   :  { %2557 = vmatprep.subr.bf16.mxu1 %v7803_v45  ;;  %2639 = vmatprep.subr.bf16.mxu0 %v7806_v46  ;;  %v7890_v45 = vld [vmem:[#allocation24 + $0x1ec] ss:$16 sps:$4 sm:$0xff]   ;;  %v7885_v46 = vld [vmem:[#allocation24 + $0x1e0] ss:$16 sps:$4 sm:$0xff]  }
 0x2d8   :  { %2558 = vmatpush1.bf16.msra.mxu1 %v7801_v47  ;;  %2640 = vmatpush1.bf16.msra.mxu0 %v7804_v48  ;;  %v7888_v47 = vld [vmem:[#allocation24 + $0x1e8] ss:$16 sps:$4 sm:$0xff]   ;;  %v7893_v48 = vld [vmem:[#allocation24 + $0x204] ss:$16 sps:$4 sm:$0xff]  }
 0x2d9   :  { %2559 = vmatprep.subr.bf16.mxu1 %v7809_v49  ;;  %2641 = vmatprep.subr.bf16.mxu0 %v7812_v50  ;;  %v7896_v49 = vld [vmem:[#allocation24 + $0x20c] ss:$16 sps:$4 sm:$0xff]   ;;  %v9334_v50 = vsub.s32 0, %v9293_v29 }
 0x2dc   :  { %2560 = vmatpush1.bf16.msra.mxu1 %v7807_v51  ;;  %2642 = vmatpush1.bf16.msra.mxu0 %v7810_v52  ;;  %v9339_v51 = vld [vmem:[%s9618_s17] sm:$0xff]  ;;  %v9342_v52 = vsub.s32 1, %v9293_v29 }
 0x2dd   :  { %2561 = vmatprep.subr.bf16.mxu1 %v7815_v53  ;;  %2643 = vmatprep.subr.bf16.mxu0 %v7818_v54  ;;  %v9345_v53 = vsub.s32 3, %v9293_v29  ;;  %v912_v54 = vrot.slane %v9339_v51, %v9334_v50 }
 0x2e0   :  { %2562 = vmatpush1.bf16.msra.mxu1 %v7813_v55  ;;  %2644 = vmatpush1.bf16.msra.mxu0 %v7816_v56  ;;  %v916_v55 = vrot.slane %v9339_v51, %v9342_v52  ;;  %v924_v56 = vrot.slane %v9339_v51, %v9345_v53 }
 0x2e1   :  { %2563 = vmatprep.subr.bf16.mxu1 %v7821_v57  ;;  %2645 = vmatprep.subr.bf16.mxu0 %v7824_v58 }
 0x2e4   :  { %2564 = vmatpush1.bf16.msra.mxu1 %v7819_v59  ;;  %2646 = vmatpush1.bf16.msra.mxu0 %v7822_v60 }
 0x2e5   :  { %2565 = vmatprep.subr.bf16.mxu1 %v7827_v61  ;;  %2647 = vmatprep.subr.bf16.mxu0 %v7830_v62 }
 0x2e8   :  { %2566 = vmatpush1.bf16.msra.mxu1 %v7825_v63  ;;  %2648 = vmatpush1.bf16.msra.mxu0 %v7828_v0 }
 0x2e9   :  { %2567 = vmatprep.subr.bf16.mxu1 %v7833_v1  ;;  %2649 = vmatprep.subr.bf16.mxu0 %v7836_v2 }
 0x2ec   :  { %2568 = vmatpush1.bf16.msra.mxu1 %v7831_v3  ;;  %2650 = vmatpush1.bf16.msra.mxu0 %v7834_v4 }
 0x2ed   :  { %2569 = vmatprep.subr.bf16.mxu1 %v7839_v5  ;;  %2651 = vmatprep.subr.bf16.mxu0 %v7842_v6 }
 0x2f0   :  { %2570 = vmatpush1.bf16.msra.mxu1 %v7837_v7  ;;  %2652 = vmatpush1.bf16.msra.mxu0 %v7840_v8  ;;  %v7891_v8 = vld [vmem:[#allocation24 + $0x200] ss:$16 sps:$4 sm:$0xff]  }
 0x2f1   :  { %2571 = vmatprep.subr.bf16.mxu1 %v7845_v9  ;;  %2653 = vmatprep.subr.bf16.mxu0 %v7848_v10  ;;  %v7894_v9 = vld [vmem:[#allocation24 + $0x208] ss:$16 sps:$4 sm:$0xff]  }
 0x2f4   :  { %2572 = vmatpush1.bf16.msra.mxu1 %v7843_v11  ;;  %2654 = vmatpush1.bf16.msra.mxu0 %v7846_v12  ;;  %v7899_v11 = vld [vmem:[#allocation24 + $0x224] ss:$16 sps:$4 sm:$0xff]   ;;  %v7902_v12 = vld [vmem:[#allocation24 + $0x22c] ss:$16 sps:$4 sm:$0xff]  }
 0x2f5   :  { %2573 = vmatprep.subr.bf16.mxu1 %v7851_v13  ;;  %2655 = vmatprep.subr.bf16.mxu0 %v7854_v14  ;;  %v7897_v14 = vld [vmem:[#allocation24 + $0x220] ss:$16 sps:$4 sm:$0xff]  }
 0x2f8   :  { %2574 = vmatpush1.bf16.msra.mxu1 %v7849_v15  ;;  %2656 = vmatpush1.bf16.msra.mxu0 %v7852_v16  ;;  %v7900_v15 = vld [vmem:[#allocation24 + $0x228] ss:$16 sps:$4 sm:$0xff]   ;;  %v7905_v16 = vld [vmem:[#allocation24 + $0x244] ss:$16 sps:$4 sm:$0xff]  }
 0x2f9   :  { %2575 = vmatprep.subr.bf16.mxu1 %v7857_v17  ;;  %2657 = vmatprep.subr.bf16.mxu0 %v7860_v18  ;;  %v7908_v17 = vld [vmem:[#allocation24 + $0x24c] ss:$16 sps:$4 sm:$0xff]   ;;  %v7903_v18 = vld [vmem:[#allocation24 + $0x240] ss:$16 sps:$4 sm:$0xff]  }
 0x2fc   :  { %2576 = vmatpush1.bf16.msra.mxu1 %v7855_v19  ;;  %2658 = vmatpush1.bf16.msra.mxu0 %v7858_v20  ;;  %v7906_v19 = vld [vmem:[#allocation24 + $0x248] ss:$16 sps:$4 sm:$0xff]   ;;  %v7911_v20 = vld [vmem:[#allocation24 + $0x264] ss:$16 sps:$4 sm:$0xff]  }
 0x2fd   :  { %2577 = vmatprep.subr.bf16.mxu1 %v7863_v21  ;;  %2659 = vmatprep.subr.bf16.mxu0 %v7866_v22  ;;  %v7914_v21 = vld [vmem:[#allocation24 + $0x26c] ss:$16 sps:$4 sm:$0xff]   ;;  %v7909_v22 = vld [vmem:[#allocation24 + $0x260] ss:$16 sps:$4 sm:$0xff]  }
 0x300   :  { %2578 = vmatpush1.bf16.msra.mxu1 %v7861_v23  ;;  %2660 = vmatpush1.bf16.msra.mxu0 %v7864_v24  ;;  %v7912_v23 = vld [vmem:[#allocation24 + $0x268] ss:$16 sps:$4 sm:$0xff]   ;;  %v7917_v24 = vld [vmem:[#allocation24 + $0x284] ss:$16 sps:$4 sm:$0xff]  }
 0x301   :  { %2579 = vmatprep.subr.bf16.mxu1 %v7869_v25  ;;  %2661 = vmatprep.subr.bf16.mxu0 %v7872_v27  ;;  %v7920_v25 = vld [vmem:[#allocation24 + $0x28c] ss:$16 sps:$4 sm:$0xff]   ;;  %v7915_v27 = vld [vmem:[#allocation24 + $0x280] ss:$16 sps:$4 sm:$0xff]  }
 0x304   :  { %2580 = vmatpush1.bf16.msra.mxu1 %v7867_v28  ;;  %2662 = vmatpush1.bf16.msra.mxu0 %v7870_v30  ;;  %v7918_v28 = vld [vmem:[#allocation24 + $0x288] ss:$16 sps:$4 sm:$0xff]   ;;  %v7923_v30 = vld [vmem:[#allocation24 + $0x2a4] ss:$16 sps:$4 sm:$0xff]  }
 0x305   :  { %2581 = vmatprep.subr.bf16.mxu1 %v7875_v31  ;;  %2663 = vmatprep.subr.bf16.mxu0 %v7878_v32  ;;  %v7926_v31 = vld [vmem:[#allocation24 + $0x2ac] ss:$16 sps:$4 sm:$0xff]   ;;  %v7921_v32 = vld [vmem:[#allocation24 + $0x2a0] ss:$16 sps:$4 sm:$0xff]  }
 0x308   :  { %2582 = vmatpush1.bf16.msra.mxu1 %v7873_v35  ;;  %2664 = vmatpush1.bf16.msra.mxu0 %v7876_v37  ;;  %v7924_v35 = vld [vmem:[#allocation24 + $0x2a8] ss:$16 sps:$4 sm:$0xff]   ;;  %v7929_v37 = vld [vmem:[#allocation24 + $0x2c4] ss:$16 sps:$4 sm:$0xff]  }
 0x309   :  { %2583 = vmatprep.subr.bf16.mxu1 %v7881_v38  ;;  %2665 = vmatprep.subr.bf16.mxu0 %v7884_v39  ;;  %v7932_v38 = vld [vmem:[#allocation24 + $0x2cc] ss:$16 sps:$4 sm:$0xff]   ;;  %v7927_v39 = vld [vmem:[#allocation24 + $0x2c0] ss:$16 sps:$4 sm:$0xff]  }
 0x30c   :  { %2584 = vmatpush1.bf16.msra.mxu1 %v7879_v41  ;;  %2666 = vmatpush1.bf16.msra.mxu0 %v7882_v43  ;;  %v7930_v41 = vld [vmem:[#allocation24 + $0x2c8] ss:$16 sps:$4 sm:$0xff]   ;;  %v7935_v43 = vld [vmem:[#allocation24 + $0x2e4] ss:$16 sps:$4 sm:$0xff]  }
 0x30d   :  { %2585 = vmatprep.subr.bf16.mxu1 %v7887_v44  ;;  %2667 = vmatprep.subr.bf16.mxu0 %v7890_v45  ;;  %v7938_v44 = vld [vmem:[#allocation24 + $0x2ec] ss:$16 sps:$4 sm:$0xff]   ;;  %v7933_v45 = vld [vmem:[#allocation24 + $0x2e0] ss:$16 sps:$4 sm:$0xff]  }
 0x310   :  { %2586 = vmatpush1.bf16.msra.mxu1 %v7885_v46  ;;  %2668 = vmatpush1.bf16.msra.mxu0 %v7888_v47  ;;  %v7936_v46 = vld [vmem:[#allocation24 + $0x2e8] ss:$16 sps:$4 sm:$0xff]   ;;  %v7941_v47 = vld [vmem:[#allocation24 + $0x304] ss:$16 sps:$4 sm:$0xff]  }
 0x311   :  { %2596 = vmatprep.subr.bf16.mxu1 %v7893_v48  ;;  %2678 = vmatprep.subr.bf16.mxu0 %v7896_v49  ;;  %v7944_v48 = vld [vmem:[#allocation24 + $0x30c] ss:$16 sps:$4 sm:$0xff]   ;;  %v7939_v49 = vld [vmem:[#allocation24 + $0x300] ss:$16 sps:$4 sm:$0xff]  }
 0x366   :  { %v1623_v57 = vpop.f32.mrb[4].mxu1  ;;  %v9353_v58 = vpop.f32.mrb[8].mxu0 }
 0x367   :  { %v1624_v59 = vadd.f32 %v1623_v57, %v912_v54  ;;  %v1625_v60 = vpop.f32.mrb[5].mxu1  ;;  %v1666_v61 = vpop.f32.mrb[9].mxu0  ;;  %v7942_v54 = vld [vmem:[#allocation24 + $0x308] ss:$16 sps:$4 sm:$0xff]   ;;  %v7945_v57 = vld [vmem:[#allocation24 + $0x320] ss:$16 sps:$4 sm:$0xff]  }
 0x368   :  { %v1626_v62 = vadd.f32 %v1625_v60, %v916_v55  ;;  %v1667_v63 = vadd.f32 %v1666_v61, %v924_v56  ;;  %v1627_v0 = vpop.f32.mrb[6].mxu1  ;;  %v1668_v1 = vpop.f32.mrb[10].mxu0  ;;  %v7947_v55 = vld [vmem:[#allocation24 + $0x324] ss:$16 sps:$4 sm:$0xff]   ;;  %v7950_v56 = vld [vmem:[#allocation24 + $0x32c] ss:$16 sps:$4 sm:$0xff]  }
 0x369   :  { %v1753_v2 = vmax.f32 %v1624_v59, 0.0  ;;  %v1628_v3 = vpop.f32.mrb[7].mxu1  ;;  %v1669_v4 = vpop.f32.mrb[11].mxu0  ;;  %v7948_v59 = vld [vmem:[#allocation24 + $0x328] ss:$16 sps:$4 sm:$0xff]  }
 0x36a   :  { %v1754_v5 = vmax.f32 %v1626_v62, 0.0  ;;  %v1756_v6 = vmax.f32 %v1667_v63, 0.0  ;;  %v7953_v60 = vld [vmem:[#allocation24 + $0x344] ss:$16 sps:$4 sm:$0xff]   ;;  %v7956_v61 = vld [vmem:[#allocation24 + $0x34c] ss:$16 sps:$4 sm:$0xff]  }
 0x36b   :  { %v1761_v10 = vpack.c.bf16 %v1753_v2, %v1753_v2  ;;  %v7951_v62 = vld [vmem:[#allocation24 + $0x340] ss:$16 sps:$4 sm:$0xff]   ;;  %v7954_v63 = vld [vmem:[#allocation24 + $0x348] ss:$16 sps:$4 sm:$0xff]   ;;  %v7959_v0 = vld [vmem:[#allocation24 + $0x364] ss:$16 sps:$4 sm:$0xff]  }
 0x36c   :  { %v1762_v7 = vpack.c.bf16 %v1754_v5, %v1754_v5  ;;  %v1764_v13 = vpack.c.bf16 %v1756_v6, %v1756_v6  ;;  %v7962_v1 = vld [vmem:[#allocation24 + $0x36c] ss:$16 sps:$4 sm:$0xff]   ;;  %v7957_v2 = vld [vmem:[#allocation24 + $0x360] ss:$16 sps:$4 sm:$0xff]   ;;  %v7960_v3 = vld [vmem:[#allocation24 + $0x368] ss:$16 sps:$4 sm:$0xff]  }
 0x36d   :  { %v7965_v4 = vld [vmem:[#allocation24 + $0x384] ss:$16 sps:$4 sm:$0xff]   ;;  %v7968_v5 = vld [vmem:[#allocation24 + $0x38c] ss:$16 sps:$4 sm:$0xff]   ;;  %v7963_v6 = vld [vmem:[#allocation24 + $0x380] ss:$16 sps:$4 sm:$0xff]  }
 0x36e   :  { %2587 = vmatprep.mubr.bf16.mxu1 %v1762_v7  ;;  %2669 = vmatprep.mubr.bf16.mxu0 %v1762_v7  ;;  %v7966_v7 = vld [vmem:[#allocation24 + $0x388] ss:$16 sps:$4 sm:$0xff]  }
 0x36f   :  { %2588 = vmatmul.mubr.bf16.vlgmr.msra.gmra.mrb[12].mxu1 %v1761_v10  ;;  %2670 = vmatmul.mubr.bf16.vlgmr.msra.gmra.mrb[16].mxu0 %v1761_v10  ;;  %v7974_v10 = vld [vmem:[#allocation24 + $0x3ac] ss:$16 sps:$4 sm:$0xff]  }
 0x370   :  { %2597 = vmatpush1.bf16.msra.mxu1 %v7891_v8  ;;  %2679 = vmatpush1.bf16.msra.mxu0 %v7894_v9  ;;  %v9356_v8 = vsub.s32 2, %v9293_v29  ;;  %v7971_v9 = vld [vmem:[#allocation24 + $0x3a4] ss:$16 sps:$4 sm:$0xff]  }
 0x371   :  { %2628 = vmatprep.mubr.bf16.mxu1 %v1764_v13  ;;  %2710 = vmatprep.mubr.bf16.mxu0 %v1764_v13 }
 0x372   :  { %2598 = vmatprep.subr.bf16.mxu1 %v7899_v11  ;;  %2680 = vmatprep.subr.bf16.mxu0 %v7902_v12  ;;  %v7969_v11 = vld [vmem:[#allocation24 + $0x3a0] ss:$16 sps:$4 sm:$0xff]   ;;  %v7972_v12 = vld [vmem:[#allocation24 + $0x3a8] ss:$16 sps:$4 sm:$0xff]   ;;  %v920_v13 = vrot.slane %v9339_v51, %v9356_v8 }
 0x374   :  { %2599 = vmatpush1.bf16.msra.mxu1 %v7897_v14  ;;  %2681 = vmatpush1.bf16.msra.mxu0 %v7900_v15  ;;  %v7977_v14 = vld [vmem:[#allocation24 + $0x3c4] ss:$16 sps:$4 sm:$0xff]   ;;  %v7980_v15 = vld [vmem:[#allocation24 + $0x3cc] ss:$16 sps:$4 sm:$0xff]  }
 0x375   :  { %2600 = vmatprep.subr.bf16.mxu1 %v7905_v16  ;;  %2682 = vmatprep.subr.bf16.mxu0 %v7908_v17  ;;  %v7975_v16 = vld [vmem:[#allocation24 + $0x3c0] ss:$16 sps:$4 sm:$0xff]   ;;  %v7978_v17 = vld [vmem:[#allocation24 + $0x3c8] ss:$16 sps:$4 sm:$0xff]  }
 0x378   :  { %2601 = vmatpush1.bf16.msra.mxu1 %v7903_v18  ;;  %2683 = vmatpush1.bf16.msra.mxu0 %v7906_v19  ;;  %v1665_v18 = vadd.f32 %v9353_v58, %v920_v13  ;;  %v7983_v19 = vld [vmem:[#allocation24 + $0x3e4] ss:$16 sps:$4 sm:$0xff]  }
 0x379   :  { %2602 = vmatprep.subr.bf16.mxu1 %v7911_v20  ;;  %2684 = vmatprep.subr.bf16.mxu0 %v7914_v21  ;;  %v7986_v20 = vld [vmem:[#allocation24 + $0x3ec] ss:$16 sps:$4 sm:$0xff]   ;;  %v8034_v13 = vld [vmem:[#allocation25 + $0x128] ss:$12 sps:$4 sm:$0xff]  }
 0x37c   :  { %2603 = vmatpush1.bf16.msra.mxu1 %v7909_v22  ;;  %2685 = vmatpush1.bf16.msra.mxu0 %v7912_v23 }
 0x37d   :  { %2604 = vmatprep.subr.bf16.mxu1 %v7917_v24  ;;  %2686 = vmatprep.subr.bf16.mxu0 %v7920_v25 }
 0x380   :  { %2605 = vmatpush1.bf16.msra.mxu1 %v7915_v27  ;;  %2687 = vmatpush1.bf16.msra.mxu0 %v7918_v28  ;;  %v7981_v27 = vld [vmem:[#allocation24 + $0x3e0] ss:$16 sps:$4 sm:$0xff]   ;;  %v7984_v28 = vld [vmem:[#allocation24 + $0x3e8] ss:$16 sps:$4 sm:$0xff]  }
 0x381   :  { %2606 = vmatprep.subr.bf16.mxu1 %v7923_v30  ;;  %2688 = vmatprep.subr.bf16.mxu0 %v7926_v31  ;;  %v1755_v30 = vmax.f32 %v1665_v18, 0.0  ;;  %v8036_v18 = vld [vmem:[#allocation25 + $0x138] ss:$12 sps:$4 sm:$0xff]  }
 0x384   :  { %2607 = vmatpush1.bf16.msra.mxu1 %v7921_v32  ;;  %2689 = vmatpush1.bf16.msra.mxu0 %v7924_v35  ;;  %v1763_v32 = vpack.c.bf16 %v1755_v30, %v1755_v30  ;;  %v7989_v35 = vld [vmem:[#allocation25 + $0x4] ss:$12 sps:$4 sm:$0xff]  }
 0x385   :  { %2608 = vmatprep.subr.bf16.mxu1 %v7929_v37  ;;  %2690 = vmatprep.subr.bf16.mxu0 %v7932_v38  ;;  %v7987_v37 = vld [vmem:[#allocation25] ss:$12 sps:$4 sm:$0xff]   ;;  %v7992_v38 = vld [vmem:[#allocation25 + $0x1c] ss:$12 sps:$4 sm:$0xff]  }
 0x386   :  { %v8049_v30 = vld [vmem:[#allocation25 + $0x170] ss:$12 sps:$4 sm:$0xff]  }
 0x388   :  { %2609 = vmatpush1.bf16.msra.mxu1 %v7927_v39  ;;  %2691 = vmatpush1.bf16.msra.mxu0 %v7930_v41  ;;  %v7990_v39 = vld [vmem:[#allocation25 + $0x18] ss:$12 sps:$4 sm:$0xff]   ;;  %v7995_v41 = vld [vmem:[#allocation25 + $0x34] ss:$12 sps:$4 sm:$0xff]  }
 0x389   :  { %2610 = vmatprep.subr.bf16.mxu1 %v7935_v43  ;;  %2692 = vmatprep.subr.bf16.mxu0 %v7938_v44  ;;  %v7993_v43 = vld [vmem:[#allocation25 + $0x30] ss:$12 sps:$4 sm:$0xff]   ;;  %v7998_v44 = vld [vmem:[#allocation25 + $0x4c] ss:$12 sps:$4 sm:$0xff]  }
 0x38c   :  { %2611 = vmatpush1.bf16.msra.mxu1 %v7933_v45  ;;  %2693 = vmatpush1.bf16.msra.mxu0 %v7936_v46  ;;  %v7996_v45 = vld [vmem:[#allocation25 + $0x48] ss:$12 sps:$4 sm:$0xff]   ;;  %v8001_v46 = vld [vmem:[#allocation25 + $0x64] ss:$12 sps:$4 sm:$0xff]  }
 0x38d   :  { %2612 = vmatprep.subr.bf16.mxu1 %v7941_v47  ;;  %2694 = vmatprep.subr.bf16.mxu0 %v7944_v48  ;;  %v7999_v47 = vld [vmem:[#allocation25 + $0x60] ss:$12 sps:$4 sm:$0xff]   ;;  %v8004_v48 = vld [vmem:[#allocation25 + $0x7c] ss:$12 sps:$4 sm:$0xff]  }
 0x390   :  { %2613 = vmatpush1.bf16.msra.mxu1 %v7939_v49  ;;  %2695 = vmatpush1.bf16.msra.mxu0 %v7942_v54  ;;  %v8002_v49 = vld [vmem:[#allocation25 + $0x78] ss:$12 sps:$4 sm:$0xff]   ;;  %v8007_v54 = vld [vmem:[#allocation25 + $0x94] ss:$12 sps:$4 sm:$0xff]  }
 0x391   :  { %2614 = vmatprep.subr.bf16.mxu1 %v7947_v55  ;;  %2696 = vmatprep.subr.bf16.mxu0 %v7950_v56  ;;  %v8005_v55 = vld [vmem:[#allocation25 + $0x90] ss:$12 sps:$4 sm:$0xff]   ;;  %v8010_v56 = vld [vmem:[#allocation25 + $0xac] ss:$12 sps:$4 sm:$0xff]  }
 0x394   :  { %2615 = vmatpush1.bf16.msra.mxu1 %v7945_v57  ;;  %2697 = vmatpush1.bf16.msra.mxu0 %v7948_v59  ;;  %v8008_v57 = vld [vmem:[#allocation25 + $0xa8] ss:$12 sps:$4 sm:$0xff]   ;;  %v8013_v59 = vld [vmem:[#allocation25 + $0xc4] ss:$12 sps:$4 sm:$0xff]  }
 0x395   :  { %2616 = vmatprep.subr.bf16.mxu1 %v7953_v60  ;;  %2698 = vmatprep.subr.bf16.mxu0 %v7956_v61  ;;  %v8014_v60 = vld [vmem:[#allocation25 + $0xc8] ss:$12 sps:$4 sm:$0xff]   ;;  %v8011_v61 = vld [vmem:[#allocation25 + $0xc0] ss:$12 sps:$4 sm:$0xff]  }
 0x398   :  { %2617 = vmatpush1.bf16.msra.mxu1 %v7951_v62  ;;  %2699 = vmatpush1.bf16.msra.mxu0 %v7954_v63  ;;  %v8015_v62 = vld [vmem:[#allocation25 + $0x8] ss:$12 sps:$4 sm:$0xff]  }
 0x399   :  { %2618 = vmatprep.subr.bf16.mxu1 %v7959_v0  ;;  %2700 = vmatprep.subr.bf16.mxu0 %v7962_v1  ;;  %v8018_v63 = vld [vmem:[#allocation25 + $0xdc] ss:$12 sps:$4 sm:$0xff]   ;;  %v8019_v0 = vld [vmem:[#allocation25 + $0xe0] ss:$12 sps:$4 sm:$0xff]   ;;  %v8016_v1 = vld [vmem:[#allocation25 + $0xd8] ss:$12 sps:$4 sm:$0xff]  }
 0x39c   :  { %2619 = vmatpush1.bf16.msra.mxu1 %v7957_v2  ;;  %2701 = vmatpush1.bf16.msra.mxu0 %v7960_v3  ;;  %v8020_v2 = vld [vmem:[#allocation25 + $0x20] ss:$12 sps:$4 sm:$0xff]  }
 0x39d   :  { %2620 = vmatprep.subr.bf16.mxu1 %v7965_v4  ;;  %2702 = vmatprep.subr.bf16.mxu0 %v7968_v5  ;;  %v8023_v3 = vld [vmem:[#allocation25 + $0xf4] ss:$12 sps:$4 sm:$0xff]   ;;  %v8024_v4 = vld [vmem:[#allocation25 + $0xf8] ss:$12 sps:$4 sm:$0xff]   ;;  %v8021_v5 = vld [vmem:[#allocation25 + $0xf0] ss:$12 sps:$4 sm:$0xff]  }
 0x3a0   :  { %2621 = vmatpush1.bf16.msra.mxu1 %v7963_v6  ;;  %2703 = vmatpush1.bf16.msra.mxu0 %v7966_v7  ;;  %v8025_v6 = vld [vmem:[#allocation25 + $0x38] ss:$12 sps:$4 sm:$0xff]  }
 0x3a1   :  { %2622 = vmatprep.subr.bf16.mxu1 %v7971_v9  ;;  %2704 = vmatprep.subr.bf16.mxu0 %v7974_v10  ;;  %v8028_v7 = vld [vmem:[#allocation25 + $0x10c] ss:$12 sps:$4 sm:$0xff]   ;;  %v8029_v9 = vld [vmem:[#allocation25 + $0x110] ss:$12 sps:$4 sm:$0xff]   ;;  %v8026_v10 = vld [vmem:[#allocation25 + $0x108] ss:$12 sps:$4 sm:$0xff]  }
 0x3a4   :  { %2623 = vmatpush1.bf16.msra.mxu1 %v7969_v11  ;;  %2705 = vmatpush1.bf16.msra.mxu0 %v7972_v12  ;;  %v8030_v11 = vld [vmem:[#allocation25 + $0x50] ss:$12 sps:$4 sm:$0xff]  }
 0x3a5   :  { %2624 = vmatprep.subr.bf16.mxu1 %v7977_v14  ;;  %2706 = vmatprep.subr.bf16.mxu0 %v7980_v15  ;;  %v8033_v12 = vld [vmem:[#allocation25 + $0x124] ss:$12 sps:$4 sm:$0xff]   ;;  %v8031_v14 = vld [vmem:[#allocation25 + $0x120] ss:$12 sps:$4 sm:$0xff]   ;;  %v8035_v15 = vld [vmem:[#allocation25 + $0x68] ss:$12 sps:$4 sm:$0xff]  }
 0x3a6   :  { %v9361_v21 = vpop.f32.mrb[8].mxu1  ;;  %v9363_v22 = vpop.f32.mrb[12].mxu0 }
 0x3a7   :  { %v9365_v23 = vpop.f32.mrb[9].mxu1  ;;  %v9367_v51 = vpop.f32.mrb[13].mxu0 }
 0x3a8   :  { %v1709_v24 = vpop.f32.mrb[10].mxu1  ;;  %v1750_v25 = vpop.f32.mrb[14].mxu0  ;;  %2625 = vmatpush1.bf16.msra.mxu1 %v7975_v16  ;;  %2707 = vmatpush1.bf16.msra.mxu0 %v7978_v17  ;;  %v8038_v16 = vld [vmem:[#allocation25 + $0x13c] ss:$12 sps:$4 sm:$0xff]   ;;  %v8039_v17 = vld [vmem:[#allocation25 + $0x140] ss:$12 sps:$4 sm:$0xff]  }
 0x3a9   :  { %v1710_v58 = vpop.f32.mrb[11].mxu1  ;;  %v1751_v31 = vpop.f32.mrb[15].mxu0  ;;  %2626 = vmatprep.subr.bf16.mxu1 %v7983_v19  ;;  %2708 = vmatprep.subr.bf16.mxu0 %v7986_v20  ;;  %v8040_v19 = vld [vmem:[#allocation25 + $0x80] ss:$12 sps:$4 sm:$0xff]   ;;  %v8041_v20 = vld [vmem:[#allocation25 + $0x150] ss:$12 sps:$4 sm:$0xff]  }
 0x3aa   :  { %v8043_v24 = vld [vmem:[#allocation25 + $0x154] ss:$12 sps:$4 sm:$0xff]   ;;  %v8044_v25 = vld [vmem:[#allocation25 + $0x158] ss:$12 sps:$4 sm:$0xff]   ;;  %v8050_v31 = vld [vmem:[#allocation25 + $0xb0] ss:$12 sps:$4 sm:$0xff]  }
 0x3ab   :  { %v8046_v58 = vld [vmem:[#allocation25 + $0x168] ss:$12 sps:$4 sm:$0xff]  }
 0x3ac   :  { %2627 = vmatpush1.bf16.msra.mxu1 %v7981_v27  ;;  %2709 = vmatpush1.bf16.msra.mxu0 %v7984_v28  ;;  %v8045_v27 = vld [vmem:[#allocation25 + $0x98] ss:$12 sps:$4 sm:$0xff]  }
 0x3ad   :  { %3334 = vmatprep.subr.bf16.mxu1 %v7989_v35  ;;  %7377 = vmatprep.subr.bf16.mxu0 %v8014_v60  ;;  %v8048_v28 = vld [vmem:[#allocation25 + $0x16c] ss:$12 sps:$4 sm:$0xff]  }
 0x3ae   :  { %v1893_v35 = vld [vmem:[%s9620_s19] sm:$0xf] }
 0x3af   :  { %2629 = vmatmul.mubr.bf16.vlgmr.msra.gmra.mrb[12].mxu1 %v1763_v32  ;;  %2711 = vmatmul.mubr.bf16.vlgmr.msra.gmra.mrb[16].mxu0 %v1763_v32  ;;  %v8053_v32 = vld [vmem:[#allocation25 + $0x184] ss:$12 sps:$4 sm:$0xff]  }
 0x3b0   :  { %3335 = vmatpush1.bf16.msra.mxu1 %v7987_v37  ;;  %7378 = vmatpush3.bf16.msra.mxu0 %v8015_v62  ;;  %v1898_v37 = vrot.slane %v1893_v35, %v9334_v50 }
 0x3b1   :  { %3336 = vmatprep.subr.bf16.mxu1 %v7992_v38  ;;  %7379 = vmatprep.subr.bf16.mxu0 %v8019_v0  ;;  %v1906_v38 = vrot.slane %v1893_v35, %v9356_v8 }
 0x3b4   :  { %3337 = vmatpush1.bf16.msra.mxu1 %v7990_v39  ;;  %7380 = vmatpush3.bf16.msra.mxu0 %v8020_v2  ;;  %v1902_v39 = vrot.slane %v1893_v35, %v9342_v52 }
 0x3b5   :  { %3338 = vmatprep.subr.bf16.mxu1 %v7995_v41  ;;  %7381 = vmatprep.subr.bf16.mxu0 %v8024_v4  ;;  %v1910_v41 = vrot.slane %v1893_v35, %v9345_v53 }
 0x3b8   :  { %3339 = vmatpush1.bf16.msra.mxu1 %v7993_v43  ;;  %7382 = vmatpush3.bf16.msra.mxu0 %v8025_v6 }
 0x3b9   :  { %3340 = vmatprep.subr.bf16.mxu1 %v7998_v44  ;;  %7383 = vmatprep.subr.bf16.mxu0 %v8029_v9 }
 0x3bc   :  { %3341 = vmatpush1.bf16.msra.mxu1 %v7996_v45  ;;  %7384 = vmatpush3.bf16.msra.mxu0 %v8030_v11 }
 0x3bd   :  { %3342 = vmatprep.subr.bf16.mxu1 %v8001_v46  ;;  %7385 = vmatprep.subr.bf16.mxu0 %v8034_v13 }
 0x3c0   :  { %3343 = vmatpush1.bf16.msra.mxu1 %v7999_v47  ;;  %7386 = vmatpush3.bf16.msra.mxu0 %v8035_v15 }
 0x3c1   :  { %3344 = vmatprep.subr.bf16.mxu1 %v8004_v48  ;;  %7387 = vmatprep.subr.bf16.mxu0 %v8039_v17 }
 0x3c4   :  { %3345 = vmatpush1.bf16.msra.mxu1 %v8002_v49  ;;  %7388 = vmatpush3.bf16.msra.mxu0 %v8040_v19 }
 0x3c5   :  { %3346 = vmatprep.subr.bf16.mxu1 %v8007_v54  ;;  %7389 = vmatprep.subr.bf16.mxu0 %v8044_v25 }
 0x3c8   :  { %3347 = vmatpush1.bf16.msra.mxu1 %v8005_v55  ;;  %7390 = vmatpush3.bf16.msra.mxu0 %v8045_v27 }
 0x3c9   :  { %3348 = vmatprep.subr.bf16.mxu1 %v8010_v56  ;;  %7391 = vmatprep.subr.bf16.mxu0 %v8049_v30 }
 0x3cc   :  { %3349 = vmatpush1.bf16.msra.mxu1 %v8008_v57  ;;  %7392 = vmatpush3.bf16.msra.mxu0 %v8050_v31 }
 0x3cd   :  { %3350 = vmatprep.subr.bf16.mxu1 %v8013_v59  ;;  %7609 = vmatprep.subr.bf16.mxu0 %v8934_v40 }
 0x3d0   :  { %3351 = vmatpush1.bf16.msra.mxu1 %v8011_v61 }
 0x3d1   :  { %3352 = vmatprep.subr.bf16.mxu1 %v8018_v63 }
 0x3d4   :  { %3353 = vmatpush1.bf16.msra.mxu1 %v8016_v1 }
 0x3d5   :  { %3354 = vmatprep.subr.bf16.mxu1 %v8023_v3 }
 0x3d8   :  { %3355 = vmatpush1.bf16.msra.mxu1 %v8021_v5 }
 0x3d9   :  { %3356 = vmatprep.subr.bf16.mxu1 %v8028_v7 }
 0x3dc   :  { %3357 = vmatpush1.bf16.msra.mxu1 %v8026_v10 }
 0x3dd   :  { %3358 = vmatprep.subr.bf16.mxu1 %v8033_v12 }
 0x3e0   :  { %3359 = vmatpush1.bf16.msra.mxu1 %v8031_v14 }
 0x3e1   :  { %3360 = vmatprep.subr.bf16.mxu1 %v8038_v16 }
 0x3e4   :  { %3361 = vmatpush1.bf16.msra.mxu1 %v8036_v18 }
 0x3e5   :  { %3362 = vmatprep.subr.bf16.mxu1 %v8043_v24 }
 0x3e8   :  { %3363 = vmatpush1.bf16.msra.mxu1 %v8041_v20 }
 0x3e9   :  { %3364 = vmatprep.subr.bf16.mxu1 %v8048_v28 }
 0x3ec   :  { %3365 = vmatpush1.bf16.msra.mxu1 %v8046_v58 }
 0x3ed   :  { %3375 = vmatprep.subr.bf16.mxu1 %v8053_v32 }
 0x482   :  { %v2630_v43 = vpop.f32.mrb[12].mxu1  ;;  %v2712_v44 = vpop.f32.mrb[16].mxu0 }
 0x483   :  { %v7689_v45 = vadd.f32 %v2630_v43, %v1898_v37  ;;  %v7691_v46 = vadd.f32 %v2712_v44, %v1906_v38  ;;  %v2632_v47 = vpop.f32.mrb[13].mxu1  ;;  %v2714_v48 = vpop.f32.mrb[17].mxu0 }
 0x484   :  { %v7690_v49 = vadd.f32 %v2632_v47, %v1902_v39  ;;  %v7692_v54 = vadd.f32 %v2714_v48, %v1910_v41  ;;  %v2634_v55 = vpop.f32.mrb[14].mxu1  ;;  %v2716_v56 = vpop.f32.mrb[18].mxu0 }
 0x485   :  { %v2720_v57 = vsel %vm2719_vm1, %v7689_v45, -inf  ;;  %v2734_v59 = vsel %vm2719_vm1, %v7691_v46, -inf  ;;  %v2635_v60 = vpop.f32.mrb[15].mxu1  ;;  %v2717_v61 = vpop.f32.mrb[19].mxu0 }
 0x486   :  { %v2721_v62 = vrot.slane %v2720_v57, 4  ;;  %v2735_v63 = vrot.slane %v2734_v59, 4  ;;  %v2727_v0 = vsel %vm2719_vm1, %v7690_v49, -inf  ;;  %v2741_v1 = vsel %vm2719_vm1, %v7692_v54, -inf }
 0x487   :  { %v2728_v2 = vrot.slane %v2727_v0, 4  ;;  %v2742_v3 = vrot.slane %v2741_v1, 4 }
 0x488   :  { %v2722_v4 = vmax.f32 %v2720_v57, %v2721_v62  ;;  %v2736_v5 = vmax.f32 %v2734_v59, %v2735_v63 }
 0x489   :  { %v2729_v6 = vmax.f32 %v2727_v0, %v2728_v2  ;;  %v2743_v7 = vmax.f32 %v2741_v1, %v2742_v3 }
 0x48a   :  { %v2723_v9 = vrot.slane %v2722_v4, 2  ;;  %v2737_v10 = vrot.slane %v2736_v5, 2 }
 0x48b   :  { %v2730_v11 = vrot.slane %v2729_v6, 2  ;;  %v2744_v12 = vrot.slane %v2743_v7, 2 }
 0x48c   :  { %v2724_v13 = vmax.f32 %v2722_v4, %v2723_v9  ;;  %v2738_v14 = vmax.f32 %v2736_v5, %v2737_v10 }
 0x48d   :  { %v2731_v15 = vmax.f32 %v2729_v6, %v2730_v11  ;;  %v2745_v16 = vmax.f32 %v2743_v7, %v2744_v12 }
 0x48e   :  { %v2725_v17 = vrot.slane %v2724_v13, 1  ;;  %v2739_v18 = vrot.slane %v2738_v14, 1 }
 0x48f   :  { %v2732_v19 = vrot.slane %v2731_v15, 1  ;;  %v2746_v20 = vrot.slane %v2745_v16, 1 }
 0x490   :  { %v2726_v24 = vmax.f32 %v2724_v13, %v2725_v17  ;;  %v2740_v25 = vmax.f32 %v2738_v14, %v2739_v18 }
 0x491   :  { %v2733_v27 = vmax.f32 %v2731_v15, %v2732_v19  ;;  %v2747_v28 = vmax.f32 %v2745_v16, %v2746_v20 }
 0x492   :  { %v2748_v30 = vsub.f32 %v7689_v45, %v2726_v24  ;;  %v2750_v58 = vsub.f32 %v7691_v46, %v2740_v25 }
 0x493   :  { %v2749_v31 = vsub.f32 %v7690_v49, %v2733_v27  ;;  %v2751_v32 = vsub.f32 %v7692_v54, %v2747_v28 }
 0x494   :  { %v2752_v35 = vmul.f32 1.442695, %v2748_v30  ;;  %v2756_v37 = vmul.f32 1.442695, %v2750_v58 }
 0x495   :  { %v2754_v38 = vmul.f32 1.442695, %v2749_v31  ;;  %v2758_v39 = vmul.f32 1.442695, %v2751_v32 }
 0x496   :  { %8483 = vpow2.f32 %v2752_v35 }
 0x497   :  { %8485 = vpow2.f32 %v2756_v37 }
 0x498   :  { %8487 = vpow2.f32 %v2754_v38 }
 0x499   :  { %8489 = vpow2.f32 %v2758_v39 }
 0x4a0   :  { %v8484_v41 = vpop.eup %8483 }
 0x4a1   :  { %v8486_v43 = vpop.eup %8485  ;;  %v2760_v44 = vsel %vm2719_vm1, %v8484_v41, 0.0 }
 0x4a2   :  { %v8488_v47 = vpop.eup %8487  ;;  %v2761_v48 = vrot.slane %v2760_v44, 4  ;;  %v2774_v55 = vsel %vm2719_vm1, %v8486_v43, 0.0 }
 0x4a3   :  { %v8490_v45 = vpop.eup %8489  ;;  %v2775_v46 = vrot.slane %v2774_v55, 4  ;;  %v2767_v49 = vsel %vm2719_vm1, %v8488_v47, 0.0 }
 0x4a4   :  { %v2762_v54 = vadd.f32 %v2761_v48, %v2760_v44  ;;  %v2768_v56 = vrot.slane %v2767_v49, 4  ;;  %v2781_v57 = vsel %vm2719_vm1, %v8490_v45, 0.0 }
 0x4a5   :  { %v2776_v59 = vadd.f32 %v2775_v46, %v2774_v55  ;;  %v2782_v60 = vrot.slane %v2781_v57, 4 }
 0x4a6   :  { %v2763_v61 = vrot.slane %v2762_v54, 2  ;;  %v2769_v62 = vadd.f32 %v2768_v56, %v2767_v49 }
 0x4a7   :  { %v2777_v63 = vrot.slane %v2776_v59, 2  ;;  %v2783_v0 = vadd.f32 %v2782_v60, %v2781_v57  ;;  %v8054_v60 = vld [vmem:[#allocation25 + $0x188] ss:$12 sps:$4 sm:$0xff]  }
 0x4a8   :  { %v2764_v1 = vadd.f32 %v2763_v61, %v2762_v54  ;;  %v2770_v2 = vrot.slane %v2769_v62, 2 }
 0x4a9   :  { %v2778_v3 = vadd.f32 %v2777_v63, %v2776_v59  ;;  %v2784_v4 = vrot.slane %v2783_v0, 2  ;;  %v8051_v59 = vld [vmem:[#allocation25 + $0x180] ss:$12 sps:$4 sm:$0xff]   ;;  %v8055_v63 = vld [vmem:[#allocation25 + $0x198] ss:$12 sps:$4 sm:$0xff]  }
 0x4aa   :  { %v2765_v5 = vrot.slane %v2764_v1, 1  ;;  %v2771_v6 = vadd.f32 %v2770_v2, %v2769_v62  ;;  %v8057_v62 = vld [vmem:[#allocation25 + $0x19c] ss:$12 sps:$4 sm:$0xff]   ;;  %v8936_v2 = vmov 0  }
 0x4ab   :  { %v2779_v7 = vrot.slane %v2778_v3, 1  ;;  %v2785_v9 = vadd.f32 %v2784_v4, %v2783_v0  ;;  %v8058_v0 = vld [vmem:[#allocation25 + $0x1a0] ss:$12 sps:$4 sm:$0xff]   ;;  %v8062_v4 = vld [vmem:[#allocation25 + $0x1b8] ss:$12 sps:$4 sm:$0xff]  }
 0x4ac   :  { %v2766_v10 = vadd.f32 %v2765_v5, %v2764_v1  ;;  %v2772_v11 = vrot.slane %v2771_v6, 1  ;;  %v8061_v1 = vld [vmem:[#allocation25 + $0x1b4] ss:$12 sps:$4 sm:$0xff]   ;;  %v8065_v5 = vld [vmem:[#allocation25 + $0x1cc] ss:$12 sps:$4 sm:$0xff]  }
 0x4ad   :  { %v2780_v12 = vadd.f32 %v2779_v7, %v2778_v3  ;;  %v2786_v13 = vrot.slane %v2785_v9, 1  ;;  %v8059_v3 = vld [vmem:[#allocation25 + $0x1b0] ss:$12 sps:$4 sm:$0xff]  }
 0x4ae   :  { %8491 = vrcp.f32 %v2766_v10  ;;  %v2773_v14 = vadd.f32 %v2772_v11, %v2771_v6  ;;  %v8063_v6 = vld [vmem:[#allocation25 + $0x1c8] ss:$12 sps:$4 sm:$0xff]   ;;  %v8066_v7 = vld [vmem:[#allocation25 + $0x1d0] ss:$12 sps:$4 sm:$0xff]   ;;  %v8067_v10 = vld [vmem:[#allocation25 + $0x1e0] ss:$12 sps:$4 sm:$0xff]  }
 0x4af   :  { %8493 = vrcp.f32 %v2780_v12  ;;  %v2787_v15 = vadd.f32 %v2786_v13, %v2785_v9  ;;  %v8069_v9 = vld [vmem:[#allocation25 + $0x1e4] ss:$12 sps:$4 sm:$0xff]   ;;  %v8070_v11 = vld [vmem:[#allocation25 + $0x1e8] ss:$12 sps:$4 sm:$0xff]  }
 0x4b0   :  { %8495 = vrcp.f32 %v2773_v14  ;;  %v8073_v12 = vld [vmem:[#allocation25 + $0x1fc] ss:$12 sps:$4 sm:$0xff]   ;;  %v8071_v13 = vld [vmem:[#allocation25 + $0x1f8] ss:$12 sps:$4 sm:$0xff]   ;;  %v8074_v14 = vld [vmem:[#allocation25 + $0x200] ss:$12 sps:$4 sm:$0xff]  }
 0x4b1   :  { %8497 = vrcp.f32 %v2787_v15  ;;  %v8077_v15 = vld [vmem:[#allocation25 + $0x214] ss:$12 sps:$4 sm:$0xff]  }
 0x4b8   :  { %v8492_v16 = vpop.eup %8491 }
 0x4b9   :  { %v8494_v17 = vpop.eup %8493  ;;  %v2792_v18 = vmul.f32 %v8492_v16, %v8484_v41  ;;  %v8075_v16 = vld [vmem:[#allocation25 + $0x210] ss:$12 sps:$4 sm:$0xff]  }
 0x4ba   :  { %v8496_v19 = vpop.eup %8495  ;;  %v2794_v20 = vmul.f32 %v8494_v17, %v8486_v43  ;;  %v8078_v17 = vld [vmem:[#allocation25 + $0x218] ss:$12 sps:$4 sm:$0xff]  }
 0x4bb   :  { %v8498_v24 = vpop.eup %8497  ;;  %v2793_v25 = vmul.f32 %v8496_v19, %v8488_v47  ;;  %v2796_v27 = vmul.f32 %v2792_v18, %v9313_v26  ;;  %v8081_v18 = vld [vmem:[#allocation25 + $0x22c] ss:$12 sps:$4 sm:$0xff]   ;;  %v9409_v19 = vrot.slane %v8934_v40, 2 }
 0x4bc   :  { %v2795_v28 = vmul.f32 %v8498_v24, %v8490_v45  ;;  %v2798_v30 = vmul.f32 %v2794_v20, %v9313_v26  ;;  %v8079_v20 = vld [vmem:[#allocation25 + $0x228] ss:$12 sps:$4 sm:$0xff]   ;;  %v8082_v24 = vld [vmem:[#allocation25 + $0x230] ss:$12 sps:$4 sm:$0xff]  }
 0x4bd   :  { %v2797_v58 = vmul.f32 %v2793_v25, %v9313_v26  ;;  %v2803_v31 = vrot.slane %v2796_v27, 6 }
 0x4be   :  { %v2799_v32 = vmul.f32 %v2795_v28, %v9313_v26  ;;  %v2805_v35 = vrot.slane %v2798_v30, 6  ;;  %v2811_v41 = vrot.slane %v2798_v30, 4  ;;  %v2817_v44 = vrot.slane %v2798_v30, 2  ;;  %v8083_v28 = vld [vmem:[#allocation27 + $0x40] sm:$0xff]  }
 0x4bf   :  { %v2804_v37 = vrot.slane %v2797_v58, 6  ;;  %v2810_v38 = vrot.slane %v2797_v58, 4  ;;  %v2823_v39 = vsel %vm2719_vm1, 0.0, %v2803_v31  ;;  %v8084_v30 = vld [vmem:[#allocation27] sm:$0xff]  }
 0x4c0   :  { %v2812_v43 = vrot.slane %v2799_v32, 4  ;;  %v2825_v47 = vsel %vm2719_vm1, %v2797_v58, %v2805_v35  ;;  %v2818_v48 = vrot.slane %v2799_v32, 2  ;;  %v8085_v58 = vld [vmem:[#allocation27 + $0xc0] sm:$0xff]   ;;  %v8087_v32 = vld [vmem:[#allocation27 + $0x48] sm:$0xff]  }
 0x4c1   :  { %v2824_v55 = vsel %vm2719_vm1, %v2796_v27, %v2804_v37  ;;  %v2827_v45 = vsel %vm2826_vm2, %v2823_v39, %v2810_v38  ;;  %v8086_v31 = vld [vmem:[#allocation27 + $0x80] sm:$0xff]   ;;  %v8089_v35 = vld [vmem:[#allocation27 + $0xc8] sm:$0xff]   ;;  %v8091_v39 = vld [vmem:[#allocation27 + $0x50] sm:$0xff]  }
 0x4c2   :  { %v2828_v46 = vsel %vm2826_vm2, %v2824_v55, %v2811_v41  ;;  %v2831_v49 = vsel %vm2830_vm3, %v2827_v45, %v2817_v44  ;;  %v9396_v54 = vsel %vm2826_vm2, %v2825_v47, %v2812_v43  ;;  %v8088_v37 = vld [vmem:[#allocation27 + $0x8] sm:$0xff]   ;;  %v8093_v41 = vld [vmem:[#allocation27 + $0xd0] sm:$0xff]   ;;  %v8095_v47 = vld [vmem:[#allocation27 + $0x58] sm:$0xff]  }
 0x4c3   :  { %v2832_v56 = vsel %vm2830_vm3, %v2828_v46, %v2818_v48  ;;  %v2834_v61 = vpack.c.bf16 %v2831_v49, %v2831_v49  ;;  %v2833_v25 = vsel %vm2830_vm3, %v9396_v54, %v9409_v19  ;;  %v8090_v38 = vld [vmem:[#allocation27 + $0x88] sm:$0xff]   ;;  %v8092_v43 = vld [vmem:[#allocation27 + $0x10] sm:$0xff]   ;;  %v8097_v48 = vld [vmem:[#allocation27 + $0xd8] sm:$0xff]  }
 0x4c4   :  { %v2835_v57 = vpack.c.bf16 %v2832_v56, %v2832_v56  ;;  %v2836_v27 = vpack.c.bf16 %v2833_v25, %v2833_v25  ;;  %v8094_v44 = vld [vmem:[#allocation27 + $0x90] sm:$0xff]   ;;  %v8096_v55 = vld [vmem:[#allocation27 + $0x18] sm:$0xff]   ;;  %v8099_v46 = vld [vmem:[#allocation27 + $0x60] sm:$0xff]  }
 0x4c5   :  { %v8098_v45 = vld [vmem:[#allocation27 + $0x98] sm:$0xff]   ;;  %v8101_v49 = vld [vmem:[#allocation27 + $0xe0] sm:$0xff]  }
 0x4c6   :  { %3366 = vmatprep.mubr.bf16.mxu1 %v2835_v57  ;;  %3448 = vmatprep.mubr.bf16.mxu0 %v2835_v57  ;;  %v8100_v54 = vld [vmem:[#allocation27 + $0x20] sm:$0xff]   ;;  %v8103_v57 = vld [vmem:[#allocation27 + $0x68] sm:$0xff]  }
 0x4c7   :  { %3367 = vmatmul.mubr.bf16.vlgmr.msra.gmra.mrb[16].mxu1 %v2834_v61  ;;  %3449 = vmatmul.mubr.bf16.vlgmr.msra.gmra.mrb[20].mxu0 %v2834_v61  ;;  %v8102_v56 = vld [vmem:[#allocation27 + $0xa0] sm:$0xff]   ;;  %v8106_v61 = vld [vmem:[#allocation27 + $0xa8] sm:$0xff]  }
 0x4c8   :  { %3376 = vmatpush1.bf16.msra.mxu1 %v8051_v59  ;;  %7610 = vmatpush3.bf16.msra.mxu0 %v8054_v60  ;;  %v8104_v59 = vld [vmem:[#allocation27 + $0x28] sm:$0xff]  }
 0x4c9   :  { %3377 = vmatprep.subr.bf16.mxu1 %v8057_v62  ;;  %7611 = vmatprep.subr.bf16.mxu0 %v8934_v40  ;;  %v8105_v60 = vld [vmem:[#allocation27 + $0xe8] sm:$0xff]   ;;  %v8107_v62 = vld [vmem:[#allocation27 + $0x70] sm:$0xff]  }
 0x4ca   :  { %3407 = vmatprep.mubr.bf16.mxu1 %v8936_v2  ;;  %7625 = vmatprep.mubr.msk.bf16.mxu0 %vm8935_vm0, %v8934_v40 }
 0x4cc   :  { %3378 = vmatpush1.bf16.msra.mxu1 %v8055_v63  ;;  %7612 = vmatpush3.bf16.msra.mxu0 %v8058_v0  ;;  %v8108_v63 = vld [vmem:[#allocation27 + $0x30] sm:$0xff]  }
 0x4cd   :  { %3379 = vmatprep.subr.bf16.mxu1 %v8061_v1  ;;  %7613 = vmatprep.subr.bf16.mxu0 %v8934_v40  ;;  %v8109_v0 = vld [vmem:[#allocation27 + $0xf0] sm:$0xff]  }
 0x4ce   :  { %v8110_v1 = vld [vmem:[#allocation27 + $0xb0] sm:$0xff]  }
 0x4d0   :  { %3380 = vmatpush1.bf16.msra.mxu1 %v8059_v3  ;;  %7614 = vmatpush3.bf16.msra.mxu0 %v8062_v4  ;;  %v8111_v3 = vld [vmem:[#allocation27 + $0x78] sm:$0xff]  }
 0x4d1   :  { %3381 = vmatprep.subr.bf16.mxu1 %v8065_v5  ;;  %7615 = vmatprep.subr.bf16.mxu0 %v8934_v40  ;;  %v8112_v4 = vld [vmem:[#allocation27 + $0x38] sm:$0xff]  }
 0x4d2   :  { %v8113_v5 = vld [vmem:[#allocation27 + $0xf8] sm:$0xff]  }
 0x4d4   :  { %3382 = vmatpush1.bf16.msra.mxu1 %v8063_v6  ;;  %7616 = vmatpush3.bf16.msra.mxu0 %v8066_v7  ;;  %v8114_v6 = vld [vmem:[#allocation27 + $0xb8] sm:$0xff]   ;;  %v8117_v7 = vld [vmem:[#allocation24 + $0x404] ss:$16 sps:$4 sm:$0xff]  }
 0x4d5   :  { %3383 = vmatprep.subr.bf16.mxu1 %v8069_v9  ;;  %7617 = vmatprep.subr.bf16.mxu0 %v8934_v40  ;;  %v8120_v9 = vld [vmem:[#allocation24 + $0x40c] ss:$16 sps:$4 sm:$0xff]  }
 0x4d8   :  { %3384 = vmatpush1.bf16.msra.mxu1 %v8067_v10  ;;  %7618 = vmatpush3.bf16.msra.mxu0 %v8070_v11 }
 0x4d9   :  { %3385 = vmatprep.subr.bf16.mxu1 %v8073_v12  ;;  %7619 = vmatprep.subr.bf16.mxu0 %v8934_v40 }
 0x4dc   :  { %3386 = vmatpush1.bf16.msra.mxu1 %v8071_v13  ;;  %7620 = vmatpush3.bf16.msra.mxu0 %v8074_v14 }
 0x4dd   :  { %3387 = vmatprep.subr.bf16.mxu1 %v8077_v15  ;;  %7621 = vmatprep.subr.bf16.mxu0 %v8934_v40  ;;  %v2933_v15 = vld [vmem:[%s9622_s21] sm:$0x7] }
 0x4e0   :  { %3388 = vmatpush1.bf16.msra.mxu1 %v8075_v16  ;;  %7622 = vmatpush3.bf16.msra.mxu0 %v8078_v17  ;;  %v2946_v16 = vrot.slane %v2933_v15, %v9356_v8  ;;  %v931_v17 = vsub.s32 5, %v9293_v29 }
 0x4e1   :  { %3389 = vmatprep.subr.bf16.mxu1 %v8081_v18  ;;  %7623 = vmatprep.subr.bf16.mxu0 %v8934_v40  ;;  %v2938_v18 = vrot.slane %v2933_v15, %v9334_v50 }
 0x4e4   :  { %3390 = vmatpush1.bf16.msra.mxu1 %v8079_v20  ;;  %7624 = vmatpush3.bf16.msra.mxu0 %v8082_v24  ;;  %v2942_v20 = vrot.slane %v2933_v15, %v9342_v52  ;;  %v8133_v15 = vld [vmem:[#allocation24 + $0x460] ss:$16 sps:$4 sm:$0xff]  }
 0x4e5   :  { %7408 = vmatprep.subr.bf16.mxu0 %v8083_v28  ;;  %7430 = vmatprep.subr.bf16.mxu1 %v8085_v58  ;;  %v9425_v28 = vld [vmem:[%s9618_s17] sm:$0xff]  ;;  %s9661_s17 = sld [smem:[#allocation48_spill]] }
 0x4e7   :  { %3408 = vmatmul.mubr.bf16.vlgmr.msra.gmra.mrb[16].mxu1 %v2836_v27  ;;  %7626 = vmatmul.mubr.bf16.vlgmr.msra.gmra.mrb[24].mxu0 %v2836_v27 }
 0x4e8   :  { %7409 = vmatpush3.bf16.msra.mxu0 %v8084_v30  ;;  %7431 = vmatpush3.bf16.msra.mxu1 %v8086_v31  ;;  %v932_v30 = vrot.slane %v9425_v28, %v931_v17  ;;  %v8136_v17 = vld [vmem:[#allocation24 + $0x468] ss:$16 sps:$4 sm:$0xff]  }
 0x4e9   :  { %7410 = vmatprep.subr.bf16.mxu0 %v8087_v32  ;;  %7432 = vmatprep.subr.bf16.mxu1 %v8089_v35 }
 0x4ec   :  { %7411 = vmatpush3.bf16.msra.mxu0 %v8088_v37  ;;  %7433 = vmatpush3.bf16.msra.mxu1 %v8090_v38 }
 0x4ed   :  { %7412 = vmatprep.subr.bf16.mxu0 %v8091_v39  ;;  %7434 = vmatprep.subr.bf16.mxu1 %v8093_v41 }
 0x4f0   :  { %7413 = vmatpush3.bf16.msra.mxu0 %v8092_v43  ;;  %7435 = vmatpush3.bf16.msra.mxu1 %v8094_v44 }
 0x4f1   :  { %7414 = vmatprep.subr.bf16.mxu0 %v8095_v47  ;;  %7436 = vmatprep.subr.bf16.mxu1 %v8097_v48 }
 0x4f4   :  { %7415 = vmatpush3.bf16.msra.mxu0 %v8096_v55  ;;  %7437 = vmatpush3.bf16.msra.mxu1 %v8098_v45  ;;  %v1708_v55 = vadd.f32 %v9365_v23, %v932_v30  ;;  %v8121_v23 = vld [vmem:[#allocation24 + $0x420] ss:$16 sps:$4 sm:$0xff]  }
 0x4f5   :  { %7416 = vmatprep.subr.bf16.mxu0 %v8099_v46  ;;  %7438 = vmatprep.subr.bf16.mxu1 %v8101_v49  ;;  %v8145_v30 = vld [vmem:[#allocation24 + $0x4a0] ss:$16 sps:$4 sm:$0xff]  }
 0x4f8   :  { %7417 = vmatpush3.bf16.msra.mxu0 %v8100_v54  ;;  %7439 = vmatpush3.bf16.msra.mxu1 %v8102_v56 }
 0x4f9   :  { %7418 = vmatprep.subr.bf16.mxu0 %v8103_v57  ;;  %7440 = vmatprep.subr.bf16.mxu1 %v8105_v60  ;;  %v1758_v57 = vmax.f32 %v1708_v55, 0.0  ;;  %v8171_v55 = vld [vmem:[#allocation24 + $0x524] ss:$16 sps:$4 sm:$0xff]  }
 0x4fc   :  { %7419 = vmatpush3.bf16.msra.mxu0 %v8104_v59  ;;  %7441 = vmatpush3.bf16.msra.mxu1 %v8106_v61 }
 0x4fd   :  { %7420 = vmatprep.subr.bf16.mxu0 %v8107_v62  ;;  %7442 = vmatprep.subr.bf16.mxu1 %v8109_v0  ;;  %v8115_v62 = vld [vmem:[#allocation24 + $0x400] ss:$16 sps:$4 sm:$0xff]  }
 0x500   :  { %7421 = vmatpush3.bf16.msra.mxu0 %v8108_v63  ;;  %7443 = vmatpush3.bf16.msra.mxu1 %v8110_v1 }
 0x501   :  { %7422 = vmatprep.subr.bf16.mxu0 %v8111_v3  ;;  %7444 = vmatprep.subr.bf16.mxu1 %v8113_v5  ;;  %v8118_v3 = vld [vmem:[#allocation24 + $0x408] ss:$16 sps:$4 sm:$0xff]   ;;  %v3865_v5 = vpack.c.bf16 %v1758_v57, %v1758_v57  ;;  %v8180_v57 = vld [vmem:[#allocation24 + $0x54c] ss:$16 sps:$4 sm:$0xff]  }
 0x504   :  { %7423 = vmatpush3.bf16.msra.mxu0 %v8112_v4  ;;  %7445 = vmatpush3.bf16.msra.mxu1 %v8114_v6  ;;  %v8123_v4 = vld [vmem:[#allocation24 + $0x424] ss:$16 sps:$4 sm:$0xff]   ;;  %v8126_v6 = vld [vmem:[#allocation24 + $0x42c] ss:$16 sps:$4 sm:$0xff]  }
 0x505   :  { %4660 = vmatprep.subr.bf16.mxu0 %v8117_v7  ;;  %4742 = vmatprep.subr.bf16.mxu1 %v8120_v9  ;;  %v8129_v7 = vld [vmem:[#allocation24 + $0x444] ss:$16 sps:$4 sm:$0xff]   ;;  %v8124_v9 = vld [vmem:[#allocation24 + $0x428] ss:$16 sps:$4 sm:$0xff]  }
 0x59a   :  { %v7393_v10 = vpop.f32.mrb[20].mxu0 }
 0x59b   :  { %v7394_v11 = vpop.f32.mrb[21].mxu0 }
 0x59c   :  { %v7395_v12 = vadd.f32 %v7394_v11, %v7393_v10  ;;  %v7396_v13 = vpop.f32.mrb[22].mxu0  ;;  %v8132_v10 = vld [vmem:[#allocation24 + $0x44c] ss:$16 sps:$4 sm:$0xff]   ;;  %v8127_v11 = vld [vmem:[#allocation24 + $0x440] ss:$16 sps:$4 sm:$0xff]  }
 0x59d   :  { %v7397_v14 = vpop.f32.mrb[23].mxu0  ;;  %v8130_v13 = vld [vmem:[#allocation24 + $0x448] ss:$16 sps:$4 sm:$0xff]  }
 0x59e   :  { %v3451_v24 = vadd.f32 %v7395_v12, %v2946_v16  ;;  %v8135_v12 = vld [vmem:[#allocation24 + $0x464] ss:$16 sps:$4 sm:$0xff]   ;;  %v8138_v14 = vld [vmem:[#allocation24 + $0x46c] ss:$16 sps:$4 sm:$0xff]  }
 0x59f   :  { %v8141_v16 = vld [vmem:[#allocation24 + $0x484] ss:$16 sps:$4 sm:$0xff]  }
 0x5ba   :  { %v3409_v25 = vpop.f32.mrb[16].mxu1  ;;  %v3490_v27 = vpop.f32.mrb[24].mxu0 }
 0x5bb   :  { %v7693_v58 = vadd.f32 %v3409_v25, %v2938_v18  ;;  %v3491_v31 = vadd.f32 %v3490_v27, %v3451_v24  ;;  %v3411_v32 = vpop.f32.mrb[17].mxu1  ;;  %v7627_v35 = vpop.f32.mrb[25].mxu0  ;;  %v8144_v18 = vld [vmem:[#allocation24 + $0x48c] ss:$16 sps:$4 sm:$0xff]   ;;  %v8147_v24 = vld [vmem:[#allocation24 + $0x4a4] ss:$16 sps:$4 sm:$0xff]  }
 0x5bc   :  { %v7694_v37 = vadd.f32 %v3411_v32, %v2942_v20  ;;  %v3413_v38 = vpop.f32.mrb[18].mxu1  ;;  %v3493_v39 = vpop.f32.mrb[26].mxu0  ;;  %v8139_v20 = vld [vmem:[#allocation24 + $0x480] ss:$16 sps:$4 sm:$0xff]   ;;  %v8142_v25 = vld [vmem:[#allocation24 + $0x488] ss:$16 sps:$4 sm:$0xff]  }
 0x5bd   :  { %v3499_v41 = vrot.slane %v7693_v58, 2  ;;  %v3501_v43 = vrot.slane %v3491_v31, 2  ;;  %v3414_v44 = vpop.f32.mrb[19].mxu1  ;;  %v7628_v47 = vpop.f32.mrb[27].mxu0  ;;  %v8150_v27 = vld [vmem:[#allocation24 + $0x4ac] ss:$16 sps:$4 sm:$0xff]  }
 0x5be   :  { %v3500_v48 = vrot.slane %v7694_v37, 2  ;;  %v8156_v32 = vld [vmem:[#allocation24 + $0x4cc] ss:$16 sps:$4 sm:$0xff]   ;;  %v8151_v35 = vld [vmem:[#allocation24 + $0x4c0] ss:$16 sps:$4 sm:$0xff]  }
 0x5bf   :  { %v3505_v45 = vmax.f32 %v7693_v58, %v3499_v41  ;;  %v3507_v46 = vmax.f32 %v3491_v31, %v3501_v43  ;;  %v8153_v58 = vld [vmem:[#allocation24 + $0x4c4] ss:$16 sps:$4 sm:$0xff]   ;;  %v8148_v31 = vld [vmem:[#allocation24 + $0x4a8] ss:$16 sps:$4 sm:$0xff]   ;;  %v8162_v39 = vld [vmem:[#allocation24 + $0x4ec] ss:$16 sps:$4 sm:$0xff]  }
 0x5c0   :  { %v3506_v49 = vmax.f32 %v7694_v37, %v3500_v48  ;;  %v8159_v37 = vld [vmem:[#allocation24 + $0x4e4] ss:$16 sps:$4 sm:$0xff]   ;;  %v8154_v38 = vld [vmem:[#allocation24 + $0x4c8] ss:$16 sps:$4 sm:$0xff]   ;;  %v8157_v41 = vld [vmem:[#allocation24 + $0x4e0] ss:$16 sps:$4 sm:$0xff]  }
 0x5c1   :  { %v8165_v43 = vld [vmem:[#allocation24 + $0x504] ss:$16 sps:$4 sm:$0xff]   ;;  %v8160_v44 = vld [vmem:[#allocation24 + $0x4e8] ss:$16 sps:$4 sm:$0xff]   ;;  %v8168_v47 = vld [vmem:[#allocation24 + $0x50c] ss:$16 sps:$4 sm:$0xff]  }
 0x5c2   :  { %v3508_v54 = vmax.f32 %v3505_v45, %v3506_v49  ;;  %v3509_v56 = vmax.f32 %v3506_v49, %v3507_v46  ;;  %v8163_v48 = vld [vmem:[#allocation24 + $0x500] ss:$16 sps:$4 sm:$0xff]   ;;  %v8166_v45 = vld [vmem:[#allocation24 + $0x508] ss:$16 sps:$4 sm:$0xff]   ;;  %v8174_v46 = vld [vmem:[#allocation24 + $0x52c] ss:$16 sps:$4 sm:$0xff]  }
 0x5c3   :  { %v8169_v49 = vld [vmem:[#allocation24 + $0x520] ss:$16 sps:$4 sm:$0xff]  }
 0x5c4   :  { %v3511_v59 = vrot.slane %v3508_v54, 4  ;;  %v3516_v60 = vpack.c.bf16 %v3508_v54, %v3508_v54  ;;  %v3517_v61 = vpack.c.bf16 %v3509_v56, %v3509_v56  ;;  %v3514_v63 = vrot.slane %v3509_v56, 4  ;;  %v8177_v54 = vld [vmem:[#allocation24 + $0x544] ss:$16 sps:$4 sm:$0xff]   ;;  %v8172_v56 = vld [vmem:[#allocation24 + $0x528] ss:$16 sps:$4 sm:$0xff]  }
 0x5c6   :  { %v3518_v0 = vpack.c.bf16 %v3511_v59, %v3511_v59  ;;  %3815 = vmatprep.mubr.bf16.mxu0 %v3517_v61  ;;  %v3519_v1 = vpack.c.bf16 %v3514_v63, %v3514_v63  ;;  %v8175_v59 = vld [vmem:[#allocation24 + $0x540] ss:$16 sps:$4 sm:$0xff]   ;;  %v8178_v61 = vld [vmem:[#allocation24 + $0x548] ss:$16 sps:$4 sm:$0xff]  }
 0x5c7   :  { %3816 = vmatmul.mubr.bf16.vlgmr.msra.gmra.mrb[28].mxu0 %v3516_v60  ;;  %v8183_v60 = vld [vmem:[#allocation24 + $0x564] ss:$16 sps:$4 sm:$0xff]   ;;  %v8181_v63 = vld [vmem:[#allocation24 + $0x560] ss:$16 sps:$4 sm:$0xff]  }
 0x5c8   :  { %4661 = vmatpush1.bf16.msra.mxu0 %v8115_v62  ;;  %3855 = vmatprep.mubr.bf16.mxu1 %v3519_v1  ;;  %v8186_v62 = vld [vmem:[#allocation24 + $0x56c] ss:$16 sps:$4 sm:$0xff]   ;;  %v8184_v1 = vld [vmem:[#allocation24 + $0x568] ss:$16 sps:$4 sm:$0xff]  }
 0x5c9   :  { %4692 = vmatprep.mubr.bf16.mxu0 %v3865_v5  ;;  %3856 = vmatmul.mubr.bf16.vlgmr.msra.gmra.mrb[20].mxu1 %v3518_v0  ;;  %v8189_v0 = vld [vmem:[#allocation24 + $0x584] ss:$16 sps:$4 sm:$0xff]  }
 0x5ca   :  { %4743 = vmatpush1.bf16.msra.mxu1 %v8118_v3  ;;  %4662 = vmatprep.subr.bf16.mxu0 %v8123_v4  ;;  %v8192_v3 = vld [vmem:[#allocation24 + $0x58c] ss:$16 sps:$4 sm:$0xff]   ;;  %v8187_v4 = vld [vmem:[#allocation24 + $0x580] ss:$16 sps:$4 sm:$0xff]  }
 0x5cb   :  { %4774 = vmatprep.mubr.bf16.mxu1 %v3865_v5  ;;  %4744 = vmatprep.subr.bf16.mxu1 %v8126_v6  ;;  %v927_v5 = vsub.s32 4, %v9293_v29  ;;  %v8195_v6 = vld [vmem:[#allocation24 + $0x5a4] ss:$16 sps:$4 sm:$0xff]  }
 0x5cc   :  { %4663 = vmatpush1.bf16.msra.mxu0 %v8121_v23  ;;  %v939_v23 = vsub.s32 7, %v9293_v29 }
 0x5cd   :  { %4664 = vmatprep.subr.bf16.mxu0 %v8129_v7  ;;  %v8190_v7 = vld [vmem:[#allocation24 + $0x588] ss:$16 sps:$4 sm:$0xff]  }
 0x5ce   :  { %4745 = vmatpush1.bf16.msra.mxu1 %v8124_v9  ;;  %v8198_v9 = vld [vmem:[#allocation24 + $0x5ac] ss:$16 sps:$4 sm:$0xff]  }
 0x5cf   :  { %4746 = vmatprep.subr.bf16.mxu1 %v8132_v10  ;;  %v8193_v10 = vld [vmem:[#allocation24 + $0x5a0] ss:$16 sps:$4 sm:$0xff]  }
 0x5d0   :  { %4665 = vmatpush1.bf16.msra.mxu0 %v8127_v11  ;;  %v928_v11 = vrot.slane %v9425_v28, %v927_v5  ;;  %v8247_v5 = vld [vmem:[#allocation24 + $0x6c0] ss:$16 sps:$4 sm:$0xff]  }
 0x5d1   :  { %4666 = vmatprep.subr.bf16.mxu0 %v8135_v12  ;;  %v8201_v12 = vld [vmem:[#allocation24 + $0x5c4] ss:$16 sps:$4 sm:$0xff]  }
 0x5d2   :  { %4747 = vmatpush1.bf16.msra.mxu1 %v8130_v13  ;;  %v940_v13 = vrot.slane %v9425_v28, %v939_v23  ;;  %v8250_v23 = vld [vmem:[#allocation24 + $0x6c8] ss:$16 sps:$4 sm:$0xff]  }
 0x5d3   :  { %4748 = vmatprep.subr.bf16.mxu1 %v8138_v14  ;;  %v8196_v14 = vld [vmem:[#allocation24 + $0x5a8] ss:$16 sps:$4 sm:$0xff]  }
 0x5d4   :  { %4667 = vmatpush1.bf16.msra.mxu0 %v8133_v15  ;;  %v8204_v15 = vld [vmem:[#allocation24 + $0x5cc] ss:$16 sps:$4 sm:$0xff]  }
 0x5d5   :  { %4668 = vmatprep.subr.bf16.mxu0 %v8141_v16  ;;  %v8199_v16 = vld [vmem:[#allocation24 + $0x5c0] ss:$16 sps:$4 sm:$0xff]  }
 0x5d6   :  { %4749 = vmatpush1.bf16.msra.mxu1 %v8136_v17  ;;  %v1706_v17 = vadd.f32 %v9361_v21, %v928_v11  ;;  %v8211_v21 = vld [vmem:[#allocation24 + $0x600] ss:$16 sps:$4 sm:$0xff]   ;;  %v8256_v11 = vld [vmem:[#allocation24 + $0x6e8] ss:$16 sps:$4 sm:$0xff]  }
 0x5d7   :  { %4750 = vmatprep.subr.bf16.mxu1 %v8144_v18  ;;  %v8207_v18 = vld [vmem:[#allocation24 + $0x5e4] ss:$16 sps:$4 sm:$0xff]  }
 0x5d8   :  { %4669 = vmatpush1.bf16.msra.mxu0 %v8139_v20  ;;  %v1749_v20 = vadd.f32 %v9367_v51, %v940_v13  ;;  %v8259_v13 = vld [vmem:[#allocation24 + $0x700] ss:$16 sps:$4 sm:$0xff]  }
 0x5d9   :  { %4670 = vmatprep.subr.bf16.mxu0 %v8147_v24  ;;  %v8202_v24 = vld [vmem:[#allocation24 + $0x5c8] ss:$16 sps:$4 sm:$0xff]  }
 0x5da   :  { %4751 = vmatpush1.bf16.msra.mxu1 %v8142_v25  ;;  %v8210_v25 = vld [vmem:[#allocation24 + $0x5ec] ss:$16 sps:$4 sm:$0xff]  }
 0x5db   :  { %4752 = vmatprep.subr.bf16.mxu1 %v8150_v27  ;;  %v8205_v27 = vld [vmem:[#allocation24 + $0x5e0] ss:$16 sps:$4 sm:$0xff]  }
 0x5dc   :  { %4671 = vmatpush1.bf16.msra.mxu0 %v8145_v30  ;;  %v1757_v30 = vmax.f32 %v1706_v17, 0.0  ;;  %v8265_v17 = vld [vmem:[#allocation24 + $0x720] ss:$16 sps:$4 sm:$0xff]  }
 0x5dd   :  { %4672 = vmatprep.subr.bf16.mxu0 %v8153_v58  ;;  %v8213_v58 = vld [vmem:[#allocation24 + $0x604] ss:$16 sps:$4 sm:$0xff]  }
 0x5de   :  { %4753 = vmatpush1.bf16.msra.mxu1 %v8148_v31  ;;  %v1760_v31 = vmax.f32 %v1749_v20, 0.0  ;;  %v8268_v20 = vld [vmem:[#allocation24 + $0x728] ss:$16 sps:$4 sm:$0xff]  }
 0x5df   :  { %4754 = vmatprep.subr.bf16.mxu1 %v8156_v32  ;;  %v8208_v32 = vld [vmem:[#allocation24 + $0x5e8] ss:$16 sps:$4 sm:$0xff]  }
 0x5e0   :  { %4673 = vmatpush1.bf16.msra.mxu0 %v8151_v35  ;;  %v8216_v35 = vld [vmem:[#allocation24 + $0x60c] ss:$16 sps:$4 sm:$0xff]   ;;  %v3867_v51 = vpack.c.bf16 %v1760_v31, %v1760_v31  ;;  %v8277_v31 = vld [vmem:[#allocation24 + $0x760] ss:$16 sps:$4 sm:$0xff]  }
 0x5e1   :  { %4674 = vmatprep.subr.bf16.mxu0 %v8159_v37  ;;  %v3864_v37 = vpack.c.bf16 %v1757_v30, %v1757_v30  ;;  %v8274_v30 = vld [vmem:[#allocation24 + $0x748] ss:$16 sps:$4 sm:$0xff]  }
 0x5e2   :  { %4755 = vmatpush1.bf16.msra.mxu1 %v8154_v38  ;;  %v8219_v38 = vld [vmem:[#allocation24 + $0x624] ss:$16 sps:$4 sm:$0xff]  }
 0x5e3   :  { %4756 = vmatprep.subr.bf16.mxu1 %v8162_v39  ;;  %v8214_v39 = vld [vmem:[#allocation24 + $0x608] ss:$16 sps:$4 sm:$0xff]  }
 0x5e4   :  { %4675 = vmatpush1.bf16.msra.mxu0 %v8157_v41  ;;  %v8222_v41 = vld [vmem:[#allocation24 + $0x62c] ss:$16 sps:$4 sm:$0xff]  }
 0x5e5   :  { %4676 = vmatprep.subr.bf16.mxu0 %v8165_v43  ;;  %v8217_v43 = vld [vmem:[#allocation24 + $0x620] ss:$16 sps:$4 sm:$0xff]  }
 0x5e6   :  { %4757 = vmatpush1.bf16.msra.mxu1 %v8160_v44  ;;  %v8225_v44 = vld [vmem:[#allocation24 + $0x644] ss:$16 sps:$4 sm:$0xff]  }
 0x5e7   :  { %4758 = vmatprep.subr.bf16.mxu1 %v8168_v47  ;;  %v8220_v47 = vld [vmem:[#allocation24 + $0x628] ss:$16 sps:$4 sm:$0xff]  }
 0x5e8   :  { %4677 = vmatpush1.bf16.msra.mxu0 %v8163_v48  ;;  %v8228_v48 = vld [vmem:[#allocation24 + $0x64c] ss:$16 sps:$4 sm:$0xff]  }
 0x5e9   :  { %4678 = vmatprep.subr.bf16.mxu0 %v8171_v55  ;;  %v8223_v55 = vld [vmem:[#allocation24 + $0x640] ss:$16 sps:$4 sm:$0xff]  }
 0x5ea   :  { %4759 = vmatpush1.bf16.msra.mxu1 %v8166_v45  ;;  %v8231_v45 = vld [vmem:[#allocation24 + $0x664] ss:$16 sps:$4 sm:$0xff]  }
 0x5eb   :  { %4760 = vmatprep.subr.bf16.mxu1 %v8174_v46  ;;  %v8226_v46 = vld [vmem:[#allocation24 + $0x648] ss:$16 sps:$4 sm:$0xff]  }
 0x5ec   :  { %4679 = vmatpush1.bf16.msra.mxu0 %v8169_v49  ;;  %v8234_v49 = vld [vmem:[#allocation24 + $0x66c] ss:$16 sps:$4 sm:$0xff]  }
 0x5ed   :  { %4680 = vmatprep.subr.bf16.mxu0 %v8177_v54  ;;  %v8229_v54 = vld [vmem:[#allocation24 + $0x660] ss:$16 sps:$4 sm:$0xff]  }
 0x5ee   :  { %4761 = vmatpush1.bf16.msra.mxu1 %v8172_v56  ;;  %v8237_v56 = vld [vmem:[#allocation24 + $0x684] ss:$16 sps:$4 sm:$0xff]  }
 0x5ef   :  { %4762 = vmatprep.subr.bf16.mxu1 %v8180_v57  ;;  %v8232_v57 = vld [vmem:[#allocation24 + $0x668] ss:$16 sps:$4 sm:$0xff]  }
 0x5f0   :  { %4681 = vmatpush1.bf16.msra.mxu0 %v8175_v59  ;;  %v8240_v59 = vld [vmem:[#allocation24 + $0x68c] ss:$16 sps:$4 sm:$0xff]  }
 0x5f1   :  { %4682 = vmatprep.subr.bf16.mxu0 %v8183_v60  ;;  %v8235_v60 = vld [vmem:[#allocation24 + $0x680] ss:$16 sps:$4 sm:$0xff]  }
 0x5f2   :  { %4763 = vmatpush1.bf16.msra.mxu1 %v8178_v61  ;;  %v8243_v61 = vld [vmem:[#allocation24 + $0x6a4] ss:$16 sps:$4 sm:$0xff]  }
 0x5f3   :  { %4764 = vmatprep.subr.bf16.mxu1 %v8186_v62  ;;  %v8238_v62 = vld [vmem:[#allocation24 + $0x688] ss:$16 sps:$4 sm:$0xff]  }
 0x5f4   :  { %4683 = vmatpush1.bf16.msra.mxu0 %v8181_v63  ;;  %v8246_v63 = vld [vmem:[#allocation24 + $0x6ac] ss:$16 sps:$4 sm:$0xff]  }
 0x5f5   :  { %4684 = vmatprep.subr.bf16.mxu0 %v8189_v0  ;;  %v8241_v0 = vld [vmem:[#allocation24 + $0x6a0] ss:$16 sps:$4 sm:$0xff]  }
 0x5f6   :  { %4765 = vmatpush1.bf16.msra.mxu1 %v8184_v1  ;;  %v8249_v1 = vld [vmem:[#allocation24 + $0x6c4] ss:$16 sps:$4 sm:$0xff]  }
 0x5f7   :  { %4766 = vmatprep.subr.bf16.mxu1 %v8192_v3  ;;  %v8244_v3 = vld [vmem:[#allocation24 + $0x6a8] ss:$16 sps:$4 sm:$0xff]  }
 0x5f8   :  { %4685 = vmatpush1.bf16.msra.mxu0 %v8187_v4  ;;  %v8252_v4 = vld [vmem:[#allocation24 + $0x6cc] ss:$16 sps:$4 sm:$0xff]  }
 0x5f9   :  { %4686 = vmatprep.subr.bf16.mxu0 %v8195_v6  ;;  %v8255_v6 = vld [vmem:[#allocation24 + $0x6e4] ss:$16 sps:$4 sm:$0xff]  }
 0x5fa   :  { %4767 = vmatpush1.bf16.msra.mxu1 %v8190_v7  ;;  %v8258_v7 = vld [vmem:[#allocation24 + $0x6ec] ss:$16 sps:$4 sm:$0xff]  }
 0x5fb   :  { %4768 = vmatprep.subr.bf16.mxu1 %v8198_v9  ;;  %v8253_v9 = vld [vmem:[#allocation24 + $0x6e0] ss:$16 sps:$4 sm:$0xff]  }
 0x5fc   :  { %4687 = vmatpush1.bf16.msra.mxu0 %v8193_v10  ;;  %v8261_v10 = vld [vmem:[#allocation24 + $0x704] ss:$16 sps:$4 sm:$0xff]  }
 0x5fd   :  { %4688 = vmatprep.subr.bf16.mxu0 %v8201_v12  ;;  %v8264_v12 = vld [vmem:[#allocation24 + $0x70c] ss:$16 sps:$4 sm:$0xff]  }
 0x5fe   :  { %4769 = vmatpush1.bf16.msra.mxu1 %v8196_v14  ;;  %v8267_v14 = vld [vmem:[#allocation24 + $0x724] ss:$16 sps:$4 sm:$0xff]  }
 0x5ff   :  { %4770 = vmatprep.subr.bf16.mxu1 %v8204_v15  ;;  %v8262_v15 = vld [vmem:[#allocation24 + $0x708] ss:$16 sps:$4 sm:$0xff]  }
 0x600   :  { %4689 = vmatpush1.bf16.msra.mxu0 %v8199_v16  ;;  %v8270_v16 = vld [vmem:[#allocation24 + $0x72c] ss:$16 sps:$4 sm:$0xff]  }
 0x601   :  { %4690 = vmatprep.subr.bf16.mxu0 %v8207_v18  ;;  %v8273_v18 = vld [vmem:[#allocation24 + $0x744] ss:$16 sps:$4 sm:$0xff]  }
 0x602   :  { %4771 = vmatpush1.bf16.msra.mxu1 %v8202_v24  ;;  %v8276_v24 = vld [vmem:[#allocation24 + $0x74c] ss:$16 sps:$4 sm:$0xff]  }
 0x603   :  { %4772 = vmatprep.subr.bf16.mxu1 %v8210_v25  ;;  %v8271_v25 = vld [vmem:[#allocation24 + $0x740] ss:$16 sps:$4 sm:$0xff]  }
 0x604   :  { %4691 = vmatpush1.bf16.msra.mxu0 %v8205_v27  ;;  %v8279_v27 = vld [vmem:[#allocation24 + $0x764] ss:$16 sps:$4 sm:$0xff]  }
 0x605   :  { %4701 = vmatprep.subr.bf16.mxu0 %v8213_v58  ;;  %v8282_v58 = vld [vmem:[#allocation24 + $0x76c] ss:$16 sps:$4 sm:$0xff]  }
 0x606   :  { %4773 = vmatpush1.bf16.msra.mxu1 %v8208_v32  ;;  %v8285_v32 = vld [vmem:[#allocation24 + $0x784] ss:$16 sps:$4 sm:$0xff]  }
 0x607   :  { %4693 = vmatmul.mubr.bf16.vlgmr.msra.gmra.mrb[32].mxu0 %v3864_v37  ;;  %4783 = vmatprep.subr.bf16.mxu1 %v8216_v35  ;;  %v8280_v35 = vld [vmem:[#allocation24 + $0x768] ss:$16 sps:$4 sm:$0xff]  }
 0x608   :  { %4702 = vmatpush1.bf16.msra.mxu0 %v8211_v21  ;;  %4733 = vmatprep.mubr.bf16.mxu0 %v3867_v51  ;;  %v8288_v21 = vld [vmem:[#allocation24 + $0x78c] ss:$16 sps:$4 sm:$0xff]  }
 0x609   :  { %4775 = vmatmul.mubr.bf16.vlgmr.msra.gmra.mrb[24].mxu1 %v3864_v37  ;;  %4703 = vmatprep.subr.bf16.mxu0 %v8219_v38  ;;  %v8283_v37 = vld [vmem:[#allocation24 + $0x780] ss:$16 sps:$4 sm:$0xff]   ;;  %v935_v38 = vsub.s32 6, %v9293_v29 }
 0x60a   :  { %4784 = vmatpush1.bf16.msra.mxu1 %v8214_v39  ;;  %4815 = vmatprep.mubr.bf16.mxu1 %v3867_v51  ;;  %v8291_v51 = vld [vmem:[#allocation24 + $0x7a4] ss:$16 sps:$4 sm:$0xff]   ;;  %v8286_v39 = vld [vmem:[#allocation24 + $0x788] ss:$16 sps:$4 sm:$0xff]  }
 0x60b   :  { %4785 = vmatprep.subr.bf16.mxu1 %v8222_v41  ;;  %v8294_v41 = vld [vmem:[#allocation24 + $0x7ac] ss:$16 sps:$4 sm:$0xff]  }
 0x60c   :  { %4704 = vmatpush1.bf16.msra.mxu0 %v8217_v43  ;;  %v8289_v43 = vld [vmem:[#allocation24 + $0x7a0] ss:$16 sps:$4 sm:$0xff]  }
 0x60d   :  { %4705 = vmatprep.subr.bf16.mxu0 %v8225_v44  ;;  %v936_v44 = vrot.slane %v9425_v28, %v935_v38  ;;  %v8304_v28 = vld [vmem:[#allocation24 + $0x7e8] ss:$16 sps:$4 sm:$0xff]   ;;  %v8339_v38 = vld [vmem:[#allocation25 + $0x320] ss:$12 sps:$4 sm:$0xff]  }
 0x60e   :  { %4786 = vmatpush1.bf16.msra.mxu1 %v8220_v47  ;;  %v8297_v47 = vld [vmem:[#allocation24 + $0x7c4] ss:$16 sps:$4 sm:$0xff]  }
 0x60f   :  { %4787 = vmatprep.subr.bf16.mxu1 %v8228_v48  ;;  %v8292_v48 = vld [vmem:[#allocation24 + $0x7a8] ss:$16 sps:$4 sm:$0xff]   ;;  %v1747_v29 = vadd.f32 %v9363_v22, %v936_v44  ;;  %v7002_v22 = vld [vmem:[%s9624_s23] ss:$0 sm:$0xff]  ;;  %v8341_v44 = vld [vmem:[#allocation25 + $0x330] ss:$12 sps:$4 sm:$0xff]  }
 0x610   :  { %4706 = vmatpush1.bf16.msra.mxu0 %v8223_v55  ;;  %v8300_v55 = vld [vmem:[#allocation24 + $0x7cc] ss:$16 sps:$4 sm:$0xff]  }
 0x611   :  { %4707 = vmatprep.subr.bf16.mxu0 %v8231_v45  ;;  %v8295_v45 = vld [vmem:[#allocation24 + $0x7c0] ss:$16 sps:$4 sm:$0xff]  }
 0x612   :  { %4788 = vmatpush1.bf16.msra.mxu1 %v8226_v46  ;;  %v8303_v46 = vld [vmem:[#allocation24 + $0x7e4] ss:$16 sps:$4 sm:$0xff]  }
 0x613   :  { %4789 = vmatprep.subr.bf16.mxu1 %v8234_v49  ;;  %v8298_v49 = vld [vmem:[#allocation24 + $0x7c8] ss:$16 sps:$4 sm:$0xff]  }
 0x614   :  { %4708 = vmatpush1.bf16.msra.mxu0 %v8229_v54  ;;  %v8306_v54 = vld [vmem:[#allocation24 + $0x7ec] ss:$16 sps:$4 sm:$0xff]  }
 0x615   :  { %4709 = vmatprep.subr.bf16.mxu0 %v8237_v56  ;;  %v8301_v56 = vld [vmem:[#allocation24 + $0x7e0] ss:$16 sps:$4 sm:$0xff]  }
 0x616   :  { %4790 = vmatpush1.bf16.msra.mxu1 %v8232_v57  ;;  %v1759_v57 = vmax.f32 %v1747_v29, 0.0  ;;  %v8350_v29 = vld [vmem:[#allocation25 + $0x290] ss:$12 sps:$4 sm:$0xff]  }
 0x617   :  { %4791 = vmatprep.subr.bf16.mxu1 %v8240_v59 }
 0x618   :  { %4710 = vmatpush1.bf16.msra.mxu0 %v8235_v60  ;;  %v3866_v59 = vpack.c.bf16 %v1759_v57, %v1759_v57  ;;  %v8358_v57 = vld [vmem:[#allocation25 + $0x37c] ss:$12 sps:$4 sm:$0xff]  }
 0x619   :  { %4711 = vmatprep.subr.bf16.mxu0 %v8243_v61 }
 0x61a   :  { %4792 = vmatpush1.bf16.msra.mxu1 %v8238_v62  ;;  %v8309_v62 = vld [vmem:[#allocation25 + $0x244] ss:$12 sps:$4 sm:$0xff]  }
 0x61b   :  { %4793 = vmatprep.subr.bf16.mxu1 %v8246_v63 }
 0x61c   :  { %4712 = vmatpush1.bf16.msra.mxu0 %v8241_v0 }
 0x61d   :  { %4713 = vmatprep.subr.bf16.mxu0 %v8249_v1 }
 0x61e   :  { %4794 = vmatpush1.bf16.msra.mxu1 %v8244_v3  ;;  %v8307_v3 = vld [vmem:[#allocation25 + $0x240] ss:$12 sps:$4 sm:$0xff]  }
 0x61f   :  { %4795 = vmatprep.subr.bf16.mxu1 %v8252_v4 }
 0x620   :  { %4714 = vmatpush1.bf16.msra.mxu0 %v8247_v5 }
 0x621   :  { %4715 = vmatprep.subr.bf16.mxu0 %v8255_v6 }
 0x622   :  { %4796 = vmatpush1.bf16.msra.mxu1 %v8250_v23 }
 0x623   :  { %4797 = vmatprep.subr.bf16.mxu1 %v8258_v7 }
 0x624   :  { %4716 = vmatpush1.bf16.msra.mxu0 %v8253_v9 }
 0x625   :  { %4717 = vmatprep.subr.bf16.mxu0 %v8261_v10  ;;  %v8312_v10 = vld [vmem:[#allocation25 + $0x25c] ss:$12 sps:$4 sm:$0xff]  }
 0x626   :  { %4798 = vmatpush1.bf16.msra.mxu1 %v8256_v11 }
 0x627   :  { %4799 = vmatprep.subr.bf16.mxu1 %v8264_v12  ;;  %v8310_v12 = vld [vmem:[#allocation25 + $0x258] ss:$12 sps:$4 sm:$0xff]  }
 0x628   :  { %4718 = vmatpush1.bf16.msra.mxu0 %v8259_v13  ;;  %v8315_v13 = vld [vmem:[#allocation25 + $0x274] ss:$12 sps:$4 sm:$0xff]  }
 0x629   :  { %4719 = vmatprep.subr.bf16.mxu0 %v8267_v14  ;;  %v8313_v14 = vld [vmem:[#allocation25 + $0x270] ss:$12 sps:$4 sm:$0xff]  }
 0x62a   :  { %4800 = vmatpush1.bf16.msra.mxu1 %v8262_v15  ;;  %v8318_v15 = vld [vmem:[#allocation25 + $0x28c] ss:$12 sps:$4 sm:$0xff]  }
 0x62b   :  { %4801 = vmatprep.subr.bf16.mxu1 %v8270_v16  ;;  %v8316_v16 = vld [vmem:[#allocation25 + $0x288] ss:$12 sps:$4 sm:$0xff]  }
 0x62c   :  { %4720 = vmatpush1.bf16.msra.mxu0 %v8265_v17  ;;  %v8321_v17 = vld [vmem:[#allocation25 + $0x2a4] ss:$12 sps:$4 sm:$0xff]  }
 0x62d   :  { %4721 = vmatprep.subr.bf16.mxu0 %v8273_v18  ;;  %v8319_v18 = vld [vmem:[#allocation25 + $0x2a0] ss:$12 sps:$4 sm:$0xff]  }
 0x62e   :  { %4802 = vmatpush1.bf16.msra.mxu1 %v8268_v20  ;;  %v8324_v20 = vld [vmem:[#allocation25 + $0x2bc] ss:$12 sps:$4 sm:$0xff]  }
 0x62f   :  { %4803 = vmatprep.subr.bf16.mxu1 %v8276_v24  ;;  %v8322_v24 = vld [vmem:[#allocation25 + $0x2b8] ss:$12 sps:$4 sm:$0xff]  }
 0x630   :  { %4722 = vmatpush1.bf16.msra.mxu0 %v8271_v25  ;;  %v8327_v25 = vld [vmem:[#allocation25 + $0x2d4] ss:$12 sps:$4 sm:$0xff]  }
 0x631   :  { %4723 = vmatprep.subr.bf16.mxu0 %v8279_v27  ;;  %v8325_v27 = vld [vmem:[#allocation25 + $0x2d0] ss:$12 sps:$4 sm:$0xff]  }
 0x632   :  { %4804 = vmatpush1.bf16.msra.mxu1 %v8274_v30  ;;  %v8330_v30 = vld [vmem:[#allocation25 + $0x2ec] ss:$12 sps:$4 sm:$0xff]  }
 0x633   :  { %4805 = vmatprep.subr.bf16.mxu1 %v8282_v58  ;;  %v8328_v58 = vld [vmem:[#allocation25 + $0x2e8] ss:$12 sps:$4 sm:$0xff]  }
 0x634   :  { %4724 = vmatpush1.bf16.msra.mxu0 %v8277_v31  ;;  %v8333_v31 = vld [vmem:[#allocation25 + $0x304] ss:$12 sps:$4 sm:$0xff]  }
 0x635   :  { %4725 = vmatprep.subr.bf16.mxu0 %v8285_v32  ;;  %v8334_v32 = vld [vmem:[#allocation25 + $0x308] ss:$12 sps:$4 sm:$0xff]  }
 0x636   :  { %4806 = vmatpush1.bf16.msra.mxu1 %v8280_v35  ;;  %v8331_v35 = vld [vmem:[#allocation25 + $0x300] ss:$12 sps:$4 sm:$0xff]  }
 0x637   :  { %4807 = vmatprep.subr.bf16.mxu1 %v8288_v21  ;;  %v8335_v21 = vld [vmem:[#allocation25 + $0x248] ss:$12 sps:$4 sm:$0xff]  }
 0x638   :  { %4726 = vmatpush1.bf16.msra.mxu0 %v8283_v37  ;;  %v8338_v37 = vld [vmem:[#allocation25 + $0x31c] ss:$12 sps:$4 sm:$0xff]  }
 0x639   :  { %4727 = vmatprep.subr.bf16.mxu0 %v8291_v51  ;;  %v8336_v51 = vld [vmem:[#allocation25 + $0x318] ss:$12 sps:$4 sm:$0xff]  }
 0x63a   :  { %4808 = vmatpush1.bf16.msra.mxu1 %v8286_v39  ;;  %v8340_v39 = vld [vmem:[#allocation25 + $0x260] ss:$12 sps:$4 sm:$0xff]  }
 0x63b   :  { %4809 = vmatprep.subr.bf16.mxu1 %v8294_v41  ;;  %v8343_v41 = vld [vmem:[#allocation25 + $0x334] ss:$12 sps:$4 sm:$0xff]  }
 0x63c   :  { %4728 = vmatpush1.bf16.msra.mxu0 %v8289_v43  ;;  %v8344_v43 = vld [vmem:[#allocation25 + $0x338] ss:$12 sps:$4 sm:$0xff]  }
 0x63d   :  { %4729 = vmatprep.subr.bf16.mxu0 %v8297_v47  ;;  %v8345_v47 = vld [vmem:[#allocation25 + $0x278] ss:$12 sps:$4 sm:$0xff]  }
 0x63e   :  { %4810 = vmatpush1.bf16.msra.mxu1 %v8292_v48  ;;  %v8348_v48 = vld [vmem:[#allocation25 + $0x34c] ss:$12 sps:$4 sm:$0xff]  }
 0x63f   :  { %4811 = vmatprep.subr.bf16.mxu1 %v8300_v55  ;;  %v8349_v55 = vld [vmem:[#allocation25 + $0x350] ss:$12 sps:$4 sm:$0xff]  }
 0x640   :  { %4730 = vmatpush1.bf16.msra.mxu0 %v8295_v45  ;;  %v8346_v45 = vld [vmem:[#allocation25 + $0x348] ss:$12 sps:$4 sm:$0xff]  }
 0x641   :  { %4731 = vmatprep.subr.bf16.mxu0 %v8303_v46  ;;  %v8353_v46 = vld [vmem:[#allocation25 + $0x364] ss:$12 sps:$4 sm:$0xff]  }
 0x642   :  { %4812 = vmatpush1.bf16.msra.mxu1 %v8298_v49  ;;  %v8354_v49 = vld [vmem:[#allocation25 + $0x368] ss:$12 sps:$4 sm:$0xff]  }
 0x643   :  { %4813 = vmatprep.subr.bf16.mxu1 %v8306_v54  ;;  %v8351_v54 = vld [vmem:[#allocation25 + $0x360] ss:$12 sps:$4 sm:$0xff]  }
 0x644   :  { %4732 = vmatpush1.bf16.msra.mxu0 %v8301_v56  ;;  %v8355_v56 = vld [vmem:[#allocation25 + $0x2a8] ss:$12 sps:$4 sm:$0xff]  }
 0x645   :  { %5435 = vmatprep.subr.bf16.mxu0 %v8309_v62  ;;  %v8361_v62 = vld [vmem:[#allocation25 + $0x390] ss:$12 sps:$4 sm:$0xff]  }
 0x646   :  { %4814 = vmatpush1.bf16.msra.mxu1 %v8304_v28  ;;  %v8359_v28 = vld [vmem:[#allocation25 + $0x380] ss:$12 sps:$4 sm:$0xff]  }
 0x647   :  { %4734 = vmatmul.mubr.bf16.vlgmr.msra.gmra.mrb[32].mxu0 %v3866_v59  ;;  %7452 = vmatprep.subr.bf16.mxu1 %v8334_v32 }
 0x648   :  { %5436 = vmatpush1.bf16.msra.mxu0 %v8307_v3  ;;  %v8366_v3 = vld [vmem:[#allocation25 + $0x3a8] ss:$12 sps:$4 sm:$0xff]  }
 0x649   :  { %4816 = vmatmul.mubr.bf16.vlgmr.msra.gmra.mrb[24].mxu1 %v3866_v59  ;;  %5437 = vmatprep.subr.bf16.mxu0 %v8312_v10  ;;  %v8356_v59 = vld [vmem:[#allocation25 + $0x378] ss:$12 sps:$4 sm:$0xff]  }
 0x64a   :  { %7453 = vmatpush3.bf16.msra.mxu1 %v8335_v21 }
 0x64b   :  { %7454 = vmatprep.subr.bf16.mxu1 %v8339_v38 }
 0x64c   :  { %5438 = vmatpush1.bf16.msra.mxu0 %v8310_v12 }
 0x64d   :  { %5439 = vmatprep.subr.bf16.mxu0 %v8315_v13 }
 0x64e   :  { %7455 = vmatpush3.bf16.msra.mxu1 %v8340_v39 }
 0x64f   :  { %7456 = vmatprep.subr.bf16.mxu1 %v8344_v43 }
 0x650   :  { %5440 = vmatpush1.bf16.msra.mxu0 %v8313_v14 }
 0x651   :  { %5441 = vmatprep.subr.bf16.mxu0 %v8318_v15 }
 0x652   :  { %7457 = vmatpush3.bf16.msra.mxu1 %v8345_v47 }
 0x653   :  { %7458 = vmatprep.subr.bf16.mxu1 %v8349_v55 }
 0x654   :  { %5442 = vmatpush1.bf16.msra.mxu0 %v8316_v16 }
 0x655   :  { %5443 = vmatprep.subr.bf16.mxu0 %v8321_v17 }
 0x656   :  { %7459 = vmatpush3.bf16.msra.mxu1 %v8350_v29 }
 0x657   :  { %7460 = vmatprep.subr.bf16.mxu1 %v8354_v49 }
 0x658   :  { %5444 = vmatpush1.bf16.msra.mxu0 %v8319_v18 }
 0x659   :  { %5445 = vmatprep.subr.bf16.mxu0 %v8324_v20 }
 0x65a   :  { %7461 = vmatpush3.bf16.msra.mxu1 %v8355_v56 }
 0x65b   :  { %7462 = vmatprep.subr.bf16.mxu1 %v8359_v28 }
 0x65c   :  { %5446 = vmatpush1.bf16.msra.mxu0 %v8322_v24 }
 0x65d   :  { %5447 = vmatprep.subr.bf16.mxu0 %v8327_v25 }
 0x660   :  { %5448 = vmatpush1.bf16.msra.mxu0 %v8325_v27 }
 0x661   :  { %5449 = vmatprep.subr.bf16.mxu0 %v8330_v30 }
 0x664   :  { %5450 = vmatpush1.bf16.msra.mxu0 %v8328_v58 }
 0x665   :  { %5451 = vmatprep.subr.bf16.mxu0 %v8333_v31 }
 0x668   :  { %5452 = vmatpush1.bf16.msra.mxu0 %v8331_v35 }
 0x669   :  { %5453 = vmatprep.subr.bf16.mxu0 %v8338_v37 }
 0x66c   :  { %5454 = vmatpush1.bf16.msra.mxu0 %v8336_v51 }
 0x66d   :  { %5455 = vmatprep.subr.bf16.mxu0 %v8343_v41 }
 0x670   :  { %5456 = vmatpush1.bf16.msra.mxu0 %v8341_v44 }
 0x671   :  { %5457 = vmatprep.subr.bf16.mxu0 %v8348_v48 }
 0x674   :  { %5458 = vmatpush1.bf16.msra.mxu0 %v8346_v45 }
 0x675   :  { %5459 = vmatprep.subr.bf16.mxu0 %v8353_v46 }
 0x678   :  { %5460 = vmatpush1.bf16.msra.mxu0 %v8351_v54 }
 0x679   :  { %5461 = vmatprep.subr.bf16.mxu0 %v8358_v57 }
 0x67c   :  { %5462 = vmatpush1.bf16.msra.mxu0 %v8356_v59 }
 0x69a   :  { %v7424_v60 = vpop.f32.mrb[28].mxu0 }
 0x69b   :  { %v7425_v61 = vpop.f32.mrb[29].mxu0 }
 0x69c   :  { %v7426_v63 = vadd.f32 %v7425_v61, %v7424_v60  ;;  %v7427_v0 = vpop.f32.mrb[30].mxu0  ;;  %v7446_v1 = vpop.f32.mrb[20].mxu1  ;;  %v8360_v60 = vld [vmem:[#allocation25 + $0x2c0] ss:$12 sps:$4 sm:$0xff]   ;;  %v8364_v61 = vld [vmem:[#allocation25 + $0x398] ss:$12 sps:$4 sm:$0xff]  }
 0x69d   :  { %v7428_v4 = vpop.f32.mrb[31].mxu0  ;;  %v7447_v5 = vpop.f32.mrb[21].mxu1  ;;  %7463 = vmatpush3.bf16.msra.mxu1 %v8360_v60  ;;  %v8368_v0 = vld [vmem:[#allocation25 + $0x3ac] ss:$12 sps:$4 sm:$0xff]  }
 0x69e   :  { %v3818_v6 = vadd.f32 %v7426_v63, %v7002_v22  ;;  %v7448_v23 = vadd.f32 %v7447_v5, %v7446_v1  ;;  %v7449_v7 = vpop.f32.mrb[22].mxu1  ;;  %v8363_v22 = vld [vmem:[#allocation25 + $0x394] ss:$12 sps:$4 sm:$0xff]   ;;  %v8365_v63 = vld [vmem:[#allocation25 + $0x2d8] ss:$12 sps:$4 sm:$0xff]   ;;  %7464 = vmatprep.subr.bf16.mxu1 %v8364_v61 }
 0x69f   :  { %v7450_v9 = vpop.f32.mrb[23].mxu1  ;;  %5463 = vmatprep.subr.bf16.mxu0 %v8363_v22  ;;  %v8369_v1 = vld [vmem:[#allocation25 + $0x3b0] ss:$12 sps:$4 sm:$0xff]  }
 0x6a0   :  { %v9441_v11 = vadd.f32 %v7448_v23, %v3818_v6  ;;  %5464 = vmatpush1.bf16.msra.mxu0 %v8361_v62  ;;  %v8370_v4 = vld [vmem:[#allocation25 + $0x2f0] ss:$12 sps:$4 sm:$0xff]  }
 0x6a1   :  { %7465 = vmatpush3.bf16.msra.mxu1 %v8365_v63  ;;  %5465 = vmatprep.subr.bf16.mxu0 %v8368_v0  ;;  %v8373_v5 = vld [vmem:[#allocation25 + $0x3c4] ss:$12 sps:$4 sm:$0xff]  }
 0x6a2   :  { %7466 = vmatprep.subr.bf16.mxu1 %v8369_v1  ;;  %v7035_v6 = vld [vmem:[%s9620_s19 + $0x4] sm:$0xf] }
 0x6a3   :  { %v4003_v23 = vrot.slane %v7035_v6, %v9334_v50  ;;  %v4007_v7 = vrot.slane %v7035_v6, %v9342_v52  ;;  %v4011_v9 = vrot.slane %v7035_v6, %v9356_v8  ;;  %v4015_v12 = vrot.slane %v7035_v6, %v9345_v53 }
 0x6a4   :  { %5466 = vmatpush1.bf16.msra.mxu0 %v8366_v3 }
 0x6a5   :  { %7467 = vmatpush3.bf16.msra.mxu1 %v8370_v4  ;;  %5476 = vmatprep.subr.bf16.mxu0 %v8373_v5 }
 0x6a6   :  { %7629 = vmatprep.subr.bf16.mxu1 %v8934_v40 }
 0x71a   :  { %v4735_v10 = vpop.f32.mrb[32].mxu0 }
 0x71b   :  { %v7695_v13 = vadd.f32 %v4735_v10, %v4003_v23  ;;  %v4737_v14 = vpop.f32.mrb[33].mxu0 }
 0x71c   :  { %v7696_v15 = vadd.f32 %v4737_v14, %v4007_v7  ;;  %v4739_v16 = vpop.f32.mrb[34].mxu0  ;;  %v4817_v17 = vpop.f32.mrb[24].mxu1 }
 0x71d   :  { %v4824_v18 = vsel %vm2719_vm1, %v7695_v13, -inf  ;;  %v7697_v20 = vadd.f32 %v4817_v17, %v4011_v9  ;;  %v4740_v24 = vpop.f32.mrb[35].mxu0  ;;  %v4819_v25 = vpop.f32.mrb[25].mxu1 }
 0x71e   :  { %v4825_v27 = vrot.slane %v4824_v18, 4  ;;  %v4831_v30 = vsel %vm2719_vm1, %v7696_v15, -inf  ;;  %v7698_v58 = vadd.f32 %v4819_v25, %v4015_v12  ;;  %v4821_v31 = vpop.f32.mrb[26].mxu1 }
 0x71f   :  { %v4832_v32 = vrot.slane %v4831_v30, 4  ;;  %v4838_v35 = vsel %vm2719_vm1, %v7697_v20, -inf  ;;  %v4822_v21 = vpop.f32.mrb[27].mxu1 }
 0x720   :  { %v4826_v53 = vmax.f32 %v4824_v18, %v4825_v27  ;;  %v4839_v37 = vrot.slane %v4838_v35, 4  ;;  %v4845_v38 = vsel %vm2719_vm1, %v7698_v58, -inf }
 0x721   :  { %v4833_v51 = vmax.f32 %v4831_v30, %v4832_v32  ;;  %v4846_v39 = vrot.slane %v4845_v38, 4 }
 0x722   :  { %v4827_v41 = vrot.slane %v4826_v53, 2  ;;  %v4840_v43 = vmax.f32 %v4838_v35, %v4839_v37 }
 0x723   :  { %v4834_v44 = vrot.slane %v4833_v51, 2  ;;  %v4847_v47 = vmax.f32 %v4845_v38, %v4846_v39 }
 0x724   :  { %v4828_v48 = vmax.f32 %v4826_v53, %v4827_v41  ;;  %v4841_v55 = vrot.slane %v4840_v43, 2 }
 0x725   :  { %v4835_v45 = vmax.f32 %v4833_v51, %v4834_v44  ;;  %v4848_v29 = vrot.slane %v4847_v47, 2 }
 0x726   :  { %v4829_v46 = vrot.slane %v4828_v48, 1  ;;  %v4842_v49 = vmax.f32 %v4840_v43, %v4841_v55 }
 0x727   :  { %v4836_v54 = vrot.slane %v4835_v45, 1  ;;  %v4849_v56 = vmax.f32 %v4847_v47, %v4848_v29 }
 0x728   :  { %v4830_v57 = vmax.f32 %v4828_v48, %v4829_v46  ;;  %v4843_v28 = vrot.slane %v4842_v49, 1 }
 0x729   :  { %v4837_v59 = vmax.f32 %v4835_v45, %v4836_v54  ;;  %v4850_v60 = vrot.slane %v4849_v56, 1 }
 0x72a   :  { %v4852_v22 = vsub.f32 %v7695_v13, %v4830_v57  ;;  %v4844_v61 = vmax.f32 %v4842_v49, %v4843_v28 }
 0x72b   :  { %v4853_v62 = vsub.f32 %v7696_v15, %v4837_v59  ;;  %v4851_v63 = vmax.f32 %v4849_v56, %v4850_v60 }
 0x72c   :  { %v4856_v0 = vmul.f32 1.442695, %v4852_v22  ;;  %v4854_v1 = vsub.f32 %v7697_v20, %v4844_v61 }
 0x72d   :  { %v4858_v3 = vmul.f32 1.442695, %v4853_v62  ;;  %v4855_v4 = vsub.f32 %v7698_v58, %v4851_v63 }
 0x72e   :  { %8499 = vpow2.f32 %v4856_v0  ;;  %v4860_v5 = vmul.f32 1.442695, %v4854_v1 }
 0x72f   :  { %8501 = vpow2.f32 %v4858_v3  ;;  %v4862_v6 = vmul.f32 1.442695, %v4855_v4 }
 0x730   :  { %8503 = vpow2.f32 %v4860_v5 }
 0x731   :  { %8505 = vpow2.f32 %v4862_v6 }
 0x738   :  { %v8500_v23 = vpop.eup %8499 }
 0x739   :  { %v8502_v7 = vpop.eup %8501  ;;  %v4864_v9 = vsel %vm2719_vm1, %v8500_v23, 0.0 }
 0x73a   :  { %v8504_v10 = vpop.eup %8503  ;;  %v4865_v12 = vrot.slane %v4864_v9, 4  ;;  %v4871_v13 = vsel %vm2719_vm1, %v8502_v7, 0.0 }
 0x73b   :  { %v8506_v14 = vpop.eup %8505  ;;  %v4872_v15 = vrot.slane %v4871_v13, 4  ;;  %v4878_v16 = vsel %vm2719_vm1, %v8504_v10, 0.0 }
 0x73c   :  { %v4866_v17 = vadd.f32 %v4865_v12, %v4864_v9  ;;  %v4879_v18 = vrot.slane %v4878_v16, 4  ;;  %v4885_v20 = vsel %vm2719_vm1, %v8506_v14, 0.0 }
 0x73d   :  { %v4873_v24 = vadd.f32 %v4872_v15, %v4871_v13  ;;  %v4886_v25 = vrot.slane %v4885_v20, 4 }
 0x73e   :  { %v4867_v27 = vrot.slane %v4866_v17, 2  ;;  %v4880_v30 = vadd.f32 %v4879_v18, %v4878_v16  ;;  %v8374_v18 = vld [vmem:[#allocation25 + $0x3c8] ss:$12 sps:$4 sm:$0xff]  }
 0x73f   :  { %v4874_v58 = vrot.slane %v4873_v24, 2  ;;  %v4887_v31 = vadd.f32 %v4886_v25, %v4885_v20  ;;  %v8375_v25 = vld [vmem:[#allocation25 + $0x3d8] ss:$12 sps:$4 sm:$0xff]  }
 0x740   :  { %v4868_v32 = vadd.f32 %v4867_v27, %v4866_v17  ;;  %v4881_v35 = vrot.slane %v4880_v30, 2  ;;  %v8371_v17 = vld [vmem:[#allocation25 + $0x3c0] ss:$12 sps:$4 sm:$0xff]  }
 0x741   :  { %v4875_v21 = vadd.f32 %v4874_v58, %v4873_v24  ;;  %v4888_v53 = vrot.slane %v4887_v31, 2  ;;  %v8377_v24 = vld [vmem:[#allocation25 + $0x3dc] ss:$12 sps:$4 sm:$0xff]   ;;  %v8378_v27 = vld [vmem:[#allocation25 + $0x3e0] ss:$12 sps:$4 sm:$0xff]  }
 0x742   :  { %v4869_v37 = vrot.slane %v4868_v32, 1  ;;  %v4882_v38 = vadd.f32 %v4881_v35, %v4880_v30  ;;  %v8381_v30 = vld [vmem:[#allocation25 + $0x3f4] ss:$12 sps:$4 sm:$0xff]   ;;  %v8379_v58 = vld [vmem:[#allocation25 + $0x3f0] ss:$12 sps:$4 sm:$0xff]  }
 0x743   :  { %v4876_v51 = vrot.slane %v4875_v21, 1  ;;  %v4889_v39 = vadd.f32 %v4888_v53, %v4887_v31  ;;  %v8382_v31 = vld [vmem:[#allocation25 + $0x3f8] ss:$12 sps:$4 sm:$0xff]   ;;  %v8383_v35 = vld [vmem:[#allocation25 + $0x408] ss:$12 sps:$4 sm:$0xff]  }
 0x744   :  { %v4870_v41 = vadd.f32 %v4869_v37, %v4868_v32  ;;  %v4883_v43 = vrot.slane %v4882_v38, 1  ;;  %v8385_v32 = vld [vmem:[#allocation25 + $0x40c] ss:$12 sps:$4 sm:$0xff]   ;;  %v8389_v53 = vld [vmem:[#allocation25 + $0x424] ss:$12 sps:$4 sm:$0xff]  }
 0x745   :  { %v4877_v44 = vadd.f32 %v4876_v51, %v4875_v21  ;;  %v4890_v47 = vrot.slane %v4889_v39, 1  ;;  %v8386_v21 = vld [vmem:[#allocation25 + $0x410] ss:$12 sps:$4 sm:$0xff]   ;;  %v8390_v37 = vld [vmem:[#allocation25 + $0x428] ss:$12 sps:$4 sm:$0xff]  }
 0x746   :  { %8507 = vrcp.f32 %v4870_v41  ;;  %v4884_v48 = vadd.f32 %v4883_v43, %v4882_v38  ;;  %v8393_v38 = vld [vmem:[#allocation25 + $0x43c] ss:$12 sps:$4 sm:$0xff]   ;;  %v8391_v51 = vld [vmem:[#allocation25 + $0x438] ss:$12 sps:$4 sm:$0xff]   ;;  %v8397_v41 = vld [vmem:[#allocation25 + $0x454] ss:$12 sps:$4 sm:$0xff]  }
 0x747   :  { %8509 = vrcp.f32 %v4877_v44  ;;  %v4891_v55 = vadd.f32 %v4890_v47, %v4889_v39  ;;  %v8394_v39 = vld [vmem:[#allocation25 + $0x440] ss:$12 sps:$4 sm:$0xff]   ;;  %v8395_v43 = vld [vmem:[#allocation25 + $0x450] ss:$12 sps:$4 sm:$0xff]   ;;  %v8398_v44 = vld [vmem:[#allocation25 + $0x458] ss:$12 sps:$4 sm:$0xff]  }
 0x748   :  { %8511 = vrcp.f32 %v4884_v48  ;;  %v8401_v47 = vld [vmem:[#allocation25 + $0x46c] ss:$12 sps:$4 sm:$0xff]   ;;  %v8399_v48 = vld [vmem:[#allocation25 + $0x468] ss:$12 sps:$4 sm:$0xff]  }
 0x749   :  { %8513 = vrcp.f32 %v4891_v55  ;;  %v8402_v55 = vld [vmem:[#allocation25 + $0x470] ss:$12 sps:$4 sm:$0xff]  }
 0x750   :  { %v8508_v45 = vpop.eup %8507 }
 0x751   :  { %v8510_v29 = vpop.eup %8509  ;;  %v4896_v46 = vmul.f32 %v8508_v45, %v8500_v23 }
 0x752   :  { %v8512_v49 = vpop.eup %8511  ;;  %v4897_v54 = vmul.f32 %v8510_v29, %v8502_v7 }
 0x753   :  { %v8514_v56 = vpop.eup %8513  ;;  %v4898_v57 = vmul.f32 %v8512_v49, %v8504_v10  ;;  %v4900_v28 = vmul.f32 %v4896_v46, %v9315_v33  ;;  %v8403_v46 = vld [vmem:[#allocation27 + $0x140] sm:$0xff]  }
 0x754   :  { %v4901_v59 = vmul.f32 %v4897_v54, %v9315_v33  ;;  %v4899_v60 = vmul.f32 %v8514_v56, %v8506_v14  ;;  %v8404_v49 = vld [vmem:[#allocation27 + $0x100] sm:$0xff]  }
 0x755   :  { %v4902_v22 = vmul.f32 %v4898_v57, %v9315_v33  ;;  %v4907_v61 = vrot.slane %v4900_v28, 6  ;;  %v8405_v54 = vld [vmem:[#allocation27 + $0x1c0] sm:$0xff]   ;;  %v8407_v57 = vld [vmem:[#allocation27 + $0x148] sm:$0xff]  }
 0x756   :  { %v4903_v62 = vmul.f32 %v4899_v60, %v9315_v33  ;;  %v4908_v63 = vrot.slane %v4901_v59, 6  ;;  %v4914_v0 = vrot.slane %v4901_v59, 4  ;;  %v8406_v56 = vld [vmem:[#allocation27 + $0x180] sm:$0xff]   ;;  %v8410_v60 = vld [vmem:[#allocation27 + $0x188] sm:$0xff]  }
 0x757   :  { %v4915_v1 = vrot.slane %v4902_v22, 4  ;;  %v4920_v3 = vrot.slane %v4902_v22, 2  ;;  %v4924_v4 = vsel %vm2719_vm1, 0.0, %v4907_v61  ;;  %v4909_v5 = vrot.slane %v4902_v22, 6  ;;  %v8413_v22 = vld [vmem:[#allocation27 + $0x1d0] sm:$0xff]  }
 0x758   :  { %v4916_v6 = vrot.slane %v4903_v62, 4  ;;  %v4921_v23 = vrot.slane %v4903_v62, 2  ;;  %v4925_v7 = vsel %vm2719_vm1, %v4900_v28, %v4908_v63  ;;  %v4927_v9 = vsel %vm2826_vm2, %v4924_v4, %v4914_v0  ;;  %v8409_v28 = vld [vmem:[#allocation27 + $0x1c8] sm:$0xff]   ;;  %v8412_v61 = vld [vmem:[#allocation27 + $0x110] sm:$0xff]   ;;  %v8415_v63 = vld [vmem:[#allocation27 + $0x158] sm:$0xff]  }
 0x759   :  { %v4928_v10 = vsel %vm2826_vm2, %v4925_v7, %v4915_v1  ;;  %v4930_v12 = vsel %vm2830_vm3, %v4927_v9, %v4920_v3  ;;  %v4926_v13 = vsel %vm2719_vm1, %v4901_v59, %v4909_v5  ;;  %v8408_v59 = vld [vmem:[#allocation27 + $0x108] sm:$0xff]   ;;  %v8414_v62 = vld [vmem:[#allocation27 + $0x190] sm:$0xff]   ;;  %v8417_v0 = vld [vmem:[#allocation27 + $0x1d8] sm:$0xff]  }
 0x75a   :  { %v4931_v14 = vsel %vm2830_vm3, %v4928_v10, %v4921_v23  ;;  %v4929_v15 = vsel %vm2826_vm2, %v4926_v13, %v4916_v6  ;;  %v4933_v20 = vpack.c.bf16 %v4930_v12, %v4930_v12  ;;  %v8416_v1 = vld [vmem:[#allocation27 + $0x118] sm:$0xff]   ;;  %v8419_v4 = vld [vmem:[#allocation27 + $0x160] sm:$0xff]   ;;  %v8423_v7 = vld [vmem:[#allocation27 + $0x168] sm:$0xff]  }
 0x75b   :  { %v4934_v16 = vpack.c.bf16 %v4931_v14, %v4931_v14  ;;  %v4932_v45 = vsel %vm2830_vm3, %v4929_v15, %v9409_v19  ;;  %v8411_v19 = vld [vmem:[#allocation27 + $0x150] sm:$0xff]   ;;  %v8418_v3 = vld [vmem:[#allocation27 + $0x198] sm:$0xff]   ;;  %v8421_v5 = vld [vmem:[#allocation27 + $0x1e0] sm:$0xff]  }
 0x75c   :  { %v4935_v29 = vpack.c.bf16 %v4932_v45, %v4932_v45  ;;  %v8420_v6 = vld [vmem:[#allocation27 + $0x120] sm:$0xff]   ;;  %v8424_v9 = vld [vmem:[#allocation27 + $0x128] sm:$0xff]   ;;  %v8427_v13 = vld [vmem:[#allocation27 + $0x170] sm:$0xff]  }
 0x75d   :  { %5467 = vmatprep.mubr.bf16.mxu0 %v4934_v16  ;;  %5549 = vmatprep.mubr.bf16.mxu1 %v4934_v16  ;;  %v8422_v23 = vld [vmem:[#allocation27 + $0x1a0] sm:$0xff]   ;;  %v8425_v10 = vld [vmem:[#allocation27 + $0x1e8] sm:$0xff]   ;;  %v8428_v14 = vld [vmem:[#allocation27 + $0x130] sm:$0xff]  }
 0x75e   :  { %5468 = vmatmul.mubr.bf16.vlgmr.msra.gmra.mrb[36].mxu0 %v4933_v20  ;;  %5550 = vmatmul.mubr.bf16.vlgmr.msra.gmra.mrb[28].mxu1 %v4933_v20  ;;  %v8426_v12 = vld [vmem:[#allocation27 + $0x1a8] sm:$0xff]   ;;  %v8429_v15 = vld [vmem:[#allocation27 + $0x1f0] sm:$0xff]   ;;  %v8433_v20 = vld [vmem:[#allocation27 + $0x1f8] sm:$0xff]  }
 0x75f   :  { %5477 = vmatpush1.bf16.msra.mxu0 %v8371_v17  ;;  %7630 = vmatpush3.bf16.msra.mxu1 %v8374_v18  ;;  %v8430_v16 = vld [vmem:[#allocation27 + $0x1b0] sm:$0xff]   ;;  %v8431_v17 = vld [vmem:[#allocation27 + $0x178] sm:$0xff]  }
 0x760   :  { %5478 = vmatprep.subr.bf16.mxu0 %v8377_v24  ;;  %7631 = vmatprep.subr.bf16.mxu1 %v8934_v40  ;;  %v8432_v18 = vld [vmem:[#allocation27 + $0x138] sm:$0xff]  }
 0x761   :  { %5508 = vmatprep.mubr.bf16.mxu0 %v8936_v2  ;;  %7645 = vmatprep.mubr.msk.bf16.mxu1 %vm8935_vm0, %v8934_v40  ;;  %v8387_v2 = vld [vmem:[#allocation25 + $0x420] ss:$12 sps:$4 sm:$0xff]   ;;  %v8434_v24 = vld [vmem:[#allocation27 + $0x1b8] sm:$0xff]  }
 0x763   :  { %5479 = vmatpush1.bf16.msra.mxu0 %v8375_v25  ;;  %7632 = vmatpush3.bf16.msra.mxu1 %v8378_v27  ;;  %v8435_v25 = vld [vmem:[#allocation10 + $0x40] sm:$0xff]  }
 0x764   :  { %5480 = vmatprep.subr.bf16.mxu0 %v8381_v30  ;;  %7633 = vmatprep.subr.bf16.mxu1 %v8934_v40 }
 0x767   :  { %5481 = vmatpush1.bf16.msra.mxu0 %v8379_v58  ;;  %7634 = vmatpush3.bf16.msra.mxu1 %v8382_v31 }
 0x768   :  { %5482 = vmatprep.subr.bf16.mxu0 %v8385_v32  ;;  %7635 = vmatprep.subr.bf16.mxu1 %v8934_v40 }
 0x76b   :  { %5483 = vmatpush1.bf16.msra.mxu0 %v8383_v35  ;;  %7636 = vmatpush3.bf16.msra.mxu1 %v8386_v21  ;;  %v7164_v35 = vld [vmem:[%s9622_s21 + $0x3] sm:$0x7] }
 0x76c   :  { %5484 = vmatprep.subr.bf16.mxu0 %v8389_v53  ;;  %7637 = vmatprep.subr.bf16.mxu1 %v8934_v40  ;;  %v5047_v21 = vrot.slane %v7164_v35, %v9356_v8  ;;  %v5039_v53 = vrot.slane %v7164_v35, %v9334_v50 }
 0x76f   :  { %5485 = vmatpush1.bf16.msra.mxu0 %v8387_v2  ;;  %7638 = vmatpush3.bf16.msra.mxu1 %v8390_v37  ;;  %v5043_v2 = vrot.slane %v7164_v35, %v9342_v52 }
 0x770   :  { %5486 = vmatprep.subr.bf16.mxu0 %v8393_v38  ;;  %7639 = vmatprep.subr.bf16.mxu1 %v8934_v40 }
 0x773   :  { %5487 = vmatpush1.bf16.msra.mxu0 %v8391_v51  ;;  %7640 = vmatpush3.bf16.msra.mxu1 %v8394_v39 }
 0x774   :  { %5488 = vmatprep.subr.bf16.mxu0 %v8397_v41  ;;  %7641 = vmatprep.subr.bf16.mxu1 %v8934_v40 }
 0x777   :  { %5489 = vmatpush1.bf16.msra.mxu0 %v8395_v43  ;;  %7642 = vmatpush3.bf16.msra.mxu1 %v8398_v44 }
 0x778   :  { %5490 = vmatprep.subr.bf16.mxu0 %v8401_v47  ;;  %7643 = vmatprep.subr.bf16.mxu1 %v8934_v40 }
 0x77b   :  { %5491 = vmatpush1.bf16.msra.mxu0 %v8399_v48  ;;  %7644 = vmatpush3.bf16.msra.mxu1 %v8402_v55 }
 0x77c   :  { %7483 = vmatprep.subr.bf16.mxu1 %v8403_v46  ;;  %7505 = vmatprep.subr.bf16.mxu0 %v8405_v54 }
 0x77e   :  { %5509 = vmatmul.mubr.bf16.vlgmr.msra.gmra.mrb[36].mxu0 %v4935_v29  ;;  %7646 = vmatmul.mubr.bf16.vlgmr.msra.gmra.mrb[32].mxu1 %v4935_v29 }
 0x77f   :  { %7484 = vmatpush3.bf16.msra.mxu1 %v8404_v49  ;;  %7506 = vmatpush3.bf16.msra.mxu0 %v8406_v56 }
 0x780   :  { %7485 = vmatprep.subr.bf16.mxu1 %v8407_v57  ;;  %7507 = vmatprep.subr.bf16.mxu0 %v8409_v28  ;;  %v3863_v28 = vmax.f32 %v9441_v11, 0.0  ;;  %v8439_v11 = vld [vmem:[#allocation10 + $0x50] sm:$0xff]  }
 0x783   :  { %7486 = vmatpush3.bf16.msra.mxu1 %v8408_v59  ;;  %7508 = vmatpush3.bf16.msra.mxu0 %v8410_v60 }
 0x784   :  { %7487 = vmatprep.subr.bf16.mxu1 %v8411_v19  ;;  %7509 = vmatprep.subr.bf16.mxu0 %v8413_v22 }
 0x787   :  { %7488 = vmatpush3.bf16.msra.mxu1 %v8412_v61  ;;  %7510 = vmatpush3.bf16.msra.mxu0 %v8414_v62 }
 0x788   :  { %7489 = vmatprep.subr.bf16.mxu1 %v8415_v63  ;;  %7511 = vmatprep.subr.bf16.mxu0 %v8417_v0  ;;  %v8436_v63 = vld [vmem:[#allocation10] sm:$0xff]   ;;  %v5968_v0 = vpack.c.bf16 %v3863_v28, %v3863_v28 }
 0x789   :  { %v7271_v28 = vld [vmem:[#allocation12] ss:$0 sm:$0xff] }
 0x78b   :  { %7490 = vmatpush3.bf16.msra.mxu1 %v8416_v1  ;;  %7512 = vmatpush3.bf16.msra.mxu0 %v8418_v3 }
 0x78c   :  { %7491 = vmatprep.subr.bf16.mxu1 %v8419_v4  ;;  %7513 = vmatprep.subr.bf16.mxu0 %v8421_v5  ;;  %v8437_v4 = vld [vmem:[#allocation10 + $0x48] sm:$0xff]  }
 0x78d   :  { %v8438_v5 = vld [vmem:[#allocation10 + $0x8] sm:$0xff]  }
 0x78f   :  { %7492 = vmatpush3.bf16.msra.mxu1 %v8420_v6  ;;  %7514 = vmatpush3.bf16.msra.mxu0 %v8422_v23  ;;  %v8440_v6 = vld [vmem:[#allocation10 + $0x10] sm:$0xff]   ;;  %v8441_v23 = vld [vmem:[#allocation10 + $0x58] sm:$0xff]  }
 0x790   :  { %7493 = vmatprep.subr.bf16.mxu1 %v8423_v7  ;;  %7515 = vmatprep.subr.bf16.mxu0 %v8425_v10  ;;  %v8442_v7 = vld [vmem:[#allocation10 + $0x18] sm:$0xff]   ;;  %v8444_v10 = vld [vmem:[#allocation10 + $0x20] sm:$0xff]  }
 0x793   :  { %7494 = vmatpush3.bf16.msra.mxu1 %v8424_v9  ;;  %7516 = vmatpush3.bf16.msra.mxu0 %v8426_v12  ;;  %v8443_v9 = vld [vmem:[#allocation10 + $0x60] sm:$0xff]   ;;  %v8445_v12 = vld [vmem:[#allocation10 + $0x68] sm:$0xff]  }
 0x794   :  { %7495 = vmatprep.subr.bf16.mxu1 %v8427_v13  ;;  %7517 = vmatprep.subr.bf16.mxu0 %v8429_v15  ;;  %v8446_v13 = vld [vmem:[#allocation10 + $0x28] sm:$0xff]   ;;  %v8448_v15 = vld [vmem:[#allocation10 + $0x30] sm:$0xff]  }
 0x797   :  { %7496 = vmatpush3.bf16.msra.mxu1 %v8428_v14  ;;  %7518 = vmatpush3.bf16.msra.mxu0 %v8430_v16  ;;  %v8447_v14 = vld [vmem:[#allocation10 + $0x70] sm:$0xff]   ;;  %v8449_v16 = vld [vmem:[#allocation10 + $0x78] sm:$0xff]  }
 0x798   :  { %7497 = vmatprep.subr.bf16.mxu1 %v8431_v17  ;;  %7519 = vmatprep.subr.bf16.mxu0 %v8433_v20  ;;  %v8450_v17 = vld [vmem:[#allocation10 + $0x38] sm:$0xff]   ;;  %v8452_v20 = vld [vmem:[#allocation13 + $0x8] sm:$0xff]  }
 0x79b   :  { %7498 = vmatpush3.bf16.msra.mxu1 %v8432_v18  ;;  %7520 = vmatpush3.bf16.msra.mxu0 %v8434_v24  ;;  %v8451_v18 = vld [vmem:[#allocation13] sm:$0xff]   ;;  %v8453_v24 = vld [vmem:[#allocation13 + $0x10] sm:$0xff]  }
 0x79c   :  { %7649 = vmatprep.subr.bf16.mxu0 %v8934_v40  ;;  %7527 = vmatprep.subr.bf16.mxu1 %v8435_v25  ;;  %v8454_v25 = vld [vmem:[#allocation13 + $0x18] sm:$0xff]  }
 0x831   :  { %v7468_v27 = vpop.f32.mrb[28].mxu1 }
 0x832   :  { %v7469_v30 = vpop.f32.mrb[29].mxu1 }
 0x833   :  { %v7470_v58 = vadd.f32 %v7469_v30, %v7468_v27  ;;  %v7471_v31 = vpop.f32.mrb[30].mxu1  ;;  %v8455_v27 = vld [vmem:[#allocation13 + $0x20] sm:$0xff]   ;;  %v8456_v30 = vld [vmem:[#allocation13 + $0x28] sm:$0xff]  }
 0x834   :  { %v7472_v32 = vpop.f32.mrb[31].mxu1  ;;  %v7238_v31 = vld [vmem:[%s9624_s23 + $0x1] ss:$0 sm:$0xff] }
 0x835   :  { %v5552_v37 = vadd.f32 %v7470_v58, %v5047_v21 }
 0x851   :  { %v5510_v38 = vpop.f32.mrb[36].mxu0  ;;  %v5591_v51 = vpop.f32.mrb[32].mxu1 }
 0x852   :  { %v7699_v39 = vadd.f32 %v5510_v38, %v5039_v53  ;;  %v5592_v41 = vadd.f32 %v5591_v51, %v5552_v37  ;;  %v5512_v43 = vpop.f32.mrb[37].mxu0  ;;  %v7647_v44 = vpop.f32.mrb[33].mxu1 }
 0x853   :  { %v7700_v47 = vadd.f32 %v5512_v43, %v5043_v2  ;;  %v5514_v48 = vpop.f32.mrb[38].mxu0  ;;  %v5594_v55 = vpop.f32.mrb[34].mxu1 }
 0x854   :  { %v5600_v45 = vrot.slane %v7699_v39, 2  ;;  %v5602_v29 = vrot.slane %v5592_v41, 2  ;;  %v5515_v46 = vpop.f32.mrb[39].mxu0  ;;  %v7648_v49 = vpop.f32.mrb[35].mxu1  ;;  %v8457_v48 = vld [vmem:[#allocation13 + $0x30] sm:$0xff]   ;;  %v8458_v55 = vld [vmem:[#allocation13 + $0x38] sm:$0xff]  }
 0x855   :  { %v5601_v54 = vrot.slane %v7700_v47, 2  ;;  %v8476_v46 = vld [vmem:[%s9660_s25 + $0x8] sm:$0xff]   ;;  %v8477_v49 = vld [vmem:[%s9660_s25 + $0x10] sm:$0xff]  }
 0x856   :  { %v5606_v8 = vmax.f32 %v7699_v39, %v5600_v45  ;;  %v5608_v56 = vmax.f32 %v5592_v41, %v5602_v29  ;;  %v8459_v45 = vld [vmem:[%s9613_s12 + $0x40] sm:$0xff]  }
 0x857   :  { %v5607_v57 = vmax.f32 %v7700_v47, %v5601_v54  ;;  %v8475_v29 = vld [vmem:[%s9660_s25] sm:$0xff]   ;;  %v8478_v54 = vld [vmem:[%s9660_s25 + $0x18] sm:$0xff]  }
 0x859   :  { %v5609_v59 = vmax.f32 %v5606_v8, %v5607_v57  ;;  %v5610_v60 = vmax.f32 %v5607_v57, %v5608_v56  ;;  %v8479_v8 = vld [vmem:[%s9660_s25 + $0x20] sm:$0xff]   ;;  %v8480_v56 = vld [vmem:[%s9660_s25 + $0x28] sm:$0xff]  }
 0x85b   :  { %v5612_v19 = vrot.slane %v5609_v59, 4  ;;  %v5617_v22 = vpack.c.bf16 %v5609_v59, %v5609_v59  ;;  %v5618_v61 = vpack.c.bf16 %v5610_v60, %v5610_v60  ;;  %v5615_v62 = vrot.slane %v5610_v60, 4 }
 0x85d   :  { %v5619_v1 = vpack.c.bf16 %v5612_v19, %v5612_v19  ;;  %5918 = vmatprep.mubr.bf16.mxu1 %v5618_v61  ;;  %v5620_v3 = vpack.c.bf16 %v5615_v62, %v5615_v62  ;;  %v8460_v62 = vld [vmem:[%s9613_s12] sm:$0xff]  }
 0x85e   :  { %5919 = vmatmul.mubr.bf16.vlgmr.msra.gmra.mrb[36].mxu1 %v5617_v22 }
 0x85f   :  { %5958 = vmatprep.mubr.bf16.mxu0 %v5620_v3  ;;  %6136 = vmatprep.mubr.bf16.mxu1 %v5968_v0  ;;  %v8461_v0 = vld [vmem:[%s9613_s12 + $0x48] sm:$0xff]   ;;  %v8463_v3 = vld [vmem:[%s9613_s12 + $0x50] sm:$0xff]  }
 0x860   :  { %5959 = vmatmul.mubr.bf16.vlgmr.msra.gmra.mrb[40].mxu0 %v5619_v1  ;;  %7528 = vmatpush3.bf16.msra.mxu1 %v8436_v63  ;;  %v8462_v1 = vld [vmem:[%s9613_s12 + $0x8] sm:$0xff]  }
 0x861   :  { %7529 = vmatprep.subr.bf16.mxu1 %v8437_v4  ;;  %7665 = vmatprep.mubr.msk.bf16.mxu0 %vm8935_vm0, %v8934_v40  ;;  %v8464_v4 = vld [vmem:[%s9613_s12 + $0x10] sm:$0xff]  }
 0x862   :  { %7650 = vmatpush3.bf16.msra.mxu0 %v8451_v18 }
 0x863   :  { %7651 = vmatprep.subr.bf16.mxu0 %v8934_v40 }
 0x864   :  { %7530 = vmatpush3.bf16.msra.mxu1 %v8438_v5  ;;  %v8465_v5 = vld [vmem:[%s9613_s12 + $0x58] sm:$0xff]  }
 0x865   :  { %7531 = vmatprep.subr.bf16.mxu1 %v8439_v11  ;;  %v8467_v11 = vld [vmem:[%s9613_s12 + $0x60] sm:$0xff]  }
 0x866   :  { %7652 = vmatpush3.bf16.msra.mxu0 %v8452_v20 }
 0x867   :  { %7653 = vmatprep.subr.bf16.mxu0 %v8934_v40 }
 0x868   :  { %7532 = vmatpush3.bf16.msra.mxu1 %v8440_v6  ;;  %v8468_v6 = vld [vmem:[%s9613_s12 + $0x20] sm:$0xff]  }
 0x869   :  { %7533 = vmatprep.subr.bf16.mxu1 %v8441_v23  ;;  %v8469_v23 = vld [vmem:[%s9613_s12 + $0x68] sm:$0xff]  }
 0x86a   :  { %7654 = vmatpush3.bf16.msra.mxu0 %v8453_v24 }
 0x86b   :  { %7655 = vmatprep.subr.bf16.mxu0 %v8934_v40 }
 0x86c   :  { %7534 = vmatpush3.bf16.msra.mxu1 %v8442_v7  ;;  %v8470_v7 = vld [vmem:[%s9613_s12 + $0x28] sm:$0xff]  }
 0x86d   :  { %7535 = vmatprep.subr.bf16.mxu1 %v8443_v9  ;;  %v8471_v9 = vld [vmem:[%s9613_s12 + $0x70] sm:$0xff]  }
 0x86e   :  { %7656 = vmatpush3.bf16.msra.mxu0 %v8454_v25 }
 0x86f   :  { %7657 = vmatprep.subr.bf16.mxu0 %v8934_v40 }
 0x870   :  { %7536 = vmatpush3.bf16.msra.mxu1 %v8444_v10  ;;  %v8472_v10 = vld [vmem:[%s9613_s12 + $0x30] sm:$0xff]  }
 0x871   :  { %7537 = vmatprep.subr.bf16.mxu1 %v8445_v12  ;;  %v8473_v12 = vld [vmem:[%s9613_s12 + $0x78] sm:$0xff]  }
 0x872   :  { %7658 = vmatpush3.bf16.msra.mxu0 %v8455_v27 }
 0x873   :  { %7659 = vmatprep.subr.bf16.mxu0 %v8934_v40 }
 0x874   :  { %7538 = vmatpush3.bf16.msra.mxu1 %v8446_v13  ;;  %v8474_v13 = vld [vmem:[%s9613_s12 + $0x38] sm:$0xff]  }
 0x875   :  { %7539 = vmatprep.subr.bf16.mxu1 %v8447_v14  ;;  %v8481_v14 = vld [vmem:[%s9660_s25 + $0x30] sm:$0xff]  }
 0x876   :  { %7660 = vmatpush3.bf16.msra.mxu0 %v8456_v30 }
 0x877   :  { %7661 = vmatprep.subr.bf16.mxu0 %v8934_v40 }
 0x878   :  { %7540 = vmatpush3.bf16.msra.mxu1 %v8448_v15  ;;  %v8482_v15 = vld [vmem:[%s9660_s25 + $0x38] sm:$0xff]  }
 0x879   :  { %7541 = vmatprep.subr.bf16.mxu1 %v8449_v16  ;;  %v7288_v16 = vld [vmem:[#allocation15] ss:$0 sm:$0xff] }
 0x87a   :  { %7662 = vmatpush3.bf16.msra.mxu0 %v8457_v48 }
 0x87b   :  { %7663 = vmatprep.subr.bf16.mxu0 %v8934_v40 }
 0x87c   :  { %7542 = vmatpush3.bf16.msra.mxu1 %v8450_v17 }
 0x87d   :  { %7669 = vmatprep.subr.bf16.mxu1 %v8934_v40 }
 0x87e   :  { %7664 = vmatpush3.bf16.msra.mxu0 %v8458_v55 }
 0x87f   :  { %7567 = vmatprep.subr.bf16.mxu0 %v8459_v45 }
 0x931   :  { %v7499_v58 = vpop.f32.mrb[36].mxu1 }
 0x932   :  { %v7500_v32 = vpop.f32.mrb[37].mxu1 }
 0x933   :  { %v7501_v35 = vadd.f32 %v7500_v32, %v7499_v58  ;;  %v7502_v21 = vpop.f32.mrb[38].mxu1  ;;  %v7521_v53 = vpop.f32.mrb[40].mxu0 }
 0x934   :  { %v7503_v2 = vpop.f32.mrb[39].mxu1  ;;  %v7522_v37 = vpop.f32.mrb[41].mxu0  ;;  %v7306_v21 = vld [vmem:[#allocation18] ss:$0 sm:$0xff] }
 0x935   :  { %v5921_v38 = vadd.f32 %v7501_v35, %v7238_v31  ;;  %v7523_v51 = vadd.f32 %v7522_v37, %v7521_v53  ;;  %v7524_v39 = vpop.f32.mrb[42].mxu0 }
 0x936   :  { %v7525_v41 = vpop.f32.mrb[43].mxu0 }
 0x937   :  { %v5961_v43 = vadd.f32 %v7523_v51, %v5921_v38  ;;  %v6552_v41 = vld [vmem:[#allocation19] sm:$0x3] }
 0x939   :  { %v5966_v44 = vmax.f32 %v5961_v43, 0.0 }
 0x93b   :  { %v5967_v47 = vpack.c.bf16 %v5966_v44, %v5966_v44  ;;  %v6557_v44 = vrot.slane %v6552_v41, %v9334_v50  ;;  %v7323_v50 = vld [vmem:[#allocation21] ss:$0 sm:$0xff] }
 0x93d   :  { %6137 = vmatmul.mubr.bf16.vlgmr.msra.gmra.mrb[40].mxu1 %v5967_v47 }
 0x93e   :  { %7685 = vmatprep.mubr.msk.bf16.mxu1 %vm8935_vm0, %v8934_v40  ;;  %7670 = vmatpush3.bf16.msra.mxu1 %v8475_v29 }
 0x93f   :  { %7671 = vmatprep.subr.bf16.mxu1 %v8934_v40 }
 0x942   :  { %7672 = vmatpush3.bf16.msra.mxu1 %v8476_v46 }
 0x943   :  { %7673 = vmatprep.subr.bf16.mxu1 %v8934_v40 }
 0x946   :  { %7674 = vmatpush3.bf16.msra.mxu1 %v8477_v49  ;;  %v6561_v49 = vrot.slane %v6552_v41, %v9342_v52 }
 0x947   :  { %7675 = vmatprep.subr.bf16.mxu1 %v8934_v40 }
 0x94a   :  { %7676 = vmatpush3.bf16.msra.mxu1 %v8478_v54 }
 0x94b   :  { %7677 = vmatprep.subr.bf16.mxu1 %v8934_v40 }
 0x94e   :  { %7678 = vmatpush3.bf16.msra.mxu1 %v8479_v8 }
 0x94f   :  { %7679 = vmatprep.subr.bf16.mxu1 %v8934_v40 }
 0x952   :  { %7680 = vmatpush3.bf16.msra.mxu1 %v8480_v56 }
 0x953   :  { %7681 = vmatprep.subr.bf16.mxu1 %v8934_v40 }
 0x956   :  { %7682 = vmatpush3.bf16.msra.mxu1 %v8481_v14 }
 0x957   :  { %7683 = vmatprep.subr.bf16.mxu1 %v8934_v40  ;;  %v6597_v40 = vrot.slane %v9315_v33, %v9296_v34 }
 0x95a   :  { %7684 = vmatpush3.bf16.msra.mxu1 %v8482_v15 }
 0xa10   :  { %v7543_v57 = vpop.f32.mrb[40].mxu1 }
 0xa11   :  { %v7544_v59 = vpop.f32.mrb[41].mxu1 }
 0xa12   :  { %v7545_v60 = vadd.f32 %v7544_v59, %v7543_v57  ;;  %v7546_v19 = vpop.f32.mrb[42].mxu1 }
 0xa13   :  { %v7547_v22 = vpop.f32.mrb[43].mxu1 }
 0xa14   :  { %v6139_v61 = vadd.f32 %v7545_v60, %v7271_v28 }
 0xa16   :  { %v6144_v63 = vpack.c.bf16 %v6139_v61, %v6139_v61 }
 0xa18   :  { %7666 = vmatmul.mubr.bf16.vlgmr.msra.gmra.mrb[44].mxu0 %v6144_v63 }
 0xa19   :  { %7568 = vmatpush3.bf16.msra.mxu0 %v8460_v62  ;;  %6537 = vmatprep.mubr.bf16.mxu0 %v9319_v36  ;;  %v8466_v36 = vld [vmem:[%s9613_s12 + $0x18] sm:$0xff]  }
 0xa1a   :  { %7569 = vmatprep.subr.bf16.mxu0 %v8461_v0 }
 0xa1d   :  { %7570 = vmatpush3.bf16.msra.mxu0 %v8462_v1 }
 0xa1e   :  { %7571 = vmatprep.subr.bf16.mxu0 %v8463_v3 }
 0xa21   :  { %7572 = vmatpush3.bf16.msra.mxu0 %v8464_v4 }
 0xa22   :  { %7573 = vmatprep.subr.bf16.mxu0 %v8465_v5 }
 0xa25   :  { %7574 = vmatpush3.bf16.msra.mxu0 %v8466_v36 }
 0xa26   :  { %7575 = vmatprep.subr.bf16.mxu0 %v8467_v11 }
 0xa29   :  { %7576 = vmatpush3.bf16.msra.mxu0 %v8468_v6 }
 0xa2a   :  { %7577 = vmatprep.subr.bf16.mxu0 %v8469_v23 }
 0xa2d   :  { %7578 = vmatpush3.bf16.msra.mxu0 %v8470_v7 }
 0xa2e   :  { %7579 = vmatprep.subr.bf16.mxu0 %v8471_v9 }
 0xa31   :  { %7580 = vmatpush3.bf16.msra.mxu0 %v8472_v10 }
 0xa32   :  { %7581 = vmatprep.subr.bf16.mxu0 %v8473_v12 }
 0xa35   :  { %7582 = vmatpush3.bf16.msra.mxu0 %v8474_v13 }
 0xa38   :  { %6538 = vmatmul.mubr.bf16.vlgmr.msra.gmra.mrb[48].mxu0 %v9323_v42 }
 0xaeb   :  { %v6250_v17 = vpop.f32.mrb[44].mxu0 }
 0xaec   :  { %v6251_v18 = vadd.f32 %v7288_v16, %v6250_v17  ;;  %v7667_v20 = vpop.f32.mrb[45].mxu0 }
 0xaed   :  { %v6253_v24 = vpop.f32.mrb[46].mxu0 }
 0xaee   :  { %v6256_v25 = vmax.f32 %v6251_v18, 0.0  ;;  %v7668_v27 = vpop.f32.mrb[47].mxu0 }
 0xaf0   :  { %v6257_v42 = vpack.c.bf16 %v6256_v25, %v6256_v25  ;;  %v6583_v30 = vcombine.low %v6256_v25, %v9313_v26  ;;  %v7297_v26 = vld [vmem:[#allocation16] ss:$0 sm:$0xff] }
 0xaf2   :  { %v6590_v58 = vrot.slane %v6583_v30, %v9296_v34  ;;  %7686 = vmatmul.mubr.bf16.vlgmr.msra.gmra.mrb[44].mxu1 %v6257_v42 }
 0xaf4   :  { %v6598_v31 = vcombine.low %v6590_v58, %v6597_v40 }
 0xaf6   :  { %6600 = vst [vmem:[%s9661_s17] sm:$0x3f] %v6598_v31 }
 0xb0b   :  { %v7583_v32 = vpop.f32.mrb[48].mxu0 }
 0xb0c   :  { %v7584_v35 = vpop.f32.mrb[49].mxu0 }
 0xb0d   :  { %v7585_v53 = vadd.f32 %v7584_v35, %v7583_v32  ;;  %v7586_v2 = vpop.f32.mrb[50].mxu0 }
 0xb0e   :  { %v7587_v37 = vpop.f32.mrb[51].mxu0 }
 0xb0f   :  { %v6540_v38 = vadd.f32 %v7585_v53, %v7306_v21 }
 0xb11   :  { %v6545_v51 = vmax.f32 %v6540_v38, 0.0 }
 0xb13   :  { %6547 = vrot.lane.b32.xlu0 %v6545_v51, %s8909_s28 }
 0xb85   :  { %v6548_v55 = vpop.permute.xlu0 %6547 }
 0xb86   :  { %v6565_v54 = vmul.f32 %v6561_v49, %v6548_v55 }
 0xb88   :  { %v6577_v8 = vsel %vm6566_vm5, %v6565_v54, 0.0 }
 0xbc5   :  { %v6363_v39 = vpop.f32.mrb[44].mxu1 }
 0xbc6   :  { %v6364_v34 = vadd.f32 %v7297_v26, %v6363_v39  ;;  %v7687_v33 = vpop.f32.mrb[45].mxu1 }
 0xbc7   :  { %v6366_v43 = vpop.f32.mrb[46].mxu1 }
 0xbc8   :  { %v6369_v47 = vmax.f32 %v6364_v34, 0.0  ;;  %v7688_v48 = vpop.f32.mrb[47].mxu1 }
 0xbca   :  { %v6551_v45 = vsel %vm6550_vm4, %v6369_v47, %v6548_v55 }
 0xbcb   :  { %v6564_v29 = vmul.f32 %v6557_v44, %v6551_v45 }
 0xbcd   :  { %6571 = vrot.lane.b32.xlu0 %v6564_v29, %s8909_s28  ;;  %v6567_v46 = vsel %vm6566_vm5, %v6564_v29, 0.0 }
 0xbce   :  { %6568 = vadd.xlane.f32.xlu1 %v6567_v46 }
 0xbec   :  { %6578 = vadd.xlane.f32.xlu0 %v6577_v8 }
 0xc3f   :  { %v6572_v56 = vpop.permute.xlu0 %6571 }
 0xc40   :  { %v6574_v57 = vsel %vm6566_vm5, %v6572_v56, 0.0 }
 0xc41   :  { %6575 = vadd.xlane.f32.xlu1 %v6574_v57 }
 0xc5b   :  { %v6569_v28 = vpop.xlane.xlu1 %6568 }
 0xc79   :  { %v6579_v60 = vpop.xlane.xlu0 %6578 }
 0xcce   :  { %v6576_v59 = vpop.xlane.xlu1 %6575 }
 0xccf   :  { %v6602_v19 = vsel %vm6601_vm6, %v6569_v28, %v6576_v59 }
 0xcd0   :  { %v6604_v22 = vsel %vm6603_vm7, %v6602_v19, %v6579_v60 }
 0xcd1   :  { %v6612_v61 = vadd.f32 %v7323_v50, %v6604_v22 }
 0xcd3   :  { %6614 = vst.msk [vmem:[%s9662_s14] sm:$0x3] %vm6613_vm8, %v6612_v61 }
 0xcd4   :  { %6623 = vsyncpa [#allocation3], 1 }
 0xcd5   :  { %6624 = vsyncpa [#allocation5], 1 }
 0xcd6   :  { %6625 = vsyncpa [#allocation8], 1 }
 0xcd7   :  { %6626 = vsyncpa [#allocation11], 1 }
 0xcd8   :  { %6627 = vsyncpa [#allocation14], 1 }
 0xcd9   :  { %6628 = vsyncpa [#allocation17], 1 }
 0xcda   :  { %6629 = vsyncpa [#allocation20], 1 }
 0xcdb   :  { %6630 = vsyncpa [#allocation23], 1 }
 0xcdc   :  { %6631 = vsyncpa [#allocation26], 1 }

</bundles_post_ra>
